<compile_context>
chip_gen: v5e
topology: v5e:2x2
jax: 0.10.0
libtpu: 0.0.40
codegen_flags: <defaults>
</compile_context>

<pallas_src>
import functools
import math

import jax
import jax.numpy as jnp
from jax import lax
from jax.experimental import pallas as pl
from jax.experimental.pallas import tpu as pltpu

_MXU_DTYPE = jnp.bfloat16          # matmul operand dtype (accumulation is always float32)


def _sigmoid(x):
    return 1.0 / (1.0 + jnp.exp(-x))


def _bn_fold(gamma, beta, rm, rv, eps=1e-5):
    sc = gamma / jnp.sqrt(rv + eps)
    return sc.reshape(1, -1), (beta - rm * sc).reshape(1, -1)


def _surviving_taps(H, W, rate):
    """3x3 dilated-conv taps that can reach at least one in-bounds pixel."""
    taps = []
    for ky in range(3):
        dy = (ky - 1) * rate
        if not (-H < dy < H):
            continue
        for kx in range(3):
            dx = (kx - 1) * rate
            if not (-W < dx < W):
                continue
            taps.append((ky, kx, dy, dx))
    return tuple(taps)


# ---------------------------------------------------------------------------
# Fused SMA kernel.  grid=(L,): program l handles target position l.
# Row layout of q/k/v/output: m = l * (H*W) + (i*W + j)   (NHWC-flat, channels on lanes)
# ---------------------------------------------------------------------------
def _sma_kernel(q_ref, k_ref, v_ref,
                wq_ref, bq_ref, wkv_ref, bkv_ref, hmask_ref, wo_ref, bo_ref,
                wpa_ref, pa_sc_ref, pa_sh_ref,
                caw1_ref, caw2_ref,
                wsa0_ref, wsa1_ref, wsa2_ref, wsa3_ref,
                bsa_ref, sa_sc_ref, sa_sh_ref,
                wsaout_ref, bsaout_ref,
                woc_ref, boc_ref, nsc_ref, nsh_ref, modb_ref,
                o_ref,
                *, L, H, W, C, taps_per_rate):
    f32 = jnp.float32
    cdt = _MXU_DTYPE
    N = H * W
    E = C

    # ------------- nn.MultiheadAttention (this program = one target position) -------------
    # 1/sqrt(head_dim) is folded into wq/bq; hmask is the 0/1 block-diagonal head mask.
    qp = (jnp.dot(q_ref[...].astype(cdt), wq_ref[...], preferred_element_type=f32)
          + bq_ref[...])                                                       # (N, E)
    kv_in = jnp.concatenate([k_ref[...], v_ref[...]], axis=1).astype(cdt)      # (L*N, 2E)
    kvp = (jnp.dot(kv_in, wkv_ref[...], preferred_element_type=f32)
           + bkv_ref[...])                                                     # (L*N, 2E)
    kp, vp = kvp[:, :E], kvp[:, E:]

    # per-head q.k scores for all L source positions in one lane-dense matmul
    qk = jnp.concatenate([qp * kp[j * N:(j + 1) * N] for j in range(L)], axis=0)
    sc_all = jnp.dot(qk.astype(cdt), hmask_ref[...], preferred_element_type=f32)
    scores = [sc_all[j * N:(j + 1) * N] for j in range(L)]
    m = scores[0]
    for j in range(1, L):
        m = jnp.maximum(m, scores[j])
    exps = [jnp.exp(s - m) for s in scores]
    den = exps[0]
    for j in range(1, L):
        den = den + exps[j]
    inv = pl.reciprocal(den, approx=True)
    ctx = (exps[0] * inv) * vp[0:N]
    for j in range(1, L):
        ctx = ctx + (exps[j] * inv) * vp[j * N:(j + 1) * N]
    x_blk = (jnp.dot(ctx.astype(cdt), wo_ref[...], preferred_element_type=f32)
             + bo_ref[...])                                                    # (N, C) MSA out

    # ------------- Modulator (eval mode), NHWC-flat (N, C) for this image ------------------
    xb = x_blk.astype(cdt)
    row_j = lax.broadcasted_iota(jnp.int32, (N, 1), 0) % W        # pixel column per row

    # PA = x * sigmoid(BN(conv1x1(x)))
    pa = x_blk * _sigmoid(
        jnp.dot(xb, wpa_ref[...], preferred_element_type=f32) * pa_sc_ref[...]
        + pa_sh_ref[...])

    # CA = x * sigmoid(W2 relu(W1 avgpool(x)))
    xm = jnp.mean(x_blk, axis=0, keepdims=True)                                # (1, C)
    h1 = jnp.maximum(jnp.dot(xm, caw1_ref[...], preferred_element_type=f32), 0.0)
    gate = _sigmoid(jnp.dot(h1, caw2_ref[...], preferred_element_type=f32))    # (1, C)
    ca = x_blk * gate

    # SA: 4 dilated 3x3 convs (Conv -> ReLU -> BN) -> shared 1x1 out-conv.
    # Shifted inputs come from one 8-aligned zero-padded copy of x; the surviving taps of
    # each rate are lane-stacked into a single (N, T*C)@(T*C, C) matmul.
    all_offs = [dy * W + dx for taps in taps_per_rate for (_, _, dy, dx) in taps]
    max_off = max(abs(o) for o in all_offs)
    P = ((max_off + 7) // 8) * 8
    if P > 0:
        zpad = jnp.zeros((P, C), f32)
        xpad = jnp.concatenate([zpad, x_blk, zpad], axis=0)        # aligned concat
    wsa_refs = (wsa0_ref, wsa1_ref, wsa2_ref, wsa3_ref)
    ys = []
    for r, taps in enumerate(taps_per_rate):
        cols = []
        for (_ky, _kx, dy, dx) in taps:
            off = dy * W + dx
            if off == 0:
                sh = x_blk
            else:
                sh = xpad[P + off:P + off + N, :]                  # zero-padded row shift
            if dx != 0:                                            # column wrap needs a mask;
                ok = (row_j + dx >= 0) & (row_j + dx < W)          # row overflow handled by pad
                sh = jnp.where(ok, sh, 0.0)
            cols.append(sh)
        stk = cols[0] if len(cols) == 1 else jnp.concatenate(cols, axis=1)
        conv = (jnp.dot(stk.astype(cdt), wsa_refs[r][...], preferred_element_type=f32)
                + bsa_ref[r])
        y = jnp.maximum(conv, 0.0) * sa_sc_ref[r] + sa_sh_ref[r]   # Conv -> ReLU -> BN (eval)
        ys.append(y.astype(cdt))
    sa = (jnp.dot(jnp.concatenate(ys, axis=1), wsaout_ref[...],
                  preferred_element_type=f32) + bsaout_ref[...])                # (N, C)

    # pa_ca = softmax(pa @ ca, dim=-1) ; out = pa_ca @ sa
    # batched (H,W)@(W,W) per channel, on the VPU: channels stay on lanes, W-wide
    # contractions unrolled, softmax max/sum as sublane reductions.
    pa3 = pa.reshape(H, W, C)
    ca3 = ca.reshape(H, W, C)
    sa3 = sa.reshape(H, W, C)
    s = pa3[:, 0:1, :] * ca3[0:1]
    for kk in range(1, W):
        s = s + pa3[:, kk:kk + 1, :] * ca3[kk:kk + 1]
    p = jnp.exp(s - jnp.max(s, axis=1, keepdims=True))
    p = p * pl.reciprocal(jnp.sum(p, axis=1, keepdims=True), approx=True)
    out3 = p[:, 0:1, :] * sa3[0:1]
    for kk in range(1, W):
        out3 = out3 + p[:, kk:kk + 1, :] * sa3[kk:kk + 1]
    out_blk = out3.reshape(N, C)

    # out = BN(output_conv(out)) + bias + residual
    t = (jnp.dot(out_blk.astype(cdt), woc_ref[...], preferred_element_type=f32)
         + boc_ref[...])
    t = t * nsc_ref[...] + nsh_ref[...]
    o_ref[...] = (t + modb_ref[...] + x_blk).astype(o_ref.dtype)


# ---------------------------------------------------------------------------
# Parameter init (matches the PyTorch module structure; BN in eval mode)
# ---------------------------------------------------------------------------
def init_params(rng, E):
    C = E
    ks = jax.random.split(rng, 16)

    def kaiming(k, shape, fan_out):
        return jax.random.normal(k, shape, jnp.float32) * math.sqrt(2.0 / fan_out)

    bn_default = lambda: (jnp.ones((C,), jnp.float32), jnp.zeros((C,), jnp.float32),
                          jnp.zeros((C,), jnp.float32), jnp.ones((C,), jnp.float32))
    p = {}
    # nn.MultiheadAttention
    p['in_proj_w'] = jax.random.normal(ks[0], (3 * E, E), jnp.float32) * math.sqrt(1.0 / E)
    p['in_proj_b'] = jnp.zeros((3 * E,), jnp.float32)
    p['out_proj_w'] = jax.random.normal(ks[1], (E, E), jnp.float32) * math.sqrt(1.0 / E)
    p['out_proj_b'] = jnp.zeros((E,), jnp.float32)
    # Modulator
    p['mod_bias'] = jnp.zeros((C,), jnp.float32)
    p['ca_w1'] = kaiming(ks[2], (C // 16, C), C // 16)          # Linear(C, C//16)
    p['ca_w2'] = kaiming(ks[3], (C, C // 16), C)                # Linear(C//16, C)
    p['pa_conv_w'] = kaiming(ks[4], (C, C, 1, 1), C)
    p['pa_bn'] = bn_default()
    p['sa_conv_w'] = [kaiming(ks[5 + i], (C, C, 3, 3), C * 9) for i in range(4)]
    p['sa_conv_b'] = [jnp.zeros((C,), jnp.float32) for _ in range(4)]
    p['sa_bn'] = [bn_default() for _ in range(4)]
    p['sa_out_w'] = kaiming(ks[9], (C, 4 * C, 1, 1), C)
    p['sa_out_b'] = jnp.zeros((C,), jnp.float32)
    p['out_conv_w'] = kaiming(ks[10], (C, C, 1, 1), C)
    p['out_conv_b'] = jnp.zeros((C,), jnp.float32)
    p['norm_bn'] = bn_default()
    return p


# ---------------------------------------------------------------------------
# SMA forward wrapper: weight folding / rearranging + one pallas_call, grid=(L,)
# ---------------------------------------------------------------------------
def sma_forward(value, key, query, params, *, num_heads):
    L, Nb, E = query.shape            # torch batch_first=False: (L, N, E)
    C = E
    Hs = int(round(math.sqrt(Nb)))
    assert Hs * Hs == Nb, "seq dim (torch 'seq_len') must be a perfect square"
    assert E % num_heads == 0
    hd = E // num_heads
    Ws = Hs
    N = Hs * Ws
    M = L * N
    cdt = _MXU_DTYPE
    rates = (1, 6, 12, 18)

    # --- MHA weights: fold 1/sqrt(hd) into the q projection; fuse K|V via block-diag ---
    Wip, bip = params['in_proj_w'], params['in_proj_b']
    scale = 1.0 / math.sqrt(hd)
    w_q = (Wip[:E].T * scale).astype(cdt)
    b_q = (bip[:E] * scale).reshape(1, E)
    zero = jnp.zeros((E, E), jnp.float32)
    w_kv = jnp.block([[Wip[E:2 * E].T, zero],
                      [zero, Wip[2 * E:].T]]).astype(cdt)                       # (2E, 2E)
    b_kv = jnp.concatenate([bip[E:2 * E], bip[2 * E:]]).reshape(1, 2 * E)
    hmask = jnp.kron(jnp.eye(num_heads, dtype=jnp.float32),
                     jnp.ones((hd, hd), jnp.float32)).astype(cdt)               # (E, E)
    w_o = params['out_proj_w'].T.astype(cdt)
    b_o = params['out_proj_b'].reshape(1, E)

    # --- Modulator weights (BN folded, conv weights rearranged to (Cin, Cout)) ---
    pa_sc, pa_sh = _bn_fold(*params['pa_bn'])
    w_pa = params['pa_conv_w'][:, :, 0, 0].T.astype(cdt)
    ca_w1 = params['ca_w1'].T                                                   # (C, C//16)
    ca_w2 = params['ca_w2'].T                                                   # (C//16, C)

    taps_per_rate = tuple(_surviving_taps(Hs, Ws, r) for r in rates)
    w_sa = []
    for r, taps in enumerate(taps_per_rate):
        wr = params['sa_conv_w'][r]                                             # (Cout, Cin, 3, 3)
        w_sa.append(jnp.concatenate(
            [wr[:, :, ky, kx].T for (ky, kx, _dy, _dx) in taps], axis=0).astype(cdt))
    b_sa = jnp.stack([b.reshape(1, C) for b in params['sa_conv_b']], axis=0)    # (4, 1, C)
    folds = [_bn_fold(*bn) for bn in params['sa_bn']]
    sa_sc = jnp.stack([f[0] for f in folds], axis=0)                            # (4, 1, C)
    sa_sh = jnp.stack([f[1] for f in folds], axis=0)
    w_saout = params['sa_out_w'][:, :, 0, 0].T.astype(cdt)                      # (4C, C)
    b_saout = params['sa_out_b'].reshape(1, C)

    w_oc = params['out_conv_w'][:, :, 0, 0].T.astype(cdt)
    b_oc = params['out_conv_b'].reshape(1, C)
    n_sc, n_sh = _bn_fold(*params['norm_bn'])
    mod_bias = params['mod_bias'].reshape(1, C)

    q2 = query.reshape(M, E)
    k2 = key.reshape(M, E)
    v2 = value.reshape(M, E)

    weights = (w_q, b_q, w_kv, b_kv, hmask, w_o, b_o,
               w_pa, pa_sc, pa_sh, ca_w1, ca_w2,
               w_sa[0], w_sa[1], w_sa[2], w_sa[3],
               b_sa, sa_sc, sa_sh, w_saout, b_saout,
               w_oc, b_oc, n_sc, n_sh, mod_bias)

    def _resident(a):   # whole array, same block every grid step -> stays in VMEM
        return pl.BlockSpec(a.shape, lambda l, nd=a.ndim: (0,) * nd)

    in_specs = [pl.BlockSpec((N, E), lambda l: (l, 0)),          # q: per-target block
                pl.BlockSpec((M, E), lambda l: (0, 0)),          # k: full, resident
                pl.BlockSpec((M, E), lambda l: (0, 0))]          # v: full, resident
    in_specs += [_resident(w) for w in weights]

    kernel = functools.partial(_sma_kernel, L=L, H=Hs, W=Ws, C=C,
                               taps_per_rate=taps_per_rate)
    out = pl.pallas_call(
        kernel,
        grid=(L,),
        in_specs=in_specs,
        out_specs=pl.BlockSpec((N, C), lambda l: (l, 0)),
        out_shape=jax.ShapeDtypeStruct((M, C), jnp.float32),
        compiler_params=pltpu.CompilerParams(dimension_semantics=("parallel",)),
    )(q2, k2, v2, *weights)

    # SMA tail: view(b, feature, -1).permute(0, 2, 1)  ==  a pure row-group reshape here.
    return out.reshape(L, Nb, E)


if __name__ == "__main__":
    feature_size = 32
    num_heads = 4
    L = 2            # torch 'target length' -> becomes Modulator batch
    Nb = 64          # torch 'batch'         -> becomes Modulator spatial (8x8)

    rng = jax.random.PRNGKey(0)
    k_v, k_k, k_q, k_p = jax.random.split(rng, 4)
    value = jax.random.normal(k_v, (L, Nb, feature_size), jnp.float32)
    key_t = jax.random.normal(k_k, (L, Nb, feature_size), jnp.float32)
    query = jax.random.normal(k_q, (L, Nb, feature_size), jnp.float32)
    params = init_params(k_p, feature_size)

    fwd = jax.jit(functools.partial(sma_forward, num_heads=num_heads))
    out = jax.block_until_ready(fwd(value, key_t, query, params))
    assert out.shape == (L, Nb, feature_size)
    assert bool(jnp.all(jnp.isfinite(out)))
    print("KERNEL_OK")
</pallas_src>

<mosaic_0001>
module attributes {stable_mosaic.version = 11 : i64} {
  func.func @_sma_kernel(%arg0: i32, %arg1: memref<64x32xf32, #tpu.memory_space<vmem>>, %arg2: memref<128x32xf32, #tpu.memory_space<vmem>>, %arg3: memref<128x32xf32, #tpu.memory_space<vmem>>, %arg4: memref<32x32xbf16, #tpu.memory_space<vmem>>, %arg5: memref<1x32xf32, #tpu.memory_space<vmem>>, %arg6: memref<64x64xbf16, #tpu.memory_space<vmem>>, %arg7: memref<1x64xf32, #tpu.memory_space<vmem>>, %arg8: memref<32x32xbf16, #tpu.memory_space<vmem>>, %arg9: memref<32x32xbf16, #tpu.memory_space<vmem>>, %arg10: memref<1x32xf32, #tpu.memory_space<vmem>>, %arg11: memref<32x32xbf16, #tpu.memory_space<vmem>>, %arg12: memref<1x32xf32, #tpu.memory_space<vmem>>, %arg13: memref<1x32xf32, #tpu.memory_space<vmem>>, %arg14: memref<32x2xf32, #tpu.memory_space<vmem>>, %arg15: memref<2x32xf32, #tpu.memory_space<vmem>>, %arg16: memref<288x32xbf16, #tpu.memory_space<vmem>>, %arg17: memref<288x32xbf16, #tpu.memory_space<vmem>>, %arg18: memref<32x32xbf16, #tpu.memory_space<vmem>>, %arg19: memref<32x32xbf16, #tpu.memory_space<vmem>>, %arg20: memref<4x1x32xf32, #tpu.memory_space<vmem>>, %arg21: memref<4x1x32xf32, #tpu.memory_space<vmem>>, %arg22: memref<4x1x32xf32, #tpu.memory_space<vmem>>, %arg23: memref<128x32xbf16, #tpu.memory_space<vmem>>, %arg24: memref<1x32xf32, #tpu.memory_space<vmem>>, %arg25: memref<32x32xbf16, #tpu.memory_space<vmem>>, %arg26: memref<1x32xf32, #tpu.memory_space<vmem>>, %arg27: memref<1x32xf32, #tpu.memory_space<vmem>>, %arg28: memref<1x32xf32, #tpu.memory_space<vmem>>, %arg29: memref<1x32xf32, #tpu.memory_space<vmem>>, %arg30: memref<64x32xf32, #tpu.memory_space<vmem>>) attributes {dimension_semantics = [#tpu.dimension_semantics<parallel>], iteration_bounds = array<i64: 2>, scalar_prefetch = 0 : i64, scratch_operands = 0 : i64, tpu.core_type = #tpu.core_type<tc>, window_params = [{transform_indices = @transform_0, window_bounds = array<i64: 64, 32>}, {pipeline_mode = #tpu.pipeline_mode<synchronous>, transform_indices = @transform_1, window_bounds = array<i64: 128, 32>}, {pipeline_mode = #tpu.pipeline_mode<synchronous>, transform_indices = @transform_2, window_bounds = array<i64: 128, 32>}, {pipeline_mode = #tpu.pipeline_mode<synchronous>, transform_indices = @transform_3, window_bounds = array<i64: 32, 32>}, {pipeline_mode = #tpu.pipeline_mode<synchronous>, transform_indices = @transform_4, window_bounds = array<i64: 1, 32>}, {pipeline_mode = #tpu.pipeline_mode<synchronous>, transform_indices = @transform_5, window_bounds = array<i64: 64, 64>}, {pipeline_mode = #tpu.pipeline_mode<synchronous>, transform_indices = @transform_6, window_bounds = array<i64: 1, 64>}, {pipeline_mode = #tpu.pipeline_mode<synchronous>, transform_indices = @transform_7, window_bounds = array<i64: 32, 32>}, {pipeline_mode = #tpu.pipeline_mode<synchronous>, transform_indices = @transform_8, window_bounds = array<i64: 32, 32>}, {pipeline_mode = #tpu.pipeline_mode<synchronous>, transform_indices = @transform_9, window_bounds = array<i64: 1, 32>}, {pipeline_mode = #tpu.pipeline_mode<synchronous>, transform_indices = @transform_10, window_bounds = array<i64: 32, 32>}, {pipeline_mode = #tpu.pipeline_mode<synchronous>, transform_indices = @transform_11, window_bounds = array<i64: 1, 32>}, {pipeline_mode = #tpu.pipeline_mode<synchronous>, transform_indices = @transform_12, window_bounds = array<i64: 1, 32>}, {pipeline_mode = #tpu.pipeline_mode<synchronous>, transform_indices = @transform_13, window_bounds = array<i64: 32, 2>}, {pipeline_mode = #tpu.pipeline_mode<synchronous>, transform_indices = @transform_14, window_bounds = array<i64: 2, 32>}, {pipeline_mode = #tpu.pipeline_mode<synchronous>, transform_indices = @transform_15, window_bounds = array<i64: 288, 32>}, {pipeline_mode = #tpu.pipeline_mode<synchronous>, transform_indices = @transform_16, window_bounds = array<i64: 288, 32>}, {pipeline_mode = #tpu.pipeline_mode<synchronous>, transform_indices = @transform_17, window_bounds = array<i64: 32, 32>}, {pipeline_mode = #tpu.pipeline_mode<synchronous>, transform_indices = @transform_18, window_bounds = array<i64: 32, 32>}, {pipeline_mode = #tpu.pipeline_mode<synchronous>, transform_indices = @transform_19, window_bounds = array<i64: 4, 1, 32>}, {pipeline_mode = #tpu.pipeline_mode<synchronous>, transform_indices = @transform_20, window_bounds = array<i64: 4, 1, 32>}, {pipeline_mode = #tpu.pipeline_mode<synchronous>, transform_indices = @transform_21, window_bounds = array<i64: 4, 1, 32>}, {pipeline_mode = #tpu.pipeline_mode<synchronous>, transform_indices = @transform_22, window_bounds = array<i64: 128, 32>}, {pipeline_mode = #tpu.pipeline_mode<synchronous>, transform_indices = @transform_23, window_bounds = array<i64: 1, 32>}, {pipeline_mode = #tpu.pipeline_mode<synchronous>, transform_indices = @transform_24, window_bounds = array<i64: 32, 32>}, {pipeline_mode = #tpu.pipeline_mode<synchronous>, transform_indices = @transform_25, window_bounds = array<i64: 1, 32>}, {pipeline_mode = #tpu.pipeline_mode<synchronous>, transform_indices = @transform_26, window_bounds = array<i64: 1, 32>}, {pipeline_mode = #tpu.pipeline_mode<synchronous>, transform_indices = @transform_27, window_bounds = array<i64: 1, 32>}, {pipeline_mode = #tpu.pipeline_mode<synchronous>, transform_indices = @transform_28, window_bounds = array<i64: 1, 32>}, {transform_indices = @transform_29, window_bounds = array<i64: 64, 32>}]} {
    %c0 = arith.constant 0 : index
    %c0_0 = arith.constant 0 : index
    %0 = vector.load %arg1[%c0, %c0_0] : memref<64x32xf32, #tpu.memory_space<vmem>>, vector<64x32xf32>
    %1 = arith.truncf %0 : vector<64x32xf32> to vector<64x32xbf16>
    %c0_1 = arith.constant 0 : index
    %c0_2 = arith.constant 0 : index
    %2 = vector.load %arg4[%c0_1, %c0_2] : memref<32x32xbf16, #tpu.memory_space<vmem>>, vector<32x32xbf16>
    %cst = arith.constant dense<0.000000e+00> : vector<64x32xf32>
    %3 = tpu.matmul %1, %2, %cst {dimension_numbers = #tpu.dot_dimension_numbers<[1], [0], [0], [1], [0, 0, 1, 1], [], []>} : vector<64x32xbf16>, vector<32x32xbf16>, vector<64x32xf32> -> vector<64x32xf32>
    %c0_3 = arith.constant 0 : index
    %c0_4 = arith.constant 0 : index
    %4 = vector.load %arg5[%c0_3, %c0_4] : memref<1x32xf32, #tpu.memory_space<vmem>>, vector<1x32xf32>
    %5 = vector.broadcast %4 : vector<1x32xf32> to vector<64x32xf32>
    %6 = arith.addf %3, %5 : vector<64x32xf32>
    %c0_5 = arith.constant 0 : index
    %c0_6 = arith.constant 0 : index
    %7 = vector.load %arg2[%c0_5, %c0_6] : memref<128x32xf32, #tpu.memory_space<vmem>>, vector<128x32xf32>
    %c0_7 = arith.constant 0 : index
    %c0_8 = arith.constant 0 : index
    %8 = vector.load %arg3[%c0_7, %c0_8] : memref<128x32xf32, #tpu.memory_space<vmem>>, vector<128x32xf32>
    %9 = tpu.concatenate %7, %8 in 1 : vector<128x32xf32>, vector<128x32xf32> -> vector<128x64xf32>
    %10 = arith.truncf %9 : vector<128x64xf32> to vector<128x64xbf16>
    %c0_9 = arith.constant 0 : index
    %c0_10 = arith.constant 0 : index
    %11 = vector.load %arg6[%c0_9, %c0_10] : memref<64x64xbf16, #tpu.memory_space<vmem>>, vector<64x64xbf16>
    %cst_11 = arith.constant dense<0.000000e+00> : vector<128x64xf32>
    %12 = tpu.matmul %10, %11, %cst_11 {dimension_numbers = #tpu.dot_dimension_numbers<[1], [0], [0], [1], [0, 0, 1, 1], [], []>} : vector<128x64xbf16>, vector<64x64xbf16>, vector<128x64xf32> -> vector<128x64xf32>
    %c0_12 = arith.constant 0 : index
    %c0_13 = arith.constant 0 : index
    %13 = vector.load %arg7[%c0_12, %c0_13] : memref<1x64xf32, #tpu.memory_space<vmem>>, vector<1x64xf32>
    %14 = vector.broadcast %13 : vector<1x64xf32> to vector<128x64xf32>
    %15 = arith.addf %12, %14 : vector<128x64xf32>
    %16 = vector.extract_strided_slice %15 {offsets = [0, 0], sizes = [128, 32], strides = [1, 1]} : vector<128x64xf32> to vector<128x32xf32>
    %17 = vector.extract_strided_slice %15 {offsets = [0, 32], sizes = [128, 32], strides = [1, 1]} : vector<128x64xf32> to vector<128x32xf32>
    %18 = vector.extract_strided_slice %16 {offsets = [0, 0], sizes = [64, 32], strides = [1, 1]} : vector<128x32xf32> to vector<64x32xf32>
    %19 = arith.mulf %6, %18 : vector<64x32xf32>
    %20 = vector.extract_strided_slice %16 {offsets = [64, 0], sizes = [64, 32], strides = [1, 1]} : vector<128x32xf32> to vector<64x32xf32>
    %21 = arith.mulf %6, %20 : vector<64x32xf32>
    %22 = tpu.concatenate %19, %21 in 0 : vector<64x32xf32>, vector<64x32xf32> -> vector<128x32xf32>
    %23 = arith.truncf %22 : vector<128x32xf32> to vector<128x32xbf16>
    %c0_14 = arith.constant 0 : index
    %c0_15 = arith.constant 0 : index
    %24 = vector.load %arg8[%c0_14, %c0_15] : memref<32x32xbf16, #tpu.memory_space<vmem>>, vector<32x32xbf16>
    %cst_16 = arith.constant dense<0.000000e+00> : vector<128x32xf32>
    %25 = tpu.matmul %23, %24, %cst_16 {dimension_numbers = #tpu.dot_dimension_numbers<[1], [0], [0], [1], [0, 0, 1, 1], [], []>} : vector<128x32xbf16>, vector<32x32xbf16>, vector<128x32xf32> -> vector<128x32xf32>
    %26 = vector.extract_strided_slice %25 {offsets = [0, 0], sizes = [64, 32], strides = [1, 1]} : vector<128x32xf32> to vector<64x32xf32>
    %27 = vector.extract_strided_slice %25 {offsets = [64, 0], sizes = [64, 32], strides = [1, 1]} : vector<128x32xf32> to vector<64x32xf32>
    %28 = arith.maximumf %26, %27 : vector<64x32xf32>
    %29 = arith.subf %26, %28 : vector<64x32xf32>
    %30 = math.exp %29 : vector<64x32xf32>
    %31 = arith.subf %27, %28 : vector<64x32xf32>
    %32 = math.exp %31 : vector<64x32xf32>
    %33 = arith.addf %30, %32 : vector<64x32xf32>
    %34 = tpu.reciprocal %33 {approx = true} : vector<64x32xf32> -> vector<64x32xf32>
    %35 = arith.mulf %30, %34 : vector<64x32xf32>
    %36 = vector.extract_strided_slice %17 {offsets = [0, 0], sizes = [64, 32], strides = [1, 1]} : vector<128x32xf32> to vector<64x32xf32>
    %37 = arith.mulf %35, %36 : vector<64x32xf32>
    %38 = arith.mulf %32, %34 : vector<64x32xf32>
    %39 = vector.extract_strided_slice %17 {offsets = [64, 0], sizes = [64, 32], strides = [1, 1]} : vector<128x32xf32> to vector<64x32xf32>
    %40 = arith.mulf %38, %39 : vector<64x32xf32>
    %41 = arith.addf %37, %40 : vector<64x32xf32>
    %42 = arith.truncf %41 : vector<64x32xf32> to vector<64x32xbf16>
    %c0_17 = arith.constant 0 : index
    %c0_18 = arith.constant 0 : index
    %43 = vector.load %arg9[%c0_17, %c0_18] : memref<32x32xbf16, #tpu.memory_space<vmem>>, vector<32x32xbf16>
    %cst_19 = arith.constant dense<0.000000e+00> : vector<64x32xf32>
    %44 = tpu.matmul %42, %43, %cst_19 {dimension_numbers = #tpu.dot_dimension_numbers<[1], [0], [0], [1], [0, 0, 1, 1], [], []>} : vector<64x32xbf16>, vector<32x32xbf16>, vector<64x32xf32> -> vector<64x32xf32>
    %c0_20 = arith.constant 0 : index
    %c0_21 = arith.constant 0 : index
    %45 = vector.load %arg10[%c0_20, %c0_21] : memref<1x32xf32, #tpu.memory_space<vmem>>, vector<1x32xf32>
    %46 = vector.broadcast %45 : vector<1x32xf32> to vector<64x32xf32>
    %47 = arith.addf %44, %46 : vector<64x32xf32>
    %48 = arith.truncf %47 : vector<64x32xf32> to vector<64x32xbf16>
    %49 = tpu.iota {dimensions = array<i32: 0>} : vector<64x1xi32>
    %c8_i32 = arith.constant 8 : i32
    %c0_i32 = arith.constant 0 : i32
    %50 = arith.cmpi eq, %c8_i32, %c0_i32 : i32
    %c1_i32 = arith.constant 1 : i32
    %51 = arith.select %50, %c1_i32, %c8_i32 : i32
    %52 = vector.broadcast %51 : i32 to vector<64x1xi32>
    %53 = arith.remsi %49, %52 : vector<64x1xi32>
    %c0_i32_22 = arith.constant 0 : i32
    %54 = vector.broadcast %c0_i32_22 : i32 to vector<64x1xi32>
    %55 = arith.cmpi ne, %53, %54 : vector<64x1xi32>
    %c0_i32_23 = arith.constant 0 : i32
    %56 = vector.broadcast %c0_i32_23 : i32 to vector<64x1xi32>
    %57 = arith.cmpi slt, %53, %56 : vector<64x1xi32>
    %c0_i32_24 = arith.constant 0 : i32
    %58 = arith.cmpi slt, %51, %c0_i32_24 : i32
    %59 = vector.broadcast %58 : i1 to vector<64x1xi1>
    %60 = vector.broadcast %59 : vector<64x1xi1> to vector<64x1xi1>
    %61 = arith.xori %57, %60 : vector<64x1xi1>
    %62 = arith.andi %61, %55 : vector<64x1xi1>
    %63 = vector.broadcast %51 : i32 to vector<64x1xi32>
    %64 = arith.addi %53, %63 : vector<64x1xi32>
    %65 = arith.select %62, %64, %53 : vector<64x1xi1>, vector<64x1xi32>
    %c0_25 = arith.constant 0 : index
    %c0_26 = arith.constant 0 : index
    %66 = vector.load %arg11[%c0_25, %c0_26] : memref<32x32xbf16, #tpu.memory_space<vmem>>, vector<32x32xbf16>
    %cst_27 = arith.constant dense<0.000000e+00> : vector<64x32xf32>
    %67 = tpu.matmul %48, %66, %cst_27 {dimension_numbers = #tpu.dot_dimension_numbers<[1], [0], [0], [1], [0, 0, 1, 1], [], []>} : vector<64x32xbf16>, vector<32x32xbf16>, vector<64x32xf32> -> vector<64x32xf32>
    %c0_28 = arith.constant 0 : index
    %c0_29 = arith.constant 0 : index
    %68 = vector.load %arg12[%c0_28, %c0_29] : memref<1x32xf32, #tpu.memory_space<vmem>>, vector<1x32xf32>
    %69 = vector.broadcast %68 : vector<1x32xf32> to vector<64x32xf32>
    %70 = arith.mulf %67, %69 : vector<64x32xf32>
    %c0_30 = arith.constant 0 : index
    %c0_31 = arith.constant 0 : index
    %71 = vector.load %arg13[%c0_30, %c0_31] : memref<1x32xf32, #tpu.memory_space<vmem>>, vector<1x32xf32>
    %72 = vector.broadcast %71 : vector<1x32xf32> to vector<64x32xf32>
    %73 = arith.addf %70, %72 : vector<64x32xf32>
    %cst_32 = arith.constant 0.000000e+00 : f32
    %74 = vector.broadcast %cst_32 : f32 to vector<64x32xf32>
    %75 = arith.subf %74, %73 : vector<64x32xf32>
    %76 = math.exp %75 : vector<64x32xf32>
    %cst_33 = arith.constant 1.000000e+00 : f32
    %77 = vector.broadcast %cst_33 : f32 to vector<64x32xf32>
    %78 = arith.addf %77, %76 : vector<64x32xf32>
    %cst_34 = arith.constant 1.000000e+00 : f32
    %79 = vector.broadcast %cst_34 : f32 to vector<64x32xf32>
    %80 = arith.divf %79, %78 : vector<64x32xf32>
    %81 = arith.mulf %47, %80 : vector<64x32xf32>
    %cst_35 = arith.constant dense<0.000000e+00> : vector<32xf32>
    %82 = vector.multi_reduction <add>, %47, %cst_35 [0] : vector<64x32xf32> to vector<32xf32>
    %83 = vector.shape_cast %82 : vector<32xf32> to vector<1x32xf32>
    %cst_36 = arith.constant 6.400000e+01 : f32
    %84 = vector.broadcast %cst_36 : f32 to vector<1x32xf32>
    %85 = arith.divf %83, %84 : vector<1x32xf32>
    %c0_37 = arith.constant 0 : index
    %c0_38 = arith.constant 0 : index
    %86 = vector.load %arg14[%c0_37, %c0_38] : memref<32x2xf32, #tpu.memory_space<vmem>>, vector<32x2xf32>
    %cst_39 = arith.constant dense<0.000000e+00> : vector<1x2xf32>
    %87 = tpu.matmul %85, %86, %cst_39 {dimension_numbers = #tpu.dot_dimension_numbers<[1], [0], [0], [1], [0, 0, 1, 1], [], []>} : vector<1x32xf32>, vector<32x2xf32>, vector<1x2xf32> -> vector<1x2xf32>
    %cst_40 = arith.constant 0.000000e+00 : f32
    %88 = vector.broadcast %cst_40 : f32 to vector<1x2xf32>
    %89 = arith.maximumf %87, %88 : vector<1x2xf32>
    %c0_41 = arith.constant 0 : index
    %c0_42 = arith.constant 0 : index
    %90 = vector.load %arg15[%c0_41, %c0_42] : memref<2x32xf32, #tpu.memory_space<vmem>>, vector<2x32xf32>
    %cst_43 = arith.constant dense<0.000000e+00> : vector<1x32xf32>
    %91 = tpu.matmul %89, %90, %cst_43 {dimension_numbers = #tpu.dot_dimension_numbers<[1], [0], [0], [1], [0, 0, 1, 1], [], []>} : vector<1x2xf32>, vector<2x32xf32>, vector<1x32xf32> -> vector<1x32xf32>
    %cst_44 = arith.constant 0.000000e+00 : f32
    %92 = vector.broadcast %cst_44 : f32 to vector<1x32xf32>
    %93 = arith.subf %92, %91 : vector<1x32xf32>
    %94 = math.exp %93 : vector<1x32xf32>
    %cst_45 = arith.constant 1.000000e+00 : f32
    %95 = vector.broadcast %cst_45 : f32 to vector<1x32xf32>
    %96 = arith.addf %95, %94 : vector<1x32xf32>
    %cst_46 = arith.constant 1.000000e+00 : f32
    %97 = vector.broadcast %cst_46 : f32 to vector<1x32xf32>
    %98 = arith.divf %97, %96 : vector<1x32xf32>
    %99 = vector.broadcast %98 : vector<1x32xf32> to vector<64x32xf32>
    %100 = arith.mulf %47, %99 : vector<64x32xf32>
    %cst_47 = arith.constant 0.000000e+00 : f32
    %101 = vector.broadcast %cst_47 : f32 to vector<56x32xf32>
    %102 = tpu.concatenate %101, %47, %101 in 0 : vector<56x32xf32>, vector<64x32xf32>, vector<56x32xf32> -> vector<176x32xf32>
    %103 = vector.extract_strided_slice %102 {offsets = [47, 0], sizes = [64, 32], strides = [1, 1]} : vector<176x32xf32> to vector<64x32xf32>
    %c-1_i32 = arith.constant -1 : i32
    %104 = vector.broadcast %c-1_i32 : i32 to vector<64x1xi32>
    %105 = arith.addi %65, %104 : vector<64x1xi32>
    %c0_i32_48 = arith.constant 0 : i32
    %106 = vector.broadcast %c0_i32_48 : i32 to vector<64x1xi32>
    %107 = arith.cmpi sge, %105, %106 : vector<64x1xi32>
    %c-1_i32_49 = arith.constant -1 : i32
    %108 = vector.broadcast %c-1_i32_49 : i32 to vector<64x1xi32>
    %109 = arith.addi %65, %108 : vector<64x1xi32>
    %c8_i32_50 = arith.constant 8 : i32
    %110 = vector.broadcast %c8_i32_50 : i32 to vector<64x1xi32>
    %111 = arith.cmpi slt, %109, %110 : vector<64x1xi32>
    %112 = arith.andi %107, %111 : vector<64x1xi1>
    %cst_51 = arith.constant 0.000000e+00 : f32
    %113 = vector.shape_cast %112 : vector<64x1xi1> to vector<64x1xi1>
    %114 = vector.broadcast %113 : vector<64x1xi1> to vector<64x32xi1>
    %115 = vector.broadcast %cst_51 : f32 to vector<64x32xf32>
    %116 = arith.select %114, %103, %115 : vector<64x32xi1>, vector<64x32xf32>
    %117 = vector.extract_strided_slice %102 {offsets = [48, 0], sizes = [64, 32], strides = [1, 1]} : vector<176x32xf32> to vector<64x32xf32>
    %118 = vector.extract_strided_slice %102 {offsets = [49, 0], sizes = [64, 32], strides = [1, 1]} : vector<176x32xf32> to vector<64x32xf32>
    %c1_i32_52 = arith.constant 1 : i32
    %119 = vector.broadcast %c1_i32_52 : i32 to vector<64x1xi32>
    %120 = arith.addi %65, %119 : vector<64x1xi32>
    %c0_i32_53 = arith.constant 0 : i32
    %121 = vector.broadcast %c0_i32_53 : i32 to vector<64x1xi32>
    %122 = arith.cmpi sge, %120, %121 : vector<64x1xi32>
    %c1_i32_54 = arith.constant 1 : i32
    %123 = vector.broadcast %c1_i32_54 : i32 to vector<64x1xi32>
    %124 = arith.addi %65, %123 : vector<64x1xi32>
    %c8_i32_55 = arith.constant 8 : i32
    %125 = vector.broadcast %c8_i32_55 : i32 to vector<64x1xi32>
    %126 = arith.cmpi slt, %124, %125 : vector<64x1xi32>
    %127 = arith.andi %122, %126 : vector<64x1xi1>
    %cst_56 = arith.constant 0.000000e+00 : f32
    %128 = vector.shape_cast %127 : vector<64x1xi1> to vector<64x1xi1>
    %129 = vector.broadcast %128 : vector<64x1xi1> to vector<64x32xi1>
    %130 = vector.broadcast %cst_56 : f32 to vector<64x32xf32>
    %131 = arith.select %129, %118, %130 : vector<64x32xi1>, vector<64x32xf32>
    %132 = vector.extract_strided_slice %102 {offsets = [55, 0], sizes = [64, 32], strides = [1, 1]} : vector<176x32xf32> to vector<64x32xf32>
    %c-1_i32_57 = arith.constant -1 : i32
    %133 = vector.broadcast %c-1_i32_57 : i32 to vector<64x1xi32>
    %134 = arith.addi %65, %133 : vector<64x1xi32>
    %c0_i32_58 = arith.constant 0 : i32
    %135 = vector.broadcast %c0_i32_58 : i32 to vector<64x1xi32>
    %136 = arith.cmpi sge, %134, %135 : vector<64x1xi32>
    %c-1_i32_59 = arith.constant -1 : i32
    %137 = vector.broadcast %c-1_i32_59 : i32 to vector<64x1xi32>
    %138 = arith.addi %65, %137 : vector<64x1xi32>
    %c8_i32_60 = arith.constant 8 : i32
    %139 = vector.broadcast %c8_i32_60 : i32 to vector<64x1xi32>
    %140 = arith.cmpi slt, %138, %139 : vector<64x1xi32>
    %141 = arith.andi %136, %140 : vector<64x1xi1>
    %cst_61 = arith.constant 0.000000e+00 : f32
    %142 = vector.shape_cast %141 : vector<64x1xi1> to vector<64x1xi1>
    %143 = vector.broadcast %142 : vector<64x1xi1> to vector<64x32xi1>
    %144 = vector.broadcast %cst_61 : f32 to vector<64x32xf32>
    %145 = arith.select %143, %132, %144 : vector<64x32xi1>, vector<64x32xf32>
    %146 = vector.extract_strided_slice %102 {offsets = [57, 0], sizes = [64, 32], strides = [1, 1]} : vector<176x32xf32> to vector<64x32xf32>
    %c1_i32_62 = arith.constant 1 : i32
    %147 = vector.broadcast %c1_i32_62 : i32 to vector<64x1xi32>
    %148 = arith.addi %65, %147 : vector<64x1xi32>
    %c0_i32_63 = arith.constant 0 : i32
    %149 = vector.broadcast %c0_i32_63 : i32 to vector<64x1xi32>
    %150 = arith.cmpi sge, %148, %149 : vector<64x1xi32>
    %c1_i32_64 = arith.constant 1 : i32
    %151 = vector.broadcast %c1_i32_64 : i32 to vector<64x1xi32>
    %152 = arith.addi %65, %151 : vector<64x1xi32>
    %c8_i32_65 = arith.constant 8 : i32
    %153 = vector.broadcast %c8_i32_65 : i32 to vector<64x1xi32>
    %154 = arith.cmpi slt, %152, %153 : vector<64x1xi32>
    %155 = arith.andi %150, %154 : vector<64x1xi1>
    %cst_66 = arith.constant 0.000000e+00 : f32
    %156 = vector.shape_cast %155 : vector<64x1xi1> to vector<64x1xi1>
    %157 = vector.broadcast %156 : vector<64x1xi1> to vector<64x32xi1>
    %158 = vector.broadcast %cst_66 : f32 to vector<64x32xf32>
    %159 = arith.select %157, %146, %158 : vector<64x32xi1>, vector<64x32xf32>
    %160 = vector.extract_strided_slice %102 {offsets = [63, 0], sizes = [64, 32], strides = [1, 1]} : vector<176x32xf32> to vector<64x32xf32>
    %c-1_i32_67 = arith.constant -1 : i32
    %161 = vector.broadcast %c-1_i32_67 : i32 to vector<64x1xi32>
    %162 = arith.addi %65, %161 : vector<64x1xi32>
    %c0_i32_68 = arith.constant 0 : i32
    %163 = vector.broadcast %c0_i32_68 : i32 to vector<64x1xi32>
    %164 = arith.cmpi sge, %162, %163 : vector<64x1xi32>
    %c-1_i32_69 = arith.constant -1 : i32
    %165 = vector.broadcast %c-1_i32_69 : i32 to vector<64x1xi32>
    %166 = arith.addi %65, %165 : vector<64x1xi32>
    %c8_i32_70 = arith.constant 8 : i32
    %167 = vector.broadcast %c8_i32_70 : i32 to vector<64x1xi32>
    %168 = arith.cmpi slt, %166, %167 : vector<64x1xi32>
    %169 = arith.andi %164, %168 : vector<64x1xi1>
    %cst_71 = arith.constant 0.000000e+00 : f32
    %170 = vector.shape_cast %169 : vector<64x1xi1> to vector<64x1xi1>
    %171 = vector.broadcast %170 : vector<64x1xi1> to vector<64x32xi1>
    %172 = vector.broadcast %cst_71 : f32 to vector<64x32xf32>
    %173 = arith.select %171, %160, %172 : vector<64x32xi1>, vector<64x32xf32>
    %174 = vector.extract_strided_slice %102 {offsets = [64, 0], sizes = [64, 32], strides = [1, 1]} : vector<176x32xf32> to vector<64x32xf32>
    %175 = vector.extract_strided_slice %102 {offsets = [65, 0], sizes = [64, 32], strides = [1, 1]} : vector<176x32xf32> to vector<64x32xf32>
    %c1_i32_72 = arith.constant 1 : i32
    %176 = vector.broadcast %c1_i32_72 : i32 to vector<64x1xi32>
    %177 = arith.addi %65, %176 : vector<64x1xi32>
    %c0_i32_73 = arith.constant 0 : i32
    %178 = vector.broadcast %c0_i32_73 : i32 to vector<64x1xi32>
    %179 = arith.cmpi sge, %177, %178 : vector<64x1xi32>
    %c1_i32_74 = arith.constant 1 : i32
    %180 = vector.broadcast %c1_i32_74 : i32 to vector<64x1xi32>
    %181 = arith.addi %65, %180 : vector<64x1xi32>
    %c8_i32_75 = arith.constant 8 : i32
    %182 = vector.broadcast %c8_i32_75 : i32 to vector<64x1xi32>
    %183 = arith.cmpi slt, %181, %182 : vector<64x1xi32>
    %184 = arith.andi %179, %183 : vector<64x1xi1>
    %cst_76 = arith.constant 0.000000e+00 : f32
    %185 = vector.shape_cast %184 : vector<64x1xi1> to vector<64x1xi1>
    %186 = vector.broadcast %185 : vector<64x1xi1> to vector<64x32xi1>
    %187 = vector.broadcast %cst_76 : f32 to vector<64x32xf32>
    %188 = arith.select %186, %175, %187 : vector<64x32xi1>, vector<64x32xf32>
    %189 = tpu.concatenate %116, %117, %131, %145, %47, %159, %173, %174, %188 in 1 : vector<64x32xf32>, vector<64x32xf32>, vector<64x32xf32>, vector<64x32xf32>, vector<64x32xf32>, vector<64x32xf32>, vector<64x32xf32>, vector<64x32xf32>, vector<64x32xf32> -> vector<64x288xf32>
    %190 = arith.truncf %189 : vector<64x288xf32> to vector<64x288xbf16>
    %c0_77 = arith.constant 0 : index
    %c0_78 = arith.constant 0 : index
    %191 = vector.load %arg16[%c0_77, %c0_78] : memref<288x32xbf16, #tpu.memory_space<vmem>>, vector<288x32xbf16>
    %cst_79 = arith.constant dense<0.000000e+00> : vector<64x32xf32>
    %192 = tpu.matmul %190, %191, %cst_79 {dimension_numbers = #tpu.dot_dimension_numbers<[1], [0], [0], [1], [0, 0, 1, 1], [], []>} : vector<64x288xbf16>, vector<288x32xbf16>, vector<64x32xf32> -> vector<64x32xf32>
    %c0_80 = arith.constant 0 : index
    %c0_81 = arith.constant 0 : index
    %c0_82 = arith.constant 0 : index
    %193 = vector.load %arg20[%c0_80, %c0_81, %c0_82] : memref<4x1x32xf32, #tpu.memory_space<vmem>>, vector<1x1x32xf32>
    %194 = vector.shape_cast %193 : vector<1x1x32xf32> to vector<1x32xf32>
    %195 = vector.broadcast %194 : vector<1x32xf32> to vector<64x32xf32>
    %196 = arith.addf %192, %195 : vector<64x32xf32>
    %cst_83 = arith.constant 0.000000e+00 : f32
    %197 = vector.broadcast %cst_83 : f32 to vector<64x32xf32>
    %198 = arith.maximumf %196, %197 : vector<64x32xf32>
    %c0_84 = arith.constant 0 : index
    %c0_85 = arith.constant 0 : index
    %c0_86 = arith.constant 0 : index
    %199 = vector.load %arg21[%c0_84, %c0_85, %c0_86] : memref<4x1x32xf32, #tpu.memory_space<vmem>>, vector<1x1x32xf32>
    %200 = vector.shape_cast %199 : vector<1x1x32xf32> to vector<1x32xf32>
    %201 = vector.broadcast %200 : vector<1x32xf32> to vector<64x32xf32>
    %202 = arith.mulf %198, %201 : vector<64x32xf32>
    %c0_87 = arith.constant 0 : index
    %c0_88 = arith.constant 0 : index
    %c0_89 = arith.constant 0 : index
    %203 = vector.load %arg22[%c0_87, %c0_88, %c0_89] : memref<4x1x32xf32, #tpu.memory_space<vmem>>, vector<1x1x32xf32>
    %204 = vector.shape_cast %203 : vector<1x1x32xf32> to vector<1x32xf32>
    %205 = vector.broadcast %204 : vector<1x32xf32> to vector<64x32xf32>
    %206 = arith.addf %202, %205 : vector<64x32xf32>
    %207 = arith.truncf %206 : vector<64x32xf32> to vector<64x32xbf16>
    %208 = vector.extract_strided_slice %102 {offsets = [2, 0], sizes = [64, 32], strides = [1, 1]} : vector<176x32xf32> to vector<64x32xf32>
    %c-6_i32 = arith.constant -6 : i32
    %209 = vector.broadcast %c-6_i32 : i32 to vector<64x1xi32>
    %210 = arith.addi %65, %209 : vector<64x1xi32>
    %c0_i32_90 = arith.constant 0 : i32
    %211 = vector.broadcast %c0_i32_90 : i32 to vector<64x1xi32>
    %212 = arith.cmpi sge, %210, %211 : vector<64x1xi32>
    %c-6_i32_91 = arith.constant -6 : i32
    %213 = vector.broadcast %c-6_i32_91 : i32 to vector<64x1xi32>
    %214 = arith.addi %65, %213 : vector<64x1xi32>
    %c8_i32_92 = arith.constant 8 : i32
    %215 = vector.broadcast %c8_i32_92 : i32 to vector<64x1xi32>
    %216 = arith.cmpi slt, %214, %215 : vector<64x1xi32>
    %217 = arith.andi %212, %216 : vector<64x1xi1>
    %cst_93 = arith.constant 0.000000e+00 : f32
    %218 = vector.shape_cast %217 : vector<64x1xi1> to vector<64x1xi1>
    %219 = vector.broadcast %218 : vector<64x1xi1> to vector<64x32xi1>
    %220 = vector.broadcast %cst_93 : f32 to vector<64x32xf32>
    %221 = arith.select %219, %208, %220 : vector<64x32xi1>, vector<64x32xf32>
    %222 = vector.extract_strided_slice %102 {offsets = [8, 0], sizes = [64, 32], strides = [1, 1]} : vector<176x32xf32> to vector<64x32xf32>
    %223 = vector.extract_strided_slice %102 {offsets = [14, 0], sizes = [64, 32], strides = [1, 1]} : vector<176x32xf32> to vector<64x32xf32>
    %c6_i32 = arith.constant 6 : i32
    %224 = vector.broadcast %c6_i32 : i32 to vector<64x1xi32>
    %225 = arith.addi %65, %224 : vector<64x1xi32>
    %c0_i32_94 = arith.constant 0 : i32
    %226 = vector.broadcast %c0_i32_94 : i32 to vector<64x1xi32>
    %227 = arith.cmpi sge, %225, %226 : vector<64x1xi32>
    %c6_i32_95 = arith.constant 6 : i32
    %228 = vector.broadcast %c6_i32_95 : i32 to vector<64x1xi32>
    %229 = arith.addi %65, %228 : vector<64x1xi32>
    %c8_i32_96 = arith.constant 8 : i32
    %230 = vector.broadcast %c8_i32_96 : i32 to vector<64x1xi32>
    %231 = arith.cmpi slt, %229, %230 : vector<64x1xi32>
    %232 = arith.andi %227, %231 : vector<64x1xi1>
    %cst_97 = arith.constant 0.000000e+00 : f32
    %233 = vector.shape_cast %232 : vector<64x1xi1> to vector<64x1xi1>
    %234 = vector.broadcast %233 : vector<64x1xi1> to vector<64x32xi1>
    %235 = vector.broadcast %cst_97 : f32 to vector<64x32xf32>
    %236 = arith.select %234, %223, %235 : vector<64x32xi1>, vector<64x32xf32>
    %237 = vector.extract_strided_slice %102 {offsets = [50, 0], sizes = [64, 32], strides = [1, 1]} : vector<176x32xf32> to vector<64x32xf32>
    %c-6_i32_98 = arith.constant -6 : i32
    %238 = vector.broadcast %c-6_i32_98 : i32 to vector<64x1xi32>
    %239 = arith.addi %65, %238 : vector<64x1xi32>
    %c0_i32_99 = arith.constant 0 : i32
    %240 = vector.broadcast %c0_i32_99 : i32 to vector<64x1xi32>
    %241 = arith.cmpi sge, %239, %240 : vector<64x1xi32>
    %c-6_i32_100 = arith.constant -6 : i32
    %242 = vector.broadcast %c-6_i32_100 : i32 to vector<64x1xi32>
    %243 = arith.addi %65, %242 : vector<64x1xi32>
    %c8_i32_101 = arith.constant 8 : i32
    %244 = vector.broadcast %c8_i32_101 : i32 to vector<64x1xi32>
    %245 = arith.cmpi slt, %243, %244 : vector<64x1xi32>
    %246 = arith.andi %241, %245 : vector<64x1xi1>
    %cst_102 = arith.constant 0.000000e+00 : f32
    %247 = vector.shape_cast %246 : vector<64x1xi1> to vector<64x1xi1>
    %248 = vector.broadcast %247 : vector<64x1xi1> to vector<64x32xi1>
    %249 = vector.broadcast %cst_102 : f32 to vector<64x32xf32>
    %250 = arith.select %248, %237, %249 : vector<64x32xi1>, vector<64x32xf32>
    %251 = vector.extract_strided_slice %102 {offsets = [62, 0], sizes = [64, 32], strides = [1, 1]} : vector<176x32xf32> to vector<64x32xf32>
    %c6_i32_103 = arith.constant 6 : i32
    %252 = vector.broadcast %c6_i32_103 : i32 to vector<64x1xi32>
    %253 = arith.addi %65, %252 : vector<64x1xi32>
    %c0_i32_104 = arith.constant 0 : i32
    %254 = vector.broadcast %c0_i32_104 : i32 to vector<64x1xi32>
    %255 = arith.cmpi sge, %253, %254 : vector<64x1xi32>
    %c6_i32_105 = arith.constant 6 : i32
    %256 = vector.broadcast %c6_i32_105 : i32 to vector<64x1xi32>
    %257 = arith.addi %65, %256 : vector<64x1xi32>
    %c8_i32_106 = arith.constant 8 : i32
    %258 = vector.broadcast %c8_i32_106 : i32 to vector<64x1xi32>
    %259 = arith.cmpi slt, %257, %258 : vector<64x1xi32>
    %260 = arith.andi %255, %259 : vector<64x1xi1>
    %cst_107 = arith.constant 0.000000e+00 : f32
    %261 = vector.shape_cast %260 : vector<64x1xi1> to vector<64x1xi1>
    %262 = vector.broadcast %261 : vector<64x1xi1> to vector<64x32xi1>
    %263 = vector.broadcast %cst_107 : f32 to vector<64x32xf32>
    %264 = arith.select %262, %251, %263 : vector<64x32xi1>, vector<64x32xf32>
    %265 = vector.extract_strided_slice %102 {offsets = [98, 0], sizes = [64, 32], strides = [1, 1]} : vector<176x32xf32> to vector<64x32xf32>
    %c-6_i32_108 = arith.constant -6 : i32
    %266 = vector.broadcast %c-6_i32_108 : i32 to vector<64x1xi32>
    %267 = arith.addi %65, %266 : vector<64x1xi32>
    %c0_i32_109 = arith.constant 0 : i32
    %268 = vector.broadcast %c0_i32_109 : i32 to vector<64x1xi32>
    %269 = arith.cmpi sge, %267, %268 : vector<64x1xi32>
    %c-6_i32_110 = arith.constant -6 : i32
    %270 = vector.broadcast %c-6_i32_110 : i32 to vector<64x1xi32>
    %271 = arith.addi %65, %270 : vector<64x1xi32>
    %c8_i32_111 = arith.constant 8 : i32
    %272 = vector.broadcast %c8_i32_111 : i32 to vector<64x1xi32>
    %273 = arith.cmpi slt, %271, %272 : vector<64x1xi32>
    %274 = arith.andi %269, %273 : vector<64x1xi1>
    %cst_112 = arith.constant 0.000000e+00 : f32
    %275 = vector.shape_cast %274 : vector<64x1xi1> to vector<64x1xi1>
    %276 = vector.broadcast %275 : vector<64x1xi1> to vector<64x32xi1>
    %277 = vector.broadcast %cst_112 : f32 to vector<64x32xf32>
    %278 = arith.select %276, %265, %277 : vector<64x32xi1>, vector<64x32xf32>
    %279 = vector.extract_strided_slice %102 {offsets = [104, 0], sizes = [64, 32], strides = [1, 1]} : vector<176x32xf32> to vector<64x32xf32>
    %280 = vector.extract_strided_slice %102 {offsets = [110, 0], sizes = [64, 32], strides = [1, 1]} : vector<176x32xf32> to vector<64x32xf32>
    %c6_i32_113 = arith.constant 6 : i32
    %281 = vector.broadcast %c6_i32_113 : i32 to vector<64x1xi32>
    %282 = arith.addi %65, %281 : vector<64x1xi32>
    %c0_i32_114 = arith.constant 0 : i32
    %283 = vector.broadcast %c0_i32_114 : i32 to vector<64x1xi32>
    %284 = arith.cmpi sge, %282, %283 : vector<64x1xi32>
    %c6_i32_115 = arith.constant 6 : i32
    %285 = vector.broadcast %c6_i32_115 : i32 to vector<64x1xi32>
    %286 = arith.addi %65, %285 : vector<64x1xi32>
    %c8_i32_116 = arith.constant 8 : i32
    %287 = vector.broadcast %c8_i32_116 : i32 to vector<64x1xi32>
    %288 = arith.cmpi slt, %286, %287 : vector<64x1xi32>
    %289 = arith.andi %284, %288 : vector<64x1xi1>
    %cst_117 = arith.constant 0.000000e+00 : f32
    %290 = vector.shape_cast %289 : vector<64x1xi1> to vector<64x1xi1>
    %291 = vector.broadcast %290 : vector<64x1xi1> to vector<64x32xi1>
    %292 = vector.broadcast %cst_117 : f32 to vector<64x32xf32>
    %293 = arith.select %291, %280, %292 : vector<64x32xi1>, vector<64x32xf32>
    %294 = tpu.concatenate %221, %222, %236, %250, %47, %264, %278, %279, %293 in 1 : vector<64x32xf32>, vector<64x32xf32>, vector<64x32xf32>, vector<64x32xf32>, vector<64x32xf32>, vector<64x32xf32>, vector<64x32xf32>, vector<64x32xf32>, vector<64x32xf32> -> vector<64x288xf32>
    %295 = arith.truncf %294 : vector<64x288xf32> to vector<64x288xbf16>
    %c0_118 = arith.constant 0 : index
    %c0_119 = arith.constant 0 : index
    %296 = vector.load %arg17[%c0_118, %c0_119] : memref<288x32xbf16, #tpu.memory_space<vmem>>, vector<288x32xbf16>
    %cst_120 = arith.constant dense<0.000000e+00> : vector<64x32xf32>
    %297 = tpu.matmul %295, %296, %cst_120 {dimension_numbers = #tpu.dot_dimension_numbers<[1], [0], [0], [1], [0, 0, 1, 1], [], []>} : vector<64x288xbf16>, vector<288x32xbf16>, vector<64x32xf32> -> vector<64x32xf32>
    %c1 = arith.constant 1 : index
    %c0_121 = arith.constant 0 : index
    %c0_122 = arith.constant 0 : index
    %298 = vector.load %arg20[%c1, %c0_121, %c0_122] : memref<4x1x32xf32, #tpu.memory_space<vmem>>, vector<1x1x32xf32>
    %299 = vector.shape_cast %298 : vector<1x1x32xf32> to vector<1x32xf32>
    %300 = vector.broadcast %299 : vector<1x32xf32> to vector<64x32xf32>
    %301 = arith.addf %297, %300 : vector<64x32xf32>
    %cst_123 = arith.constant 0.000000e+00 : f32
    %302 = vector.broadcast %cst_123 : f32 to vector<64x32xf32>
    %303 = arith.maximumf %301, %302 : vector<64x32xf32>
    %c1_124 = arith.constant 1 : index
    %c0_125 = arith.constant 0 : index
    %c0_126 = arith.constant 0 : index
    %304 = vector.load %arg21[%c1_124, %c0_125, %c0_126] : memref<4x1x32xf32, #tpu.memory_space<vmem>>, vector<1x1x32xf32>
    %305 = vector.shape_cast %304 : vector<1x1x32xf32> to vector<1x32xf32>
    %306 = vector.broadcast %305 : vector<1x32xf32> to vector<64x32xf32>
    %307 = arith.mulf %303, %306 : vector<64x32xf32>
    %c1_127 = arith.constant 1 : index
    %c0_128 = arith.constant 0 : index
    %c0_129 = arith.constant 0 : index
    %308 = vector.load %arg22[%c1_127, %c0_128, %c0_129] : memref<4x1x32xf32, #tpu.memory_space<vmem>>, vector<1x1x32xf32>
    %309 = vector.shape_cast %308 : vector<1x1x32xf32> to vector<1x32xf32>
    %310 = vector.broadcast %309 : vector<1x32xf32> to vector<64x32xf32>
    %311 = arith.addf %307, %310 : vector<64x32xf32>
    %312 = arith.truncf %311 : vector<64x32xf32> to vector<64x32xbf16>
    %313 = arith.truncf %47 : vector<64x32xf32> to vector<64x32xbf16>
    %c0_130 = arith.constant 0 : index
    %c0_131 = arith.constant 0 : index
    %314 = vector.load %arg18[%c0_130, %c0_131] : memref<32x32xbf16, #tpu.memory_space<vmem>>, vector<32x32xbf16>
    %cst_132 = arith.constant dense<0.000000e+00> : vector<64x32xf32>
    %315 = tpu.matmul %313, %314, %cst_132 {dimension_numbers = #tpu.dot_dimension_numbers<[1], [0], [0], [1], [0, 0, 1, 1], [], []>} : vector<64x32xbf16>, vector<32x32xbf16>, vector<64x32xf32> -> vector<64x32xf32>
    %c2 = arith.constant 2 : index
    %c0_133 = arith.constant 0 : index
    %c0_134 = arith.constant 0 : index
    %316 = vector.load %arg20[%c2, %c0_133, %c0_134] : memref<4x1x32xf32, #tpu.memory_space<vmem>>, vector<1x1x32xf32>
    %317 = vector.shape_cast %316 : vector<1x1x32xf32> to vector<1x32xf32>
    %318 = vector.broadcast %317 : vector<1x32xf32> to vector<64x32xf32>
    %319 = arith.addf %315, %318 : vector<64x32xf32>
    %cst_135 = arith.constant 0.000000e+00 : f32
    %320 = vector.broadcast %cst_135 : f32 to vector<64x32xf32>
    %321 = arith.maximumf %319, %320 : vector<64x32xf32>
    %c2_136 = arith.constant 2 : index
    %c0_137 = arith.constant 0 : index
    %c0_138 = arith.constant 0 : index
    %322 = vector.load %arg21[%c2_136, %c0_137, %c0_138] : memref<4x1x32xf32, #tpu.memory_space<vmem>>, vector<1x1x32xf32>
    %323 = vector.shape_cast %322 : vector<1x1x32xf32> to vector<1x32xf32>
    %324 = vector.broadcast %323 : vector<1x32xf32> to vector<64x32xf32>
    %325 = arith.mulf %321, %324 : vector<64x32xf32>
    %c2_139 = arith.constant 2 : index
    %c0_140 = arith.constant 0 : index
    %c0_141 = arith.constant 0 : index
    %326 = vector.load %arg22[%c2_139, %c0_140, %c0_141] : memref<4x1x32xf32, #tpu.memory_space<vmem>>, vector<1x1x32xf32>
    %327 = vector.shape_cast %326 : vector<1x1x32xf32> to vector<1x32xf32>
    %328 = vector.broadcast %327 : vector<1x32xf32> to vector<64x32xf32>
    %329 = arith.addf %325, %328 : vector<64x32xf32>
    %330 = arith.truncf %329 : vector<64x32xf32> to vector<64x32xbf16>
    %331 = arith.truncf %47 : vector<64x32xf32> to vector<64x32xbf16>
    %c0_142 = arith.constant 0 : index
    %c0_143 = arith.constant 0 : index
    %332 = vector.load %arg19[%c0_142, %c0_143] : memref<32x32xbf16, #tpu.memory_space<vmem>>, vector<32x32xbf16>
    %cst_144 = arith.constant dense<0.000000e+00> : vector<64x32xf32>
    %333 = tpu.matmul %331, %332, %cst_144 {dimension_numbers = #tpu.dot_dimension_numbers<[1], [0], [0], [1], [0, 0, 1, 1], [], []>} : vector<64x32xbf16>, vector<32x32xbf16>, vector<64x32xf32> -> vector<64x32xf32>
    %c3 = arith.constant 3 : index
    %c0_145 = arith.constant 0 : index
    %c0_146 = arith.constant 0 : index
    %334 = vector.load %arg20[%c3, %c0_145, %c0_146] : memref<4x1x32xf32, #tpu.memory_space<vmem>>, vector<1x1x32xf32>
    %335 = vector.shape_cast %334 : vector<1x1x32xf32> to vector<1x32xf32>
    %336 = vector.broadcast %335 : vector<1x32xf32> to vector<64x32xf32>
    %337 = arith.addf %333, %336 : vector<64x32xf32>
    %cst_147 = arith.constant 0.000000e+00 : f32
    %338 = vector.broadcast %cst_147 : f32 to vector<64x32xf32>
    %339 = arith.maximumf %337, %338 : vector<64x32xf32>
    %c3_148 = arith.constant 3 : index
    %c0_149 = arith.constant 0 : index
    %c0_150 = arith.constant 0 : index
    %340 = vector.load %arg21[%c3_148, %c0_149, %c0_150] : memref<4x1x32xf32, #tpu.memory_space<vmem>>, vector<1x1x32xf32>
    %341 = vector.shape_cast %340 : vector<1x1x32xf32> to vector<1x32xf32>
    %342 = vector.broadcast %341 : vector<1x32xf32> to vector<64x32xf32>
    %343 = arith.mulf %339, %342 : vector<64x32xf32>
    %c3_151 = arith.constant 3 : index
    %c0_152 = arith.constant 0 : index
    %c0_153 = arith.constant 0 : index
    %344 = vector.load %arg22[%c3_151, %c0_152, %c0_153] : memref<4x1x32xf32, #tpu.memory_space<vmem>>, vector<1x1x32xf32>
    %345 = vector.shape_cast %344 : vector<1x1x32xf32> to vector<1x32xf32>
    %346 = vector.broadcast %345 : vector<1x32xf32> to vector<64x32xf32>
    %347 = arith.addf %343, %346 : vector<64x32xf32>
    %348 = arith.truncf %347 : vector<64x32xf32> to vector<64x32xbf16>
    %349 = tpu.concatenate %207, %312, %330, %348 in 1 : vector<64x32xbf16>, vector<64x32xbf16>, vector<64x32xbf16>, vector<64x32xbf16> -> vector<64x128xbf16>
    %c0_154 = arith.constant 0 : index
    %c0_155 = arith.constant 0 : index
    %350 = vector.load %arg23[%c0_154, %c0_155] : memref<128x32xbf16, #tpu.memory_space<vmem>>, vector<128x32xbf16>
    %cst_156 = arith.constant dense<0.000000e+00> : vector<64x32xf32>
    %351 = tpu.matmul %349, %350, %cst_156 {dimension_numbers = #tpu.dot_dimension_numbers<[1], [0], [0], [1], [0, 0, 1, 1], [], []>} : vector<64x128xbf16>, vector<128x32xbf16>, vector<64x32xf32> -> vector<64x32xf32>
    %c0_157 = arith.constant 0 : index
    %c0_158 = arith.constant 0 : index
    %352 = vector.load %arg24[%c0_157, %c0_158] : memref<1x32xf32, #tpu.memory_space<vmem>>, vector<1x32xf32>
    %353 = vector.broadcast %352 : vector<1x32xf32> to vector<64x32xf32>
    %354 = arith.addf %351, %353 : vector<64x32xf32>
    %355 = vector.shape_cast %81 : vector<64x32xf32> to vector<8x8x32xf32>
    %356 = vector.shape_cast %100 : vector<64x32xf32> to vector<8x8x32xf32>
    %357 = vector.shape_cast %354 : vector<64x32xf32> to vector<8x8x32xf32>
    %358 = vector.extract_strided_slice %355 {offsets = [0, 0, 0], sizes = [8, 1, 32], strides = [1, 1, 1]} : vector<8x8x32xf32> to vector<8x1x32xf32>
    %359 = vector.extract_strided_slice %356 {offsets = [0, 0, 0], sizes = [1, 8, 32], strides = [1, 1, 1]} : vector<8x8x32xf32> to vector<1x8x32xf32>
    %360 = vector.broadcast %358 : vector<8x1x32xf32> to vector<8x8x32xf32>
    %361 = vector.broadcast %359 : vector<1x8x32xf32> to vector<8x8x32xf32>
    %362 = arith.mulf %360, %361 : vector<8x8x32xf32>
    %363 = vector.extract_strided_slice %355 {offsets = [0, 1, 0], sizes = [8, 1, 32], strides = [1, 1, 1]} : vector<8x8x32xf32> to vector<8x1x32xf32>
    %364 = vector.extract_strided_slice %356 {offsets = [1, 0, 0], sizes = [1, 8, 32], strides = [1, 1, 1]} : vector<8x8x32xf32> to vector<1x8x32xf32>
    %365 = vector.broadcast %363 : vector<8x1x32xf32> to vector<8x8x32xf32>
    %366 = vector.broadcast %364 : vector<1x8x32xf32> to vector<8x8x32xf32>
    %367 = arith.mulf %365, %366 : vector<8x8x32xf32>
    %368 = arith.addf %362, %367 : vector<8x8x32xf32>
    %369 = vector.extract_strided_slice %355 {offsets = [0, 2, 0], sizes = [8, 1, 32], strides = [1, 1, 1]} : vector<8x8x32xf32> to vector<8x1x32xf32>
    %370 = vector.extract_strided_slice %356 {offsets = [2, 0, 0], sizes = [1, 8, 32], strides = [1, 1, 1]} : vector<8x8x32xf32> to vector<1x8x32xf32>
    %371 = vector.broadcast %369 : vector<8x1x32xf32> to vector<8x8x32xf32>
    %372 = vector.broadcast %370 : vector<1x8x32xf32> to vector<8x8x32xf32>
    %373 = arith.mulf %371, %372 : vector<8x8x32xf32>
    %374 = arith.addf %368, %373 : vector<8x8x32xf32>
    %375 = vector.extract_strided_slice %355 {offsets = [0, 3, 0], sizes = [8, 1, 32], strides = [1, 1, 1]} : vector<8x8x32xf32> to vector<8x1x32xf32>
    %376 = vector.extract_strided_slice %356 {offsets = [3, 0, 0], sizes = [1, 8, 32], strides = [1, 1, 1]} : vector<8x8x32xf32> to vector<1x8x32xf32>
    %377 = vector.broadcast %375 : vector<8x1x32xf32> to vector<8x8x32xf32>
    %378 = vector.broadcast %376 : vector<1x8x32xf32> to vector<8x8x32xf32>
    %379 = arith.mulf %377, %378 : vector<8x8x32xf32>
    %380 = arith.addf %374, %379 : vector<8x8x32xf32>
    %381 = vector.extract_strided_slice %355 {offsets = [0, 4, 0], sizes = [8, 1, 32], strides = [1, 1, 1]} : vector<8x8x32xf32> to vector<8x1x32xf32>
    %382 = vector.extract_strided_slice %356 {offsets = [4, 0, 0], sizes = [1, 8, 32], strides = [1, 1, 1]} : vector<8x8x32xf32> to vector<1x8x32xf32>
    %383 = vector.broadcast %381 : vector<8x1x32xf32> to vector<8x8x32xf32>
    %384 = vector.broadcast %382 : vector<1x8x32xf32> to vector<8x8x32xf32>
    %385 = arith.mulf %383, %384 : vector<8x8x32xf32>
    %386 = arith.addf %380, %385 : vector<8x8x32xf32>
    %387 = vector.extract_strided_slice %355 {offsets = [0, 5, 0], sizes = [8, 1, 32], strides = [1, 1, 1]} : vector<8x8x32xf32> to vector<8x1x32xf32>
    %388 = vector.extract_strided_slice %356 {offsets = [5, 0, 0], sizes = [1, 8, 32], strides = [1, 1, 1]} : vector<8x8x32xf32> to vector<1x8x32xf32>
    %389 = vector.broadcast %387 : vector<8x1x32xf32> to vector<8x8x32xf32>
    %390 = vector.broadcast %388 : vector<1x8x32xf32> to vector<8x8x32xf32>
    %391 = arith.mulf %389, %390 : vector<8x8x32xf32>
    %392 = arith.addf %386, %391 : vector<8x8x32xf32>
    %393 = vector.extract_strided_slice %355 {offsets = [0, 6, 0], sizes = [8, 1, 32], strides = [1, 1, 1]} : vector<8x8x32xf32> to vector<8x1x32xf32>
    %394 = vector.extract_strided_slice %356 {offsets = [6, 0, 0], sizes = [1, 8, 32], strides = [1, 1, 1]} : vector<8x8x32xf32> to vector<1x8x32xf32>
    %395 = vector.broadcast %393 : vector<8x1x32xf32> to vector<8x8x32xf32>
    %396 = vector.broadcast %394 : vector<1x8x32xf32> to vector<8x8x32xf32>
    %397 = arith.mulf %395, %396 : vector<8x8x32xf32>
    %398 = arith.addf %392, %397 : vector<8x8x32xf32>
    %399 = vector.extract_strided_slice %355 {offsets = [0, 7, 0], sizes = [8, 1, 32], strides = [1, 1, 1]} : vector<8x8x32xf32> to vector<8x1x32xf32>
    %400 = vector.extract_strided_slice %356 {offsets = [7, 0, 0], sizes = [1, 8, 32], strides = [1, 1, 1]} : vector<8x8x32xf32> to vector<1x8x32xf32>
    %401 = vector.broadcast %399 : vector<8x1x32xf32> to vector<8x8x32xf32>
    %402 = vector.broadcast %400 : vector<1x8x32xf32> to vector<8x8x32xf32>
    %403 = arith.mulf %401, %402 : vector<8x8x32xf32>
    %404 = arith.addf %398, %403 : vector<8x8x32xf32>
    %cst_159 = arith.constant dense<0xFF800000> : vector<8x32xf32>
    %405 = vector.multi_reduction <maximumf>, %404, %cst_159 [1] : vector<8x8x32xf32> to vector<8x32xf32>
    %406 = vector.shape_cast %405 : vector<8x32xf32> to vector<8x1x32xf32>
    %407 = vector.broadcast %406 : vector<8x1x32xf32> to vector<8x8x32xf32>
    %408 = arith.subf %404, %407 : vector<8x8x32xf32>
    %409 = math.exp %408 : vector<8x8x32xf32>
    %cst_160 = arith.constant dense<0.000000e+00> : vector<8x32xf32>
    %410 = vector.multi_reduction <add>, %409, %cst_160 [1] : vector<8x8x32xf32> to vector<8x32xf32>
    %411 = vector.shape_cast %410 : vector<8x32xf32> to vector<8x1x32xf32>
    %412 = tpu.reciprocal %411 {approx = true} : vector<8x1x32xf32> -> vector<8x1x32xf32>
    %413 = vector.broadcast %412 : vector<8x1x32xf32> to vector<8x8x32xf32>
    %414 = arith.mulf %409, %413 : vector<8x8x32xf32>
    %415 = vector.extract_strided_slice %414 {offsets = [0, 0, 0], sizes = [8, 1, 32], strides = [1, 1, 1]} : vector<8x8x32xf32> to vector<8x1x32xf32>
    %416 = vector.extract_strided_slice %357 {offsets = [0, 0, 0], sizes = [1, 8, 32], strides = [1, 1, 1]} : vector<8x8x32xf32> to vector<1x8x32xf32>
    %417 = vector.broadcast %415 : vector<8x1x32xf32> to vector<8x8x32xf32>
    %418 = vector.broadcast %416 : vector<1x8x32xf32> to vector<8x8x32xf32>
    %419 = arith.mulf %417, %418 : vector<8x8x32xf32>
    %420 = vector.extract_strided_slice %414 {offsets = [0, 1, 0], sizes = [8, 1, 32], strides = [1, 1, 1]} : vector<8x8x32xf32> to vector<8x1x32xf32>
    %421 = vector.extract_strided_slice %357 {offsets = [1, 0, 0], sizes = [1, 8, 32], strides = [1, 1, 1]} : vector<8x8x32xf32> to vector<1x8x32xf32>
    %422 = vector.broadcast %420 : vector<8x1x32xf32> to vector<8x8x32xf32>
    %423 = vector.broadcast %421 : vector<1x8x32xf32> to vector<8x8x32xf32>
    %424 = arith.mulf %422, %423 : vector<8x8x32xf32>
    %425 = arith.addf %419, %424 : vector<8x8x32xf32>
    %426 = vector.extract_strided_slice %414 {offsets = [0, 2, 0], sizes = [8, 1, 32], strides = [1, 1, 1]} : vector<8x8x32xf32> to vector<8x1x32xf32>
    %427 = vector.extract_strided_slice %357 {offsets = [2, 0, 0], sizes = [1, 8, 32], strides = [1, 1, 1]} : vector<8x8x32xf32> to vector<1x8x32xf32>
    %428 = vector.broadcast %426 : vector<8x1x32xf32> to vector<8x8x32xf32>
    %429 = vector.broadcast %427 : vector<1x8x32xf32> to vector<8x8x32xf32>
    %430 = arith.mulf %428, %429 : vector<8x8x32xf32>
    %431 = arith.addf %425, %430 : vector<8x8x32xf32>
    %432 = vector.extract_strided_slice %414 {offsets = [0, 3, 0], sizes = [8, 1, 32], strides = [1, 1, 1]} : vector<8x8x32xf32> to vector<8x1x32xf32>
    %433 = vector.extract_strided_slice %357 {offsets = [3, 0, 0], sizes = [1, 8, 32], strides = [1, 1, 1]} : vector<8x8x32xf32> to vector<1x8x32xf32>
    %434 = vector.broadcast %432 : vector<8x1x32xf32> to vector<8x8x32xf32>
    %435 = vector.broadcast %433 : vector<1x8x32xf32> to vector<8x8x32xf32>
    %436 = arith.mulf %434, %435 : vector<8x8x32xf32>
    %437 = arith.addf %431, %436 : vector<8x8x32xf32>
    %438 = vector.extract_strided_slice %414 {offsets = [0, 4, 0], sizes = [8, 1, 32], strides = [1, 1, 1]} : vector<8x8x32xf32> to vector<8x1x32xf32>
    %439 = vector.extract_strided_slice %357 {offsets = [4, 0, 0], sizes = [1, 8, 32], strides = [1, 1, 1]} : vector<8x8x32xf32> to vector<1x8x32xf32>
    %440 = vector.broadcast %438 : vector<8x1x32xf32> to vector<8x8x32xf32>
    %441 = vector.broadcast %439 : vector<1x8x32xf32> to vector<8x8x32xf32>
    %442 = arith.mulf %440, %441 : vector<8x8x32xf32>
    %443 = arith.addf %437, %442 : vector<8x8x32xf32>
    %444 = vector.extract_strided_slice %414 {offsets = [0, 5, 0], sizes = [8, 1, 32], strides = [1, 1, 1]} : vector<8x8x32xf32> to vector<8x1x32xf32>
    %445 = vector.extract_strided_slice %357 {offsets = [5, 0, 0], sizes = [1, 8, 32], strides = [1, 1, 1]} : vector<8x8x32xf32> to vector<1x8x32xf32>
    %446 = vector.broadcast %444 : vector<8x1x32xf32> to vector<8x8x32xf32>
    %447 = vector.broadcast %445 : vector<1x8x32xf32> to vector<8x8x32xf32>
    %448 = arith.mulf %446, %447 : vector<8x8x32xf32>
    %449 = arith.addf %443, %448 : vector<8x8x32xf32>
    %450 = vector.extract_strided_slice %414 {offsets = [0, 6, 0], sizes = [8, 1, 32], strides = [1, 1, 1]} : vector<8x8x32xf32> to vector<8x1x32xf32>
    %451 = vector.extract_strided_slice %357 {offsets = [6, 0, 0], sizes = [1, 8, 32], strides = [1, 1, 1]} : vector<8x8x32xf32> to vector<1x8x32xf32>
    %452 = vector.broadcast %450 : vector<8x1x32xf32> to vector<8x8x32xf32>
    %453 = vector.broadcast %451 : vector<1x8x32xf32> to vector<8x8x32xf32>
    %454 = arith.mulf %452, %453 : vector<8x8x32xf32>
    %455 = arith.addf %449, %454 : vector<8x8x32xf32>
    %456 = vector.extract_strided_slice %414 {offsets = [0, 7, 0], sizes = [8, 1, 32], strides = [1, 1, 1]} : vector<8x8x32xf32> to vector<8x1x32xf32>
    %457 = vector.extract_strided_slice %357 {offsets = [7, 0, 0], sizes = [1, 8, 32], strides = [1, 1, 1]} : vector<8x8x32xf32> to vector<1x8x32xf32>
    %458 = vector.broadcast %456 : vector<8x1x32xf32> to vector<8x8x32xf32>
    %459 = vector.broadcast %457 : vector<1x8x32xf32> to vector<8x8x32xf32>
    %460 = arith.mulf %458, %459 : vector<8x8x32xf32>
    %461 = arith.addf %455, %460 : vector<8x8x32xf32>
    %462 = vector.shape_cast %461 : vector<8x8x32xf32> to vector<64x32xf32>
    %463 = arith.truncf %462 : vector<64x32xf32> to vector<64x32xbf16>
    %c0_161 = arith.constant 0 : index
    %c0_162 = arith.constant 0 : index
    %464 = vector.load %arg25[%c0_161, %c0_162] : memref<32x32xbf16, #tpu.memory_space<vmem>>, vector<32x32xbf16>
    %cst_163 = arith.constant dense<0.000000e+00> : vector<64x32xf32>
    %465 = tpu.matmul %463, %464, %cst_163 {dimension_numbers = #tpu.dot_dimension_numbers<[1], [0], [0], [1], [0, 0, 1, 1], [], []>} : vector<64x32xbf16>, vector<32x32xbf16>, vector<64x32xf32> -> vector<64x32xf32>
    %c0_164 = arith.constant 0 : index
    %c0_165 = arith.constant 0 : index
    %466 = vector.load %arg26[%c0_164, %c0_165] : memref<1x32xf32, #tpu.memory_space<vmem>>, vector<1x32xf32>
    %467 = vector.broadcast %466 : vector<1x32xf32> to vector<64x32xf32>
    %468 = arith.addf %465, %467 : vector<64x32xf32>
    %c0_166 = arith.constant 0 : index
    %c0_167 = arith.constant 0 : index
    %469 = vector.load %arg27[%c0_166, %c0_167] : memref<1x32xf32, #tpu.memory_space<vmem>>, vector<1x32xf32>
    %470 = vector.broadcast %469 : vector<1x32xf32> to vector<64x32xf32>
    %471 = arith.mulf %468, %470 : vector<64x32xf32>
    %c0_168 = arith.constant 0 : index
    %c0_169 = arith.constant 0 : index
    %472 = vector.load %arg28[%c0_168, %c0_169] : memref<1x32xf32, #tpu.memory_space<vmem>>, vector<1x32xf32>
    %473 = vector.broadcast %472 : vector<1x32xf32> to vector<64x32xf32>
    %474 = arith.addf %471, %473 : vector<64x32xf32>
    %c0_170 = arith.constant 0 : index
    %c0_171 = arith.constant 0 : index
    %475 = vector.load %arg29[%c0_170, %c0_171] : memref<1x32xf32, #tpu.memory_space<vmem>>, vector<1x32xf32>
    %476 = vector.broadcast %475 : vector<1x32xf32> to vector<64x32xf32>
    %477 = arith.addf %474, %476 : vector<64x32xf32>
    %478 = arith.addf %477, %47 : vector<64x32xf32>
    %c0_172 = arith.constant 0 : index
    %c0_173 = arith.constant 0 : index
    %479 = vector.load %arg30[%c0_172, %c0_173] : memref<64x32xf32, #tpu.memory_space<vmem>>, vector<64x32xf32>
    tpu.vector_store %arg30[%c0_172, %c0_173], %478 {strides = array<i32>} : memref<64x32xf32, #tpu.memory_space<vmem>>, vector<64x32xf32>,
    return
  }
  func.func @transform_0(%arg0: i32) -> (i32, i32) {
    %c0_i32 = arith.constant 0 : i32
    %c0_i32_0 = arith.constant 0 : i32
    return %arg0, %c0_i32 : i32, i32
  }
  func.func @transform_1(%arg0: i32) -> (i32, i32) {
    %c0_i32 = arith.constant 0 : i32
    %c0_i32_0 = arith.constant 0 : i32
    %c0_i32_1 = arith.constant 0 : i32
    return %c0_i32, %c0_i32_0 : i32, i32
  }
  func.func @transform_2(%arg0: i32) -> (i32, i32) {
    %c0_i32 = arith.constant 0 : i32
    %c0_i32_0 = arith.constant 0 : i32
    %c0_i32_1 = arith.constant 0 : i32
    return %c0_i32, %c0_i32_0 : i32, i32
  }
  func.func @transform_3(%arg0: i32) -> (i32, i32) {
    %c0_i32 = arith.constant 0 : i32
    %c0_i32_0 = arith.constant 0 : i32
    %c0_i32_1 = arith.constant 0 : i32
    return %c0_i32, %c0_i32_0 : i32, i32
  }
  func.func @transform_4(%arg0: i32) -> (i32, i32) {
    %c0_i32 = arith.constant 0 : i32
    %c0_i32_0 = arith.constant 0 : i32
    %c0_i32_1 = arith.constant 0 : i32
    return %c0_i32, %c0_i32_0 : i32, i32
  }
  func.func @transform_5(%arg0: i32) -> (i32, i32) {
    %c0_i32 = arith.constant 0 : i32
    %c0_i32_0 = arith.constant 0 : i32
    %c0_i32_1 = arith.constant 0 : i32
    return %c0_i32, %c0_i32_0 : i32, i32
  }
  func.func @transform_6(%arg0: i32) -> (i32, i32) {
    %c0_i32 = arith.constant 0 : i32
    %c0_i32_0 = arith.constant 0 : i32
    %c0_i32_1 = arith.constant 0 : i32
    return %c0_i32, %c0_i32_0 : i32, i32
  }
  func.func @transform_7(%arg0: i32) -> (i32, i32) {
    %c0_i32 = arith.constant 0 : i32
    %c0_i32_0 = arith.constant 0 : i32
    %c0_i32_1 = arith.constant 0 : i32
    return %c0_i32, %c0_i32_0 : i32, i32
  }
  func.func @transform_8(%arg0: i32) -> (i32, i32) {
    %c0_i32 = arith.constant 0 : i32
    %c0_i32_0 = arith.constant 0 : i32
    %c0_i32_1 = arith.constant 0 : i32
    return %c0_i32, %c0_i32_0 : i32, i32
  }
  func.func @transform_9(%arg0: i32) -> (i32, i32) {
    %c0_i32 = arith.constant 0 : i32
    %c0_i32_0 = arith.constant 0 : i32
    %c0_i32_1 = arith.constant 0 : i32
    return %c0_i32, %c0_i32_0 : i32, i32
  }
  func.func @transform_10(%arg0: i32) -> (i32, i32) {
    %c0_i32 = arith.constant 0 : i32
    %c0_i32_0 = arith.constant 0 : i32
    %c0_i32_1 = arith.constant 0 : i32
    return %c0_i32, %c0_i32_0 : i32, i32
  }
  func.func @transform_11(%arg0: i32) -> (i32, i32) {
    %c0_i32 = arith.constant 0 : i32
    %c0_i32_0 = arith.constant 0 : i32
    %c0_i32_1 = arith.constant 0 : i32
    return %c0_i32, %c0_i32_0 : i32, i32
  }
  func.func @transform_12(%arg0: i32) -> (i32, i32) {
    %c0_i32 = arith.constant 0 : i32
    %c0_i32_0 = arith.constant 0 : i32
    %c0_i32_1 = arith.constant 0 : i32
    return %c0_i32, %c0_i32_0 : i32, i32
  }
  func.func @transform_13(%arg0: i32) -> (i32, i32) {
    %c0_i32 = arith.constant 0 : i32
    %c0_i32_0 = arith.constant 0 : i32
    %c0_i32_1 = arith.constant 0 : i32
    return %c0_i32, %c0_i32_0 : i32, i32
  }
  func.func @transform_14(%arg0: i32) -> (i32, i32) {
    %c0_i32 = arith.constant 0 : i32
    %c0_i32_0 = arith.constant 0 : i32
    %c0_i32_1 = arith.constant 0 : i32
    return %c0_i32, %c0_i32_0 : i32, i32
  }
  func.func @transform_15(%arg0: i32) -> (i32, i32) {
    %c0_i32 = arith.constant 0 : i32
    %c0_i32_0 = arith.constant 0 : i32
    %c0_i32_1 = arith.constant 0 : i32
    return %c0_i32, %c0_i32_0 : i32, i32
  }
  func.func @transform_16(%arg0: i32) -> (i32, i32) {
    %c0_i32 = arith.constant 0 : i32
    %c0_i32_0 = arith.constant 0 : i32
    %c0_i32_1 = arith.constant 0 : i32
    return %c0_i32, %c0_i32_0 : i32, i32
  }
  func.func @transform_17(%arg0: i32) -> (i32, i32) {
    %c0_i32 = arith.constant 0 : i32
    %c0_i32_0 = arith.constant 0 : i32
    %c0_i32_1 = arith.constant 0 : i32
    return %c0_i32, %c0_i32_0 : i32, i32
  }
  func.func @transform_18(%arg0: i32) -> (i32, i32) {
    %c0_i32 = arith.constant 0 : i32
    %c0_i32_0 = arith.constant 0 : i32
    %c0_i32_1 = arith.constant 0 : i32
    return %c0_i32, %c0_i32_0 : i32, i32
  }
  func.func @transform_19(%arg0: i32) -> (i32, i32, i32) {
    %c0_i32 = arith.constant 0 : i32
    %c0_i32_0 = arith.constant 0 : i32
    %c0_i32_1 = arith.constant 0 : i32
    %c0_i32_2 = arith.constant 0 : i32
    return %c0_i32, %c0_i32_0, %c0_i32_1 : i32, i32, i32
  }
  func.func @transform_20(%arg0: i32) -> (i32, i32, i32) {
    %c0_i32 = arith.constant 0 : i32
    %c0_i32_0 = arith.constant 0 : i32
    %c0_i32_1 = arith.constant 0 : i32
    %c0_i32_2 = arith.constant 0 : i32
    return %c0_i32, %c0_i32_0, %c0_i32_1 : i32, i32, i32
  }
  func.func @transform_21(%arg0: i32) -> (i32, i32, i32) {
    %c0_i32 = arith.constant 0 : i32
    %c0_i32_0 = arith.constant 0 : i32
    %c0_i32_1 = arith.constant 0 : i32
    %c0_i32_2 = arith.constant 0 : i32
    return %c0_i32, %c0_i32_0, %c0_i32_1 : i32, i32, i32
  }
  func.func @transform_22(%arg0: i32) -> (i32, i32) {
    %c0_i32 = arith.constant 0 : i32
    %c0_i32_0 = arith.constant 0 : i32
    %c0_i32_1 = arith.constant 0 : i32
    return %c0_i32, %c0_i32_0 : i32, i32
  }
  func.func @transform_23(%arg0: i32) -> (i32, i32) {
    %c0_i32 = arith.constant 0 : i32
    %c0_i32_0 = arith.constant 0 : i32
    %c0_i32_1 = arith.constant 0 : i32
    return %c0_i32, %c0_i32_0 : i32, i32
  }
  func.func @transform_24(%arg0: i32) -> (i32, i32) {
    %c0_i32 = arith.constant 0 : i32
    %c0_i32_0 = arith.constant 0 : i32
    %c0_i32_1 = arith.constant 0 : i32
    return %c0_i32, %c0_i32_0 : i32, i32
  }
  func.func @transform_25(%arg0: i32) -> (i32, i32) {
    %c0_i32 = arith.constant 0 : i32
    %c0_i32_0 = arith.constant 0 : i32
    %c0_i32_1 = arith.constant 0 : i32
    return %c0_i32, %c0_i32_0 : i32, i32
  }
  func.func @transform_26(%arg0: i32) -> (i32, i32) {
    %c0_i32 = arith.constant 0 : i32
    %c0_i32_0 = arith.constant 0 : i32
    %c0_i32_1 = arith.constant 0 : i32
    return %c0_i32, %c0_i32_0 : i32, i32
  }
  func.func @transform_27(%arg0: i32) -> (i32, i32) {
    %c0_i32 = arith.constant 0 : i32
    %c0_i32_0 = arith.constant 0 : i32
    %c0_i32_1 = arith.constant 0 : i32
    return %c0_i32, %c0_i32_0 : i32, i32
  }
  func.func @transform_28(%arg0: i32) -> (i32, i32) {
    %c0_i32 = arith.constant 0 : i32
    %c0_i32_0 = arith.constant 0 : i32
    %c0_i32_1 = arith.constant 0 : i32
    return %c0_i32, %c0_i32_0 : i32, i32
  }
  func.func @transform_29(%arg0: i32) -> (i32, i32) {
    %c0_i32 = arith.constant 0 : i32
    %c0_i32_0 = arith.constant 0 : i32
    return %arg0, %c0_i32 : i32, i32
  }
}

</mosaic_0001>

<bundles_post_ra>
// kernel: sma_forward.1
= control target key start
LH: loop header
LB: loop body
LE: loop exit
PB: predicated region body
PF: predicated region fallthrough
CT: control target
= control target key end

     0   :  { %s5393_s6 = smov 1   ;;  %s5394_s10 = smov 2   ;;  %s7767_s0 = inlined_call_operand.smem [shape: u32[30], index: -1, kind: input, shape index: {}] }
   0x1   :  { %s5435_s5 = sld [smem:[%s7767_s0]]   ;;  %s5395_s14 = smov 3  }
   0x2   :  { %s5440_s9 = sld [smem:[%s7767_s0 + %s5393_s6]]   ;;  %s5396_s18 = smov 4  }
   0x3   :  { %s5445_s13 = sld [smem:[%s7767_s0 + %s5394_s10]]   ;;  %s5397_s22 = smov 5  }
   0x4   :  { %s5450_s17 = sld [smem:[%s7767_s0 + %s5395_s14]]   ;;  %s5398_s26 = smov 6  }
   0x5   :  { %s5455_s21 = sld [smem:[%s7767_s0 + %s5396_s18]]   ;;  %s5399_s30 = smov 7  }
   0x6   :  { %s5460_s25 = sld [smem:[%s7767_s0 + %s5397_s22]]   ;;  %s5400_s4 = smov 8  }
   0x7   :  { %s5465_s29 = sld [smem:[%s7767_s0 + %s5398_s26]]   ;;  %s5401_s10 = smov 9  }
   0x8   :  { %s5470_s3 = sld [smem:[%s7767_s0 + %s5399_s30]]   ;;  %s5402_s15 = smov 10  }
   0x9   :  { %s5475_s8 = sld [smem:[%s7767_s0 + %s5400_s4]]   ;;  %s5403_s20 = smov 11  }
   0xa   :  { %s5480_s14 = sld [smem:[%s7767_s0 + %s5401_s10]]   ;;  %s5404_s26 = smov 12  }
   0xb   :  { %s5485_s19 = sld [smem:[%s7767_s0 + %s5402_s15]]   ;;  %s5405_s1 = smov 13  }
   0xc   :  { %s5490_s24 = sld [smem:[%s7767_s0 + %s5403_s20]]   ;;  %s5406_s7 = smov 14  }
   0xd   :  { %s5495_s30 = sld [smem:[%s7767_s0 + %s5404_s26]]   ;;  %s5407_s15 = smov 15  }
   0xe   :  { %s5500_s6 = sld [smem:[%s7767_s0 + %s5405_s1]]   ;;  %s5408_s22 = smov 16  }
   0xf   :  { %s5505_s12 = sld [smem:[%s7767_s0 + %s5406_s7]]   ;;  %s5409_s28 = smov 17  }
  0x10   :  { %s5510_s20 = sld [smem:[%s7767_s0 + %s5407_s15]]   ;;  %s5410_s7 = smov 18  }
  0x11   :  { %s5515_s27 = sld [smem:[%s7767_s0 + %s5408_s22]]   ;;  %s5411_s15 = smov 19  }
  0x12   :  { %7800 = sst [smem:[#allocation2_spill]] %s5490_s24  ;;  %s5412_s22 = smov 20  }
  0x13   :  { %7801 = sst [smem:[#allocation3_spill]] %s5495_s30 }
  0x14   :  { %s5520_s4 = sld [smem:[%s7767_s0 + %s5409_s28]]   ;;  %s5413_s28 = smov 21  }
  0x15   :  { %7802 = sst [smem:[#allocation4_spill]] %s5505_s12 }
  0x16   :  { %s5525_s30 = sld [smem:[%s7767_s0 + %s5410_s7]]   ;;  %s5414_s7 = smov 22  }
  0x17   :  { %7803 = sst [smem:[#allocation5_spill]] %s5515_s27 }
  0x18   :  { %s5530_s24 = sld [smem:[%s7767_s0 + %s5411_s15]]   ;;  %s5415_s15 = smov 23  }
  0x19   :  { %s5535_s12 = sld [smem:[%s7767_s0 + %s5412_s22]]   ;;  %s5416_s22 = smov 24  }
  0x1a   :  { %s5540_s27 = sld [smem:[%s7767_s0 + %s5413_s28]]   ;;  %s5417_s28 = smov 25  }
  0x1c   :  { %7804 = sst [smem:[#allocation6_spill]] %s5525_s30 }
  0x1d   :  { %s5545_s30 = sld [smem:[%s7767_s0 + %s5414_s7]]   ;;  %s5418_s7 = smov 26  }
  0x1e   :  { %7805 = sst [smem:[#allocation7_spill]] %s5530_s24 }
  0x1f   :  { %7806 = sst [smem:[#allocation8_spill]] %s5535_s12 }
  0x20   :  { %7807 = sst [smem:[#allocation9_spill]] %s5540_s27 }
  0x21   :  { %s5550_s24 = sld [smem:[%s7767_s0 + %s5415_s15]]   ;;  %s5419_s15 = smov 27  }
  0x22   :  { %s5555_s12 = sld [smem:[%s7767_s0 + %s5416_s22]]   ;;  %s5420_s22 = smov 28  }
  0x23   :  { %7808 = sst [smem:[#allocation10_spill]] %s5545_s30 }
  0x24   :  { %s5560_s27 = sld [smem:[%s7767_s0 + %s5417_s28]]   ;;  %s5421_s28 = smov 29  }
  0x25   :  { %s5565_s30 = sld [smem:[%s7767_s0 + %s5418_s7]]   ;;  %s5582_s7 = smov 0  }
  0x27   :  { %7809 = sst [smem:[#allocation11_spill]] %s5550_s24 }
  0x28   :  { %7810 = sst [smem:[#allocation12_spill]] %s5555_s12 }
  0x29   :  { %s5570_s24 = sld [smem:[%s7767_s0 + %s5419_s15]]  }
  0x2a   :  { %7811 = sst [smem:[#allocation13_spill]] %s5560_s27 }
  0x2b   :  { %s5575_s12 = sld [smem:[%s7767_s0 + %s5420_s22]]  }
  0x2c   :  { %s5580_s27 = sld [smem:[%s7767_s0 + %s5421_s28]]  }
  0x2d LB: > { %s4580_s10 = sadd.s32 4294967295, %s5391_s7   ;;  %p4584_p0 = scmp.ge.s32.totalorder %s5391_s7, 1  ;;  %s5391_s7 = sphi %s5582_s7, %s69_s7  }
  0x2e   : > { %p818_p1 = scmp.lt.s32.totalorder %s5391_s7, 3 }
  0x30   : > { %p819_p2 = pnand %p4584_p0, %p818_p1 }
  0x32   : > { %822 = sbr.rel (%p819_p2) target bundleno = 1629 (0x65d), region = 136 }
  0x37   : > { %v997_v0 = vld [vmem:[%s5445_s13] sm:$0xff]  ;;  %v998_v1 = vld [vmem:[%s5445_s13 + $0x8] sm:$0xff]  ;;  %s4585_s0 = sshll.u32 %s4580_s10, 3  ;;  %s5422_s11 = smov 32   ;;  %v999_v7 = vld [vmem:[%s5445_s13 + $0x10] sm:$0xff]  ;;  %vm939_vm0 = vcmask 261120  }
  0x38   : > { %v5005_v2 = vpack.i.bf16 %v998_v1, %v997_v0  ;;  %v1001_v3 = vld [vmem:[%s5445_s13 + $0x20] sm:$0xff]  ;;  %v1002_v4 = vld [vmem:[%s5445_s13 + $0x28] sm:$0xff]  ;;  %p895_p3 = scmp.lt.s32.totalorder %s4585_s0, 15  ;;  %v1000_v9 = vld [vmem:[%s5445_s13 + $0x18] sm:$0xff]  ;;  %vm7775_vm1 = vcmask 523264   ;;  %s5423_s18 = smov 96  }
  0x39   : > { %v5015_v5 = vpack.i.bf16 %v1002_v4, %v1001_v3  ;;  %v1005_v6 = vld [vmem:[%s5445_s13 + $0x40] sm:$0xff]  ;;  %v1006_v8 = vld [vmem:[%s5445_s13 + $0x48] sm:$0xff]  ;;  %v1003_v10 = vld [vmem:[%s5445_s13 + $0x30] sm:$0xff]  ;;  %v5010_v19 = vpack.i.bf16 %v1000_v9, %v999_v7  ;;  %s5425_s22 = smov 64   ;;  %vm1977_vm7 = vcmask 1041408   ;;  %vm2085_vm9 = vcmask 1040384  }
  0x3a   : > { %5006 = vrot.lane.b32.xlu0 %v5005_v2, %s5422_s11  ;;  %s7939_s0 = smov (!%p895_p3, %s4585_s0), 15  ;;  %v5025_v11 = vpack.i.bf16 %v1006_v8, %v1005_v6  ;;  %v4900_v12 = vld [vmem:[%s5450_s17 + $0x8] sm:$0xff]  ;;  %v1004_v13 = vld [vmem:[%s5445_s13 + $0x38] sm:$0xff]  ;;  %v1007_v14 = vld [vmem:[%s5445_s13 + $0x50] sm:$0xff]  ;;  %vm2167_vm11 = vcmask 1046528   ;;  %s7828_s23 = sld [smem:[#allocation5_spill]] }
  0x3b   : > { %5016 = vrot.lane.b32.xlu1 %v5015_v5, %s5422_s11  ;;  %v4904_v15 = vld [vmem:[%s5460_s25 + $0x18] sm:$0xff]  ;;  %s4586_s15 = sshll.u32 %s7939_s0, 3  ;;  %958 = vmatpush.bf16.msra.mxu0 %v4900_v12  ;;  %v4899_v17 = vld [vmem:[%s5450_s17] sm:$0xff]  ;;  %v4903_v18 = vld [vmem:[%s5460_s25 + $0x10] sm:$0xff]  ;;  %v5020_v22 = vpack.i.bf16 %v1004_v13, %v1003_v10  ;;  %s7867_s26 = sld [smem:[#allocation4_spill]] }
  0x3c   : > { %5026 = vrot.lane.b32.xlu2 %v5025_v11, %s5422_s11  ;;  %v1008_v16 = vld [vmem:[%s5445_s13 + $0x58] sm:$0xff]  ;;  %s5615_s16 = scalar_lea.vmem %s5435_s5, %s4586_s15  ;;  %1166 = vmatpush.bf16.msra.mxu1 %v4904_v15  ;;  %v4902_v24 = vld [vmem:[%s5460_s25 + $0x8] sm:$0xff]  ;;  %v1009_v25 = vld [vmem:[%s5445_s13 + $0x60] sm:$0xff]  ;;  %s7876_s28 = sld [smem:[#allocation6_spill]] }
  0x3d   : > { %v907_v20 = vld [vmem:[%s5615_s16] sm:$0xff]  ;;  %v908_v21 = vld [vmem:[%s5615_s16 + $0x8] sm:$0xff]  ;;  %4961 = vmatpush.bf16.msra.mxu2 %v4900_v12  ;;  %v5030_v27 = vpack.i.bf16 %v1008_v16, %v1007_v14  ;;  %v1011_v28 = vld [vmem:[%s5445_s13 + $0x70] sm:$0xff]  ;;  %s7881_s1 = sld [smem:[#allocation7_spill]] }
  0x3e   : > { %v915_v23 = vpack.c.bf16 %v908_v21, %v907_v20  ;;  %v1010_v26 = vld [vmem:[%s5445_s13 + $0x68] sm:$0xff]  ;;  %v1012_v29 = vld [vmem:[%s5445_s13 + $0x78] sm:$0xff]  ;;  %v4901_v32 = vld [vmem:[%s5460_s25] sm:$0xff]  ;;  %s7884_s2 = sld [smem:[#allocation8_spill]] }
  0x3f   : > { %959 = vmatpush.bf16.msra.mxu0 %v4899_v17  ;;  %v5035_v30 = vpack.i.bf16 %v1010_v26, %v1009_v25  ;;  %v5040_v31 = vpack.i.bf16 %v1012_v29, %v1011_v28  ;;  %v909_v33 = vld [vmem:[%s5615_s16 + $0x10] sm:$0xff]  ;;  %v910_v34 = vld [vmem:[%s5615_s16 + $0x18] sm:$0xff]  ;;  %v911_v36 = vld [vmem:[%s5615_s16 + $0x20] sm:$0xff]  ;;  %s7886_s10 = sld [smem:[#allocation9_spill]] }
  0x40   : > { %1167 = vmatpush.bf16.msra.mxu1 %v4903_v18  ;;  %v916_v35 = vpack.c.bf16 %v910_v34, %v909_v33  ;;  %v912_v37 = vld [vmem:[%s5615_s16 + $0x28] sm:$0xff]  ;;  %v981_v40 = vld [vmem:[%s5440_s9] sm:$0xff]  ;;  %v913_v47 = vld [vmem:[%s5615_s16 + $0x30] sm:$0xff] }
  0x41   : > { %4962 = vmatpush.bf16.msra.mxu2 %v4899_v17  ;;  %v917_v38 = vpack.c.bf16 %v912_v37, %v911_v36  ;;  %v982_v41 = vld [vmem:[%s5440_s9 + $0x8] sm:$0xff]  ;;  %v914_v48 = vld [vmem:[%s5615_s16 + $0x38] sm:$0xff]  ;;  %v983_v53 = vld [vmem:[%s5440_s9 + $0x10] sm:$0xff]  ;;  %s7900_s16 = sld [smem:[#allocation10_spill]] }
  0x42   : > { %5011 = vrot.lane.b32.xlu0 %v5010_v19, %s5422_s11  ;;  %4597 = vmatmul.msk.bf16.vlgmr.msra.gmra.mxu0 %vm939_vm0, %v915_v23  ;;  %v918_v49 = vpack.c.bf16 %v914_v48, %v913_v47  ;;  %v984_v54 = vld [vmem:[%s5440_s9 + $0x18] sm:$0xff]  ;;  %v985_v61 = vld [vmem:[%s5440_s9 + $0x20] sm:$0xff]  ;;  %v986_v62 = vld [vmem:[%s5440_s9 + $0x28] sm:$0xff] }
  0x43   : > { %5021 = vrot.lane.b32.xlu1 %v5020_v22, %s5422_s11  ;;  %v987_v5 = vld [vmem:[%s5440_s9 + $0x30] sm:$0xff]  ;;  %v988_v6 = vld [vmem:[%s5440_s9 + $0x38] sm:$0xff]  ;;  %v989_v13 = vld [vmem:[%s5440_s9 + $0x40] sm:$0xff] }
  0x44   : > { %5031 = vrot.lane.b32.xlu2 %v5030_v27, %s5422_s11  ;;  %1168 = vmatpush.bf16.msra.mxu1 %v4902_v24  ;;  %v990_v14 = vld [vmem:[%s5440_s9 + $0x48] sm:$0xff]  ;;  %v991_v22 = vld [vmem:[%s5440_s9 + $0x50] sm:$0xff]  ;;  %v992_v23 = vld [vmem:[%s5440_s9 + $0x58] sm:$0xff] }
  0x45   : > { %4599 = vmatmul.msk.bf16.vlgmr.msra.gmra.mxu2 %vm939_vm0, %v917_v38  ;;  %v4906_v18 = vld [vmem:[%s5470_s3 + $0x8] sm:$0xff]  ;;  %v4905_v27 = vld [vmem:[%s5470_s3] sm:$0xff] }
  0x46   : > { %1281 = vmatpush.bf16.msrb.mxu2 %v4906_v18 }
  0x48   : > { %1169 = vmatpush.bf16.msra.mxu1 %v4901_v32  ;;  %v994_v32 = vld [vmem:[%s5440_s9 + $0x68] sm:$0xff] }
  0x4a   : > { %5036 = vrot.lane.b32.xlu0 %v5035_v30, %s5422_s11  ;;  %1282 = vmatpush.bf16.msrb.mxu2 %v4905_v27 }
  0x4b   : > { %5041 = vrot.lane.b32.xlu1 %v5040_v31, %s5422_s11  ;;  %v993_v31 = vld [vmem:[%s5440_s9 + $0x60] sm:$0xff] }
  0x52   : > { %4598 = vmatmul.msk.bf16.gmra.mxu0 %vm939_vm0, %v916_v35 }
  0x55   : > { %4600 = vmatmul.msk.bf16.gmra.mxu2 %vm939_vm0, %v918_v49  ;;  %v5245_v49 = vld [vmem:[%s5455_s21] ss:$0 sm:$0xff] }
  0x96   : > { %v5027_v10 = vpop.permute.xlu2 %5026 }
  0x97   : > { %v5029_v11 = vunpack.i.h.bf16 %v5027_v10  ;;  %v5028_v12 = vunpack.i.l.bf16 %v5027_v10 }
  0x99   : > { %v1085_v15 = vsel %vm939_vm0, %v989_v13, %v5028_v12  ;;  %v1086_v16 = vsel %vm939_vm0, %v990_v14, %v5029_v11 }
  0x9a   : > { %v1097_v17 = vpack.c.bf16 %v1086_v16, %v1085_v15 }
  0x9e   : > { %v5032_v19 = vpop.permute.xlu2 %5031 }
  0x9f   : > { %v5034_v20 = vunpack.i.h.bf16 %v5032_v19  ;;  %v5033_v21 = vunpack.i.l.bf16 %v5032_v19 }
  0xa1   : > { %v1087_v24 = vsel %vm939_vm0, %v991_v22, %v5033_v21  ;;  %v1088_v25 = vsel %vm939_vm0, %v992_v23, %v5034_v20 }
  0xa2   : > { %v1098_v26 = vpack.c.bf16 %v1088_v25, %v1087_v24 }
  0xac   : > { %v5007_v39 = vpop.permute.xlu0 %5006 }
  0xad   : > { %v5009_v42 = vunpack.i.h.bf16 %v5007_v39  ;;  %v5008_v43 = vunpack.i.l.bf16 %v5007_v39  ;;  %v5017_v58 = vpop.permute.xlu1 %5016  ;;  %v995_v39 = vld [vmem:[%s5440_s9 + $0x70] sm:$0xff] }
  0xae   : > { %v5019_v59 = vunpack.i.h.bf16 %v5017_v58  ;;  %v5018_v60 = vunpack.i.l.bf16 %v5017_v58 }
  0xaf   : > { %v1077_v44 = vsel %vm939_vm0, %v981_v40, %v5008_v43  ;;  %v1078_v45 = vsel %vm939_vm0, %v982_v41, %v5009_v42  ;;  %v996_v40 = vld [vmem:[%s5440_s9 + $0x78] sm:$0xff] }
  0xb0   : > { %v1093_v46 = vpack.c.bf16 %v1078_v45, %v1077_v44  ;;  %v1081_v63 = vsel %vm939_vm0, %v985_v61, %v5018_v60  ;;  %v1082_v0 = vsel %vm939_vm0, %v986_v62, %v5019_v59  ;;  %v5683_v45 = vld [vmem:[%s5465_s29] ss:$0 sm:$0xff] }
  0xb1   : > { %v1095_v1 = vpack.c.bf16 %v1082_v0, %v1081_v63 }
  0xb2   : > { %4617 = vmatmul.msk.bf16.vlgmr.msra.gmra.mxu1 %vm7775_vm1, %v1093_v46 }
  0xb4   : > { %v5012_v50 = vpop.permute.xlu0 %5011 }
  0xb5   : > { %v5014_v51 = vunpack.i.h.bf16 %v5012_v50  ;;  %v5013_v52 = vunpack.i.l.bf16 %v5012_v50  ;;  %v5022_v2 = vpop.permute.xlu1 %5021 }
  0xb6   : > { %v5024_v3 = vunpack.i.h.bf16 %v5022_v2  ;;  %v5023_v4 = vunpack.i.l.bf16 %v5022_v2 }
  0xb7   : > { %v1079_v55 = vsel %vm939_vm0, %v983_v53, %v5013_v52  ;;  %v1080_v56 = vsel %vm939_vm0, %v984_v54, %v5014_v51 }
  0xb8   : > { %v1094_v57 = vpack.c.bf16 %v1080_v56, %v1079_v55  ;;  %v1083_v7 = vsel %vm939_vm0, %v987_v5, %v5023_v4  ;;  %v1084_v8 = vsel %vm939_vm0, %v988_v6, %v5024_v3 }
  0xb9   : > { %v1096_v9 = vpack.c.bf16 %v1084_v8, %v1083_v7 }
  0xbc   : > { %v5037_v28 = vpop.permute.xlu0 %5036 }
  0xbd   : > { %v5039_v29 = vunpack.i.h.bf16 %v5037_v28  ;;  %v5038_v30 = vunpack.i.l.bf16 %v5037_v28  ;;  %v5042_v36 = vpop.permute.xlu1 %5041 }
  0xbe   : > { %v5044_v37 = vunpack.i.h.bf16 %v5042_v36  ;;  %v5043_v38 = vunpack.i.l.bf16 %v5042_v36 }
  0xbf   : > { %v1089_v33 = vsel %vm939_vm0, %v993_v31, %v5038_v30  ;;  %v1090_v34 = vsel %vm939_vm0, %v994_v32, %v5039_v29  ;;  %v961_v44 = vpop.f32.mrf.mxu0 }
  0xc0   : > { %v1099_v35 = vpack.c.bf16 %v1090_v34, %v1089_v33  ;;  %v1091_v41 = vsel %vm939_vm0, %v995_v39, %v5043_v38  ;;  %v1092_v42 = vsel %vm939_vm0, %v996_v40, %v5044_v37  ;;  %v962_v50 = vadd.f32 %v5245_v49, %v961_v44 }
  0xc1   : > { %v1100_v43 = vpack.c.bf16 %v1092_v42, %v1091_v41 }
  0xc2   : > { %4618 = vmatmul.msk.bf16.gmra.mxu1 %vm7775_vm1, %v1094_v57 }
  0xc7   : > { %v963_v48 = vpop.f32.mrf.mxu0 }
  0xc8   : > { %v964_v52 = vadd.f32 %v5245_v49, %v963_v48  ;;  %v971_v62 = vpop.f32.mrf.mxu2 }
  0xc9   : > { %v972_v7 = vadd.f32 %v5245_v49, %v971_v62 }
  0xcf   : > { %v966_v56 = vpop.f32.mrf.mxu0 }
  0xd0   : > { %v967_v61 = vadd.f32 %v5245_v49, %v966_v56  ;;  %v973_v6 = vpop.f32.mrf.mxu2 }
  0xd1   : > { %v974_v10 = vadd.f32 %v5245_v49, %v973_v6 }
  0xd2   : > { %4619 = vmatmul.msk.bf16.gmra.mxu1 %vm7775_vm1, %v1095_v1 }
  0xd7   : > { %v968_v60 = vpop.f32.mrf.mxu0 }
  0xd8   : > { %v969_v0 = vadd.f32 %v5245_v49, %v968_v60  ;;  %v976_v14 = vpop.f32.mrf.mxu2 }
  0xd9   : > { %v977_v18 = vadd.f32 %v5245_v49, %v976_v14 }
  0xe2   : > { %4620 = vmatmul.msk.bf16.gmra.mxu1 %vm7775_vm1, %v1096_v9 }
  0xf2   : > { %4621 = vmatmul.msk.bf16.gmra.mxu1 %vm7775_vm1, %v1097_v17  ;;  %v978_v17 = vpop.f32.mrf.mxu2 }
  0xf3   : > { %v979_v21 = vadd.f32 %v5245_v49, %v978_v17 }
 0x102   : > { %4622 = vmatmul.msk.bf16.gmra.mxu1 %vm7775_vm1, %v1098_v26 }
 0x112   : > { %4623 = vmatmul.msk.bf16.gmra.mxu1 %vm7775_vm1, %v1099_v35 }
 0x122   : > { %4624 = vmatmul.msk.bf16.gmra.mxu1 %vm7775_vm1, %v1100_v43  ;;  %vm2814_vm1 = vcmask 1045504  }
 0x12f   : > { %v1171_v46 = vpop.f32.mrf.mxu1 }
 0x130   : > { %v1172_v47 = vadd.f32 %v5683_v45, %v1171_v46 }
 0x132   : > { %1412 = vrot.lane.b32.xlu2 %v1172_v47, %s5423_s18  ;;  %v1211_v54 = vmul.f32 %v1172_v47, %v962_v50 }
 0x137   : > { %v1173_v51 = vpop.f32.mrf.mxu1 }
 0x138   : > { %v1174_v53 = vadd.f32 %v5683_v45, %v1173_v51 }
 0x13a   : > { %v1212_v55 = vmul.f32 %v1174_v53, %v964_v52  ;;  %1414 = vrot.lane.b32.xlu0 %v1174_v53, %s5423_s18 }
 0x13c   : > { %v1227_v57 = vpack.c.bf16 %v1212_v55, %v1211_v54 }
 0x13e   : > { %4633 = vmatmul.msk.bf16.vlgmr.msrb.gmra.mxu2 %vm939_vm0, %v1227_v57 }
 0x13f   : > { %v1176_v58 = vpop.f32.mrf.mxu1 }
 0x140   : > { %v1177_v59 = vadd.f32 %v5683_v45, %v1176_v58 }
 0x142   : > { %1416 = vrot.lane.b32.xlu0 %v1177_v59, %s5423_s18  ;;  %v1213_v2 = vmul.f32 %v1177_v59, %v967_v61 }
 0x147   : > { %v1178_v63 = vpop.f32.mrf.mxu1 }
 0x148   : > { %v1179_v1 = vadd.f32 %v5683_v45, %v1178_v63 }
 0x14a   : > { %v1214_v3 = vmul.f32 %v1179_v1, %v969_v0 }
 0x14c   : > { %v1228_v4 = vpack.c.bf16 %v1214_v3, %v1213_v2  ;;  %v4907_v3 = vld [vmem:[%s5475_s8] sm:$0xff] }
 0x14e   : > { %4634 = vmatmul.msk.bf16.gmra.mxu2 %vm939_vm0, %v1228_v4 }
 0x14f   : > { %v1181_v5 = vpop.f32.mrf.mxu1 }
 0x150   : > { %v1182_v8 = vadd.f32 %v5683_v45, %v1181_v5 }
 0x152   : > { %v1215_v12 = vmul.f32 %v1182_v8, %v972_v7 }
 0x157   : > { %v1183_v9 = vpop.f32.mrf.mxu1 }
 0x158   : > { %v1184_v11 = vadd.f32 %v5683_v45, %v1183_v9 }
 0x15a   : > { %v1216_v13 = vmul.f32 %v1184_v11, %v974_v10 }
 0x15c   : > { %v1229_v15 = vpack.c.bf16 %v1216_v13, %v1215_v12 }
 0x15e   : > { %4635 = vmatmul.msk.bf16.gmra.mxu2 %vm939_vm0, %v1229_v15 }
 0x15f   : > { %v1186_v16 = vpop.f32.mrf.mxu1 }
 0x160   : > { %v1187_v19 = vadd.f32 %v5683_v45, %v1186_v16 }
 0x162   : > { %v1217_v23 = vmul.f32 %v1187_v19, %v977_v18 }
 0x167   : > { %v1188_v20 = vpop.f32.mrf.mxu1 }
 0x168   : > { %v1189_v22 = vadd.f32 %v5683_v45, %v1188_v20 }
 0x16a   : > { %v1218_v24 = vmul.f32 %v1189_v22, %v979_v21 }
 0x16c   : > { %v1230_v25 = vpack.c.bf16 %v1218_v24, %v1217_v23 }
 0x16e   : > { %4636 = vmatmul.msk.bf16.gmra.mxu2 %vm939_vm0, %v1230_v25 }
 0x16f   : > { %v1191_v26 = vpop.f32.mrf.mxu1 }
 0x170   : > { %v1192_v27 = vadd.f32 %v5683_v45, %v1191_v26 }
 0x172   : > { %1460 = vrot.lane.b32.xlu1 %v1192_v27, %s5423_s18  ;;  %v1219_v30 = vmul.f32 %v1192_v27, %v962_v50 }
 0x177   : > { %v1193_v28 = vpop.f32.mrf.mxu1 }
 0x178   : > { %v1194_v29 = vadd.f32 %v5683_v45, %v1193_v28 }
 0x17a   : > { %v1220_v31 = vmul.f32 %v1194_v29, %v964_v52  ;;  %1418 = vrot.lane.b32.xlu1 %v1179_v1, %s5423_s18  ;;  %1462 = vrot.lane.b32.xlu2 %v1194_v29, %s5423_s18 }
 0x17c   : > { %v1231_v32 = vpack.c.bf16 %v1220_v31, %v1219_v30 }
 0x17e   : > { %4637 = vmatmul.msk.bf16.gmra.mxu2 %vm939_vm0, %v1231_v32 }
 0x17f   : > { %v1196_v33 = vpop.f32.mrf.mxu1 }
 0x180   : > { %v1197_v34 = vadd.f32 %v5683_v45, %v1196_v33 }
 0x182   : > { %1420 = vrot.lane.b32.xlu1 %v1182_v8, %s5423_s18  ;;  %1464 = vrot.lane.b32.xlu2 %v1197_v34, %s5423_s18  ;;  %v1221_v37 = vmul.f32 %v1197_v34, %v967_v61 }
 0x187   : > { %v1198_v35 = vpop.f32.mrf.mxu1 }
 0x188   : > { %v1199_v36 = vadd.f32 %v5683_v45, %v1198_v35 }
 0x18a   : > { %v1222_v38 = vmul.f32 %v1199_v36, %v969_v0  ;;  %1466 = vrot.lane.b32.xlu0 %v1199_v36, %s5423_s18  ;;  %1422 = vrot.lane.b32.xlu2 %v1184_v11, %s5423_s18 }
 0x18c   : > { %v1232_v39 = vpack.c.bf16 %v1222_v38, %v1221_v37  ;;  %v1413_v26 = vpop.permute.xlu2 %1412 }
 0x18e   : > { %4638 = vmatmul.msk.bf16.gmra.mxu2 %vm939_vm0, %v1232_v39 }
 0x18f   : > { %v1201_v40 = vpop.f32.mrf.mxu1 }
 0x190   : > { %v1202_v41 = vadd.f32 %v5683_v45, %v1201_v40 }
 0x192   : > { %1468 = vrot.lane.b32.xlu0 %v1202_v41, %s5423_s18  ;;  %1424 = vrot.lane.b32.xlu2 %v1187_v19, %s5423_s18  ;;  %v1223_v44 = vmul.f32 %v1202_v41, %v972_v7 }
 0x197   : > { %v1203_v42 = vpop.f32.mrf.mxu1 }
 0x198   : > { %v1204_v43 = vadd.f32 %v5683_v45, %v1203_v42 }
 0x19a   : > { %v1224_v46 = vmul.f32 %v1204_v43, %v974_v10  ;;  %1470 = vrot.lane.b32.xlu1 %v1204_v43, %s5423_s18  ;;  %1426 = vrot.lane.b32.xlu0 %v1189_v22, %s5423_s18 }
 0x19c   : > { %v1233_v47 = vpack.c.bf16 %v1224_v46, %v1223_v44 }
 0x19e   : > { %4639 = vmatmul.msk.bf16.gmra.mxu2 %vm939_vm0, %v1233_v47 }
 0x19f   : > { %v1206_v48 = vpop.f32.mrf.mxu1 }
 0x1a0   : > { %v1207_v49 = vadd.f32 %v5683_v45, %v1206_v48 }
 0x1a2   : > { %1472 = vrot.lane.b32.xlu1 %v1207_v49, %s5423_s18  ;;  %v1225_v52 = vmul.f32 %v1207_v49, %v977_v18 }
 0x1a7   : > { %v1208_v50 = vpop.f32.mrf.mxu1 }
 0x1a8   : > { %v1209_v51 = vadd.f32 %v5683_v45, %v1208_v50  ;;  %v4908_v45 = vld [vmem:[%s5475_s8 + $0x8] sm:$0xff] }
 0x1a9   : > { %1542 = vmatpush.bf16.msra.mxu3 %v4908_v45 }
 0x1aa   : > { %v1226_v53 = vmul.f32 %v1209_v51, %v979_v21  ;;  %1474 = vrot.lane.b32.xlu2 %v1209_v51, %s5423_s18 }
 0x1ac   : > { %v1234_v54 = vpack.c.bf16 %v1226_v53, %v1225_v52  ;;  %v1415_v37 = vpop.permute.xlu0 %1414 }
 0x1ad   : > { %1543 = vmatpush.bf16.msra.mxu3 %v4907_v3 }
 0x1ae   : > { %4640 = vmatmul.msk.bf16.gmra.mxu2 %vm939_vm0, %v1234_v54 }
 0x1c1   : > { %v1284_v55 = vpop.f32.mrf.mxu2 }
 0x1c9   : > { %v1286_v56 = vpop.f32.mrf.mxu2 }
 0x1d1   : > { %v1289_v57 = vpop.f32.mrf.mxu2 }
 0x1d4   : > { %v1463_v46 = vpop.permute.xlu2 %1462 }
 0x1d9   : > { %v1291_v58 = vpop.f32.mrf.mxu2 }
 0x1e1   : > { %v5726_v59 = vpop.f32.mrf.mxu2 }
 0x1e4   : > { %v1461_v38 = vpop.permute.xlu1 %1460 }
 0x1e9   : > { %v5728_v60 = vpop.f32.mrf.mxu2 }
 0x1f1   : > { %v5730_v61 = vpop.f32.mrf.mxu2 }
 0x1f9   : > { %v5732_v62 = vpop.f32.mrf.mxu2 }
 0x201   : > { %v1304_v63 = vpop.f32.mrf.mxu2 }
 0x202   : > { %v1324_v0 = vmax.f32 %v1284_v55, %v1304_v63 }
 0x204   : > { %v1332_v1 = vsub.f32 %v1284_v55, %v1324_v0  ;;  %v1356_v2 = vsub.f32 %v1304_v63, %v1324_v0 }
 0x206   : > { %v1340_v4 = vmul.f32 1.442695, %v1332_v1  ;;  %v1364_v5 = vmul.f32 1.442695, %v1356_v2  ;;  %v1417_v1 = vpop.permute.xlu0 %1416 }
 0x208   : > { %5267 = vpow2.f32 %v1340_v4 }
 0x209   : > { %5269 = vpow2.f32 %v1364_v5  ;;  %v1306_v6 = vpop.f32.mrf.mxu2 }
 0x20a   : > { %v1325_v7 = vmax.f32 %v1286_v56, %v1306_v6 }
 0x20c   : > { %v1333_v8 = vsub.f32 %v1286_v56, %v1325_v7  ;;  %v1357_v9 = vsub.f32 %v1306_v6, %v1325_v7 }
 0x20e   : > { %v5268_v10 = vpop.eup %5267  ;;  %v1342_v11 = vmul.f32 1.442695, %v1333_v8  ;;  %v1366_v12 = vmul.f32 1.442695, %v1357_v9 }
 0x20f   : > { %v5270_v13 = vpop.eup %5269 }
 0x210   : > { %v1380_v14 = vadd.f32 %v5270_v13, %v5268_v10  ;;  %5271 = vpow2.f32 %v1342_v11  ;;  %v1465_v11 = vpop.permute.xlu2 %1464 }
 0x211   : > { %5273 = vpow2.f32 %v1366_v12  ;;  %v1309_v15 = vpop.f32.mrf.mxu2  ;;  %v1419_v12 = vpop.permute.xlu1 %1418 }
 0x212   : > { %v1326_v16 = vmax.f32 %v1289_v57, %v1309_v15  ;;  %5275 = vrcp.f32 %v1380_v14 }
 0x214   : > { %v1334_v17 = vsub.f32 %v1289_v57, %v1326_v16  ;;  %v1358_v18 = vsub.f32 %v1309_v15, %v1326_v16 }
 0x216   : > { %v5272_v19 = vpop.eup %5271  ;;  %v1344_v20 = vmul.f32 1.442695, %v1334_v17  ;;  %v1368_v21 = vmul.f32 1.442695, %v1358_v18 }
 0x217   : > { %v5274_v22 = vpop.eup %5273 }
 0x218   : > { %v1381_v23 = vadd.f32 %v5274_v22, %v5272_v19  ;;  %5277 = vpow2.f32 %v1344_v20  ;;  %v5276_v24 = vpop.eup %5275 }
 0x219   : > { %5279 = vpow2.f32 %v1368_v21  ;;  %v1311_v25 = vpop.f32.mrf.mxu2  ;;  %v1396_v30 = vmul.f32 %v5276_v24, %v5268_v10  ;;  %v1444_v31 = vmul.f32 %v5276_v24, %v5270_v13 }
 0x21a   : > { %5281 = vrcp.f32 %v1381_v23  ;;  %v1327_v27 = vmax.f32 %v1291_v58, %v1311_v25 }
 0x21b   : > { %v1436_v40 = vmul.f32 %v1413_v26, %v1396_v30  ;;  %v1484_v44 = vmul.f32 %v1461_v38, %v1444_v31 }
 0x21c   : > { %v1335_v28 = vsub.f32 %v1291_v58, %v1327_v27  ;;  %v1359_v29 = vsub.f32 %v1311_v25, %v1327_v27 }
 0x21d   : > { %v1492_v52 = vadd.f32 %v1484_v44, %v1436_v40 }
 0x21e   : > { %v5278_v32 = vpop.eup %5277  ;;  %v1346_v33 = vmul.f32 1.442695, %v1335_v28  ;;  %v1370_v34 = vmul.f32 1.442695, %v1359_v29 }
 0x21f   : > { %v5280_v35 = vpop.eup %5279 }
 0x220   : > { %v5282_v36 = vpop.eup %5281  ;;  %v1382_v39 = vadd.f32 %v5280_v35, %v5278_v32  ;;  %5283 = vpow2.f32 %v1346_v33 }
 0x221   : > { %v1445_v41 = vmul.f32 %v5282_v36, %v5274_v22  ;;  %5285 = vpow2.f32 %v1370_v34  ;;  %v1314_v42 = vpop.f32.mrf.mxu2  ;;  %v1397_v43 = vmul.f32 %v5282_v36, %v5272_v19  ;;  %v1467_v19 = vpop.permute.xlu0 %1466  ;;  %v1569_v34 = vlaneseq }
 0x222   : > { %v1328_v47 = vmax.f32 %v5726_v59, %v1314_v42  ;;  %5287 = vrcp.f32 %v1382_v39 }
 0x223   : > { %v1437_v48 = vmul.f32 %v1415_v37, %v1397_v43  ;;  %v1485_v49 = vmul.f32 %v1463_v46, %v1445_v41  ;;  %v5745_v37 = vshrl.u32 %v1569_v34, 7 }
 0x224   : > { %v1336_v50 = vsub.f32 %v5726_v59, %v1328_v47  ;;  %v1360_v51 = vsub.f32 %v1314_v42, %v1328_v47 }
 0x225   : > { %v1493_v53 = vadd.f32 %v1485_v49, %v1437_v48  ;;  %v1571_v41 = vadd.s32 8, %v5745_v37  ;;  %v5750_v42 = vand.u32 7, %v5745_v37 }
 0x226   : > { %v5284_v54 = vpop.eup %5283  ;;  %v1348_v55 = vmul.f32 1.442695, %v1336_v50  ;;  %v1372_v56 = vmul.f32 1.442695, %v1360_v51  ;;  %v5424_v51 = vmov 0.0  }
 0x227   : > { %v5286_v57 = vpop.eup %5285  ;;  %v1500_v58 = vpack.c.bf16 %v1493_v53, %v1492_v52  ;;  %v5752_v49 = vand.u32 7, %v1571_v41  ;;  %v5755_v50 = vadd.s32 6, %v5750_v42  ;;  %v1423_v53 = vpop.permute.xlu2 %1422 }
 0x228   : > { %v1383_v45 = vadd.f32 %v5286_v57, %v5284_v54  ;;  %5289 = vpow2.f32 %v1348_v55  ;;  %v5288_v63 = vpop.eup %5287 }
 0x229   : > { %5291 = vpow2.f32 %v1372_v56  ;;  %4649 = vmatmul.msk.bf16.vlgmr.msra.gmra.mxu3 %vm939_vm0, %v1500_v58  ;;  %v1316_v0 = vpop.f32.mrf.mxu2  ;;  %v1398_v4 = vmul.f32 %v5288_v63, %v5278_v32  ;;  %v1446_v5 = vmul.f32 %v5288_v63, %v5280_v35  ;;  %v1421_v35 = vpop.permute.xlu1 %1420  ;;  %vm7782_vm2 = vcmp.lt.s32.totalorder %v5755_v50, 8 }
 0x22a   : > { %5293 = vrcp.f32 %v1383_v45  ;;  %v1329_v2 = vmax.f32 %v5728_v60, %v1316_v0  ;;  %v1469_v48 = vpop.permute.xlu0 %1468  ;;  %v5761_v45 = vadd.s32 6, %v5752_v49 }
 0x22b   : > { %v1438_v14 = vmul.f32 %v1417_v1, %v1398_v4  ;;  %v1486_v18 = vmul.f32 %v1465_v11, %v1446_v5 }
 0x22c   : > { %v1337_v59 = vsub.f32 %v5728_v60, %v1329_v2  ;;  %v1361_v3 = vsub.f32 %v1316_v0, %v1329_v2  ;;  %vm7781_vm3 = vcmp.lt.s32.totalorder %v5761_v45, 8 }
 0x22d   : > { %v1494_v24 = vadd.f32 %v1486_v18, %v1438_v14 }
 0x22e   : > { %v5290_v6 = vpop.eup %5289  ;;  %v1350_v7 = vmul.f32 1.442695, %v1337_v59  ;;  %v1374_v8 = vmul.f32 1.442695, %v1361_v3 }
 0x22f   : > { %v5292_v9 = vpop.eup %5291  ;;  %v1425_v11 = vpop.permute.xlu2 %1424 }
 0x230   : > { %v5294_v10 = vpop.eup %5293  ;;  %v1384_v13 = vadd.f32 %v5292_v9, %v5290_v6  ;;  %5295 = vpow2.f32 %v1350_v7 }
 0x231   : > { %v1447_v15 = vmul.f32 %v5294_v10, %v5286_v57  ;;  %5297 = vpow2.f32 %v1374_v8  ;;  %v1319_v16 = vpop.f32.mrf.mxu2  ;;  %v1399_v17 = vmul.f32 %v5294_v10, %v5284_v54  ;;  %v1471_v63 = vpop.permute.xlu1 %1470 }
 0x232   : > { %5299 = vrcp.f32 %v1384_v13  ;;  %v1330_v60 = vmax.f32 %v5730_v61, %v1319_v16 }
 0x233   : > { %v1439_v20 = vmul.f32 %v1419_v12, %v1399_v17  ;;  %v1487_v21 = vmul.f32 %v1467_v19, %v1447_v15 }
 0x234   : > { %v1338_v22 = vsub.f32 %v5730_v61, %v1330_v60  ;;  %v1362_v23 = vsub.f32 %v1319_v16, %v1330_v60 }
 0x235   : > { %v1495_v25 = vadd.f32 %v1487_v21, %v1439_v20  ;;  %v1427_v20 = vpop.permute.xlu0 %1426 }
 0x236   : > { %v5296_v26 = vpop.eup %5295  ;;  %v1352_v27 = vmul.f32 1.442695, %v1338_v22  ;;  %v1376_v28 = vmul.f32 1.442695, %v1362_v23 }
 0x237   : > { %v5298_v29 = vpop.eup %5297  ;;  %v1501_v30 = vpack.c.bf16 %v1495_v25, %v1494_v24  ;;  %v1475_v60 = vpop.permute.xlu2 %1474 }
 0x238   : > { %v5300_v31 = vpop.eup %5299  ;;  %v1385_v32 = vadd.f32 %v5298_v29, %v5296_v26  ;;  %5301 = vpow2.f32 %v1352_v27  ;;  %v1573_v27 = vadd.s32 24, %v5745_v37 }
 0x239   : > { %5303 = vpow2.f32 %v1376_v28  ;;  %4650 = vmatmul.msk.bf16.gmra.mxu3 %vm939_vm0, %v1501_v30  ;;  %v1321_v33 = vpop.f32.mrf.mxu2  ;;  %v1448_v36 = vmul.f32 %v5300_v31, %v5292_v9  ;;  %v1400_v40 = vmul.f32 %v5300_v31, %v5290_v6  ;;  %v1473_v15 = vpop.permute.xlu1 %1472 }
 0x23a   : > { %5305 = vrcp.f32 %v1385_v32  ;;  %v1331_v61 = vmax.f32 %v5732_v62, %v1321_v33  ;;  %v4910_v32 = vld [vmem:[%s5485_s19 + $0x8] sm:$0xff] }
 0x23b   : > { %v1440_v55 = vmul.f32 %v1421_v35, %v1400_v40  ;;  %v1488_v56 = vmul.f32 %v1469_v48, %v1448_v36  ;;  %1708 = vmatpush.bf16.msrb.mxu0 %v4910_v32  ;;  %v1947_v36 = vld [vmem:[%s5500_s6 + $0x18] sm:$0xff]  ;;  %v1577_v48 = vadd.s32 56, %v5745_v37 }
 0x23c   : > { %v1339_v38 = vsub.f32 %v5732_v62, %v1331_v61  ;;  %v1363_v39 = vsub.f32 %v1321_v33, %v1331_v61  ;;  %v5758_v62 = vrot.slane %v5424_v51, 6  ;;  %v4909_v61 = vld [vmem:[%s5485_s19] sm:$0xff]  ;;  %1963 = vmatpush.msrb.mxu3 %v1947_v36 }
 0x23d   : > { %v1496_v3 = vadd.f32 %v1488_v56, %v1440_v55 }
 0x23e   : > { %v5302_v43 = vpop.eup %5301  ;;  %v1354_v44 = vmul.f32 1.442695, %v1339_v38  ;;  %v1378_v46 = vmul.f32 1.442695, %v1363_v39  ;;  %v2892_v2 = vsel %vm7782_vm2, %v5758_v62, 0.0  ;;  %v2893_v59 = vsel %vm7781_vm3, %v5758_v62, 0.0 }
 0x23f   : > { %v5304_v47 = vpop.eup %5303  ;;  %v5045_v5 = vpack.i.bf16 %v2893_v59, %v2892_v2  ;;  %1709 = vmatpush.bf16.msrb.mxu0 %v4909_v61  ;;  %v1574_v38 = vadd.s32 32, %v5745_v37  ;;  %v1575_v39 = vadd.s32 40, %v5745_v37  ;;  %v5847_v59 = vadd.s32 1, %v5750_v42 }
 0x240   : > { %v5306_v52 = vpop.eup %5305  ;;  %v1386_v54 = vadd.f32 %v5304_v47, %v5302_v43  ;;  %5307 = vpow2.f32 %v1354_v44  ;;  %v5812_v44 = vld [vmem:[%s5480_s14] ss:$0 sm:$0xff] }
 0x241   : > { %v1449_v57 = vmul.f32 %v5306_v52, %v5298_v29  ;;  %5309 = vpow2.f32 %v1378_v46  ;;  %v1401_v58 = vmul.f32 %v5306_v52, %v5296_v26  ;;  %5046 = vrot.lane.b32.xlu0 %v5045_v5, %s5425_s22  ;;  %v1572_v26 = vadd.s32 16, %v5745_v37  ;;  %v4927_v52 = vld [vmem:[%s5510_s20 + $0x80] sm:$0xff] }
 0x242   : > { %5311 = vrcp.f32 %v1386_v54  ;;  %v5778_v29 = vand.u32 7, %v1573_v27  ;;  %v5806_v40 = vand.u32 7, %v1574_v38  ;;  %v5808_v41 = vand.u32 7, %v1575_v39  ;;  %v1946_v54 = vld [vmem:[%s5500_s6 + $0x10] sm:$0xff] }
 0x243   : > { %v1441_v0 = vmul.f32 %v1423_v53, %v1401_v58  ;;  %v1489_v1 = vmul.f32 %v1471_v63, %v1449_v57  ;;  %v5776_v28 = vand.u32 7, %v1572_v26  ;;  %v5823_v53 = vadd.s32 4294967295, %v5752_v49  ;;  %1964 = vmatpush.msrb.mxu3 %v1946_v54 }
 0x244   : > { %v5784_v31 = vadd.s32 6, %v5778_v29  ;;  %v5815_v46 = vadd.s32 6, %v5806_v40  ;;  %v5831_v57 = vrot.slane %v5424_v51, 7  ;;  %v5834_v58 = vand.u32 7, %v1577_v48 }
 0x245   : > { %v1497_v4 = vadd.f32 %v1489_v1, %v1441_v0  ;;  %v5781_v30 = vadd.s32 6, %v5776_v28  ;;  %vm2038_vm10 = vcmp.ge.s32.totalorder %v5823_v53, 0  ;;  %v5858_v5 = vadd.s32 1, %v5752_v49 }
 0x246   : > { %v5308_v6 = vpop.eup %5307  ;;  %vm7779_vm5 = vcmp.lt.s32.totalorder %v5784_v31, 8  ;;  %vm7776_vm6 = vcmp.lt.s32.totalorder %v5815_v46, 8  ;;  %vm2134_vm12 = vcmp.lt.s32.totalorder %v5847_v59, 8  ;;  %v5922_v38 = vadd.s32 4294967290, %v5750_v42 }
 0x247   : > { %v5310_v7 = vpop.eup %5309  ;;  %v1502_v8 = vpack.c.bf16 %v1497_v4, %v1496_v3  ;;  %vm7778_vm4 = vcmp.lt.s32.totalorder %v5781_v30, 8  ;;  %v5797_v34 = vsel %vm7779_vm5, %v5758_v62, 0.0  ;;  %v5844_v2 = vsel %vm7776_vm6, %v5758_v62, 0.0 }
 0x248   : > { %v1387_v9 = vadd.f32 %v5310_v7, %v5308_v6  ;;  %v5312_v10 = vpop.eup %5311  ;;  %v5792_v33 = vsel %vm7778_vm4, %v5758_v62, 0.0  ;;  %7813 = vst [vmem:[#allocation15_spill] sm:$0xff] %v5797_v34  ;;  %v5850_v3 = vrot.slane %v5424_v51, 1  ;;  %vm2135_vm14 = vcmp.lt.s32.totalorder %v5858_v5, 8 }
 0x249   : > { %4651 = vmatmul.msk.bf16.gmra.mxu3 %vm939_vm0, %v1502_v8  ;;  %v1450_v12 = vmul.f32 %v5312_v10, %v5304_v47  ;;  %v1402_v13 = vmul.f32 %v5312_v10, %v5302_v43  ;;  %7812 = vst [vmem:[#allocation14_spill] sm:$0xff] %v5792_v33  ;;  %v5050_v35 = vpack.i.bf16 %v5797_v34, %v5792_v33  ;;  %v4928_v43 = vld [vmem:[%s5510_s20 + $0x88] sm:$0xff]  ;;  %v5818_v47 = vadd.s32 6, %v5808_v41 }
 0x24a   : > { %5313 = vrcp.f32 %v1387_v9  ;;  %2703 = vmatpush.bf16.msra.mxu2 %v4928_v43  ;;  %7814 = vst [vmem:[#allocation16_spill] sm:$0xff] %v5844_v2  ;;  %v5925_v39 = vrot.slane %v5424_v51, 2  ;;  %vm7795_vm4 = vcmp.ge.s32.totalorder %v5922_v38, 0 }
 0x24b   : > { %v1442_v18 = vmul.f32 %v1425_v11, %v1402_v13  ;;  %v1490_v19 = vmul.f32 %v1473_v15, %v1450_v12  ;;  %5051 = vrot.lane.b32.xlu2 %v5050_v35, %s5425_s22  ;;  %vm7777_vm8 = vcmp.lt.s32.totalorder %v5818_v47, 8  ;;  %v5873_v11 = vadd.s32 4294967290, %v5834_v58  ;;  %7817 = vst [vmem:[#allocation19_spill] sm:$0xff] %v5922_v38 }
 0x24d   : > { %v1498_v23 = vadd.f32 %v1490_v19, %v1442_v18  ;;  %vm7780_vm15 = vcmp.ge.s32.totalorder %v5873_v11, 0  ;;  %v1945_v18 = vld [vmem:[%s5500_s6 + $0x8] sm:$0xff] }
 0x24e   : > { %2704 = vmatpush.bf16.msra.mxu2 %v4927_v52  ;;  %1965 = vmatpush.msrb.mxu3 %v1945_v18  ;;  %v5934_v52 = vadd.s32 4294967295, %v5778_v29  ;;  %v5965_v18 = vadd.s32 1, %v5778_v29 }
 0x250   : > { %v5314_v14 = vpop.eup %5313  ;;  %vm2040_vm5 = vcmp.ge.s32.totalorder %v5934_v52, 0  ;;  %vm2137_vm3 = vcmp.lt.s32.totalorder %v5965_v18, 8 }
 0x251   : > { %v1451_v16 = vmul.f32 %v5314_v14, %v5310_v7  ;;  %v1403_v17 = vmul.f32 %v5314_v14, %v5308_v6  ;;  %v5861_v6 = vadd.s32 4294967295, %v5750_v42  ;;  %v5877_v14 = vadd.s32 4294967295, %v5776_v28 }
 0x253   : > { %v1443_v21 = vmul.f32 %v1427_v20, %v1403_v17  ;;  %v1491_v22 = vmul.f32 %v1475_v60, %v1451_v16  ;;  %vm7784_vm13 = vcmp.ge.s32.totalorder %v5861_v6, 0  ;;  %vm2039_vm6 = vcmp.ge.s32.totalorder %v5877_v14, 0 }
 0x255   : > { %v1499_v24 = vadd.f32 %v1491_v22, %v1443_v21  ;;  %v5899_v22 = vadd.s32 4294967290, %v5752_v49 }
 0x257   : > { %v1503_v25 = vpack.c.bf16 %v1499_v24, %v1498_v23 }
 0x259   : > { %4652 = vmatmul.msk.bf16.gmra.mxu3 %vm939_vm0, %v1503_v25 }
 0x2ac   : > { %v1545_v55 = vpop.f32.mrf.mxu3 }
 0x2ad   : > { %v5827_v56 = vadd.f32 %v5812_v44, %v1545_v55 }
 0x2af   : > { %v5055_v63 = vpack.i.bf16 %v5827_v56, %v5424_v51  ;;  %v7783_v0 = vrot.slane %v5827_v56, 6  ;;  %v2088_v1 = vrot.slane %v5827_v56, 7  ;;  %v2169_v9 = vrot.slane %v5827_v56, 1 }
 0x2b0   : > { %v2817_v17 = vrot.slane %v5827_v56, 2 }
 0x2b1   : > { %5056 = vrot.lane.b32.xlu0 %v5055_v63, %s5422_s11  ;;  %v2883_v4 = vsel %vm1977_vm7, %v5758_v62, %v7783_v0  ;;  %v2089_v7 = vsel %vm2085_vm9, %v5831_v57, %v2088_v1  ;;  %v2170_v16 = vsel %vm2167_vm11, %v5850_v3, %v2169_v9 }
 0x2b2   : > { %v2897_v8 = vsel %vm7777_vm8, %v2883_v4, 0.0  ;;  %v5870_v10 = vsel %vm2038_vm10, %v2089_v7, 0.0  ;;  %v2193_v24 = vsel %vm2134_vm12, %v2170_v16, 0.0  ;;  %v2204_v27 = vsel %vm7784_vm13, %v2089_v7, 0.0 }
 0x2b3   : > { %7815 = vst [vmem:[#allocation17_spill] sm:$0xff] %v5870_v10  ;;  %v5060_v12 = vpack.i.bf16 %v2897_v8, %v5844_v2  ;;  %vm2775_vm8 = vcmp.ge.s32.totalorder %v5899_v22, 0  ;;  %v5943_v51 = vsel %vm2814_vm1, %v5925_v39, %v2817_v17  ;;  %v5951_v4 = vadd.s32 1, %v5776_v28 }
 0x2b4   : > { %v1547_v13 = vpop.f32.mrf.mxu3  ;;  %v2918_v7 = vsel %vm7795_vm4, %v5943_v51, 0.0 }
 0x2b5   : > { %v5880_v15 = vadd.f32 %v5812_v44, %v1547_v13  ;;  %5061 = vrot.lane.b32.xlu1 %v5060_v12, %s5425_s22 }
 0x2b7   : > { %v5893_v19 = vpack.c.bf16 %v5880_v15, %v5827_v56  ;;  %v2171_v60 = vrot.slane %v5880_v15, 1  ;;  %v2090_v20 = vrot.slane %v5880_v15, 7  ;;  %v2819_v21 = vrot.slane %v5880_v15, 2 }
 0x2b9   : > { %4661 = vmatmul.msk.bf16.vlgmr.msrb.gmra.mxu0 %vm939_vm0, %v5893_v19  ;;  %v2172_v23 = vsel %vm2167_vm11, %v2169_v9, %v2171_v60  ;;  %v2091_v25 = vsel %vm2085_vm9, %v2088_v1, %v2090_v20  ;;  %v2820_v26 = vsel %vm2814_vm1, %v2817_v17, %v2819_v21 }
 0x2ba   : > { %v2194_v49 = vsel %vm2135_vm14, %v2172_v23, 0.0  ;;  %v2205_v32 = vsel %vm2038_vm10, %v2091_v25, 0.0  ;;  %v5919_v35 = vsel %vm7780_vm15, %v2820_v26, 0.0  ;;  %v5938_v42 = vsel %vm2039_vm6, %v2091_v25, 0.0 }
 0x2bb   : > { %7816 = vst [vmem:[#allocation18_spill] sm:$0xff] %v5919_v35  ;;  %v5065_v61 = vpack.i.bf16 %v2194_v49, %v2193_v24  ;;  %v5070_v36 = vpack.i.bf16 %v2205_v32, %v2204_v27  ;;  %v2919_v63 = vsel %vm2775_vm8, %v2820_v26, 0.0  ;;  %v2214_v8 = vsel %vm2134_vm12, %v2172_v23, 0.0  ;;  %v1944_v49 = vld [vmem:[%s5500_s6] sm:$0xff] }
 0x2bc   : > { %v1550_v43 = vpop.f32.mrf.mxu3  ;;  %7818 = vst [vmem:[#allocation20_spill] sm:$0xff] %v5938_v42  ;;  %v5075_v13 = vpack.i.bf16 %v2919_v63, %v2918_v7  ;;  %v5968_v24 = vadd.s32 4294967295, %v5806_v40  ;;  %vm2136_vm15 = vcmp.lt.s32.totalorder %v5951_v4, 8  ;;  %v5982_v26 = vadd.s32 4294967290, %v5778_v29  ;;  %1966 = vmatpush.msrb.mxu3 %v1944_v49 }
 0x2bd   : > { %v5928_v48 = vadd.f32 %v5812_v44, %v1550_v43  ;;  %5066 = vrot.lane.b32.xlu1 %v5065_v61, %s5425_s22  ;;  %5071 = vrot.lane.b32.xlu2 %v5070_v36, %s5423_s18  ;;  %v2224_v29 = vsel %vm7784_vm13, %v2091_v25, 0.0 }
 0x2be   : > { %vm2041_vm2 = vcmp.ge.s32.totalorder %v5968_v24, 0 }
 0x2bf   : > { %v2173_v54 = vrot.slane %v5928_v48, 1  ;;  %v2092_v55 = vrot.slane %v5928_v48, 7  ;;  %v5080_v16 = vpack.i.bf16 %v5928_v48, %v5880_v15  ;;  %v2900_v5 = vrot.slane %v5928_v48, 2 }
 0x2c1   : > { %v2174_v1 = vsel %vm2167_vm11, %v2171_v60, %v2173_v54  ;;  %v2093_v12 = vsel %vm2085_vm9, %v2090_v20, %v2092_v55 }
 0x2c2   : > { %v2215_v9 = vsel %vm2135_vm14, %v2174_v1, 0.0  ;;  %v5978_v20 = vsel %vm2040_vm5, %v2093_v12, 0.0  ;;  %v2234_v36 = vsel %vm2134_vm12, %v2174_v1, 0.0  ;;  %v2195_v43 = vsel %vm2136_vm15, %v2174_v1, 0.0 }
 0x2c3   : > { %v5090_v17 = vpack.i.bf16 %v2215_v9, %v2214_v8  ;;  %7819 = vst [vmem:[#allocation21_spill] sm:$0xff] %v5978_v20  ;;  %v2225_v7 = vsel %vm2038_vm10, %v2093_v12, 0.0  ;;  %v2206_v59 = vsel %vm2039_vm6, %v2093_v12, 0.0  ;;  %v6016_v12 = vadd.s32 4294967290, %v5776_v28 }
 0x2c4   : > { %v1552_v60 = vpop.f32.mrf.mxu3  ;;  %v5095_v49 = vpack.i.bf16 %v2225_v7, %v2224_v29  ;;  %vm2777_vm10 = vcmp.ge.s32.totalorder %v5982_v26, 0  ;;  %v2901_v7 = vsel %vm2814_vm1, %v2819_v21, %v2900_v5 }
 0x2c5   : > { %v5971_v23 = vadd.f32 %v5812_v44, %v1552_v60  ;;  %5076 = vrot.lane.b32.xlu1 %v5075_v13, %s5423_s18  ;;  %5081 = vrot.lane.b32.xlu2 %v5080_v16, %s5423_s18  ;;  %v1576_v60 = vadd.s32 48, %v5745_v37  ;;  %vm7791_vm12 = vcmp.ge.s32.totalorder %v6016_v12, 0 }
 0x2c6   : > { %5091 = vrot.lane.b32.xlu0 %v5090_v17, %s5422_s11 }
 0x2c7   : > { %v2175_v27 = vrot.slane %v5971_v23, 1  ;;  %v5988_v32 = vpack.c.bf16 %v5971_v23, %v5928_v48  ;;  %v2094_v61 = vrot.slane %v5971_v23, 7  ;;  %v7785_v9 = vrot.slane %v5971_v23, 2 }
 0x2c8   : > { %v6039_v29 = vand.u32 7, %v1576_v60 }
 0x2c9   : > { %v2176_v63 = vsel %vm2167_vm11, %v2173_v54, %v2175_v27  ;;  %4662 = vmatmul.msk.bf16.gmra.mxu0 %vm939_vm0, %v5988_v32  ;;  %v2095_v8 = vsel %vm2085_vm9, %v2092_v55, %v2094_v61  ;;  %v2903_v28 = vsel %vm2814_vm1, %v2900_v5, %v7785_v9 }
 0x2ca   : > { %v2235_v1 = vsel %vm2135_vm14, %v2176_v63, 0.0  ;;  %v2196_v25 = vsel %vm2137_vm3, %v2176_v63, 0.0  ;;  %v2207_v54 = vsel %vm2040_vm5, %v2095_v8, 0.0  ;;  %v6029_v37 = vsel %vm2041_vm2, %v2095_v8, 0.0 }
 0x2cb   : > { %v2469_v13 = vpack.c.bf16 %v2235_v1, %v2234_v36  ;;  %v5100_v17 = vpack.i.bf16 %v2196_v25, %v2195_v43  ;;  %v5105_v53 = vpack.i.bf16 %v2207_v54, %v2206_v59  ;;  %v6025_v36 = vadd.s32 4294967295, %v5808_v41  ;;  %7820 = vst [vmem:[#allocation22_spill] sm:$0xff] %v6029_v37 }
 0x2cc   : > { %v1555_v55 = vpop.f32.mrf.mxu3  ;;  %v6046_v59 = vadd.s32 1, %v5806_v40  ;;  %v2921_v1 = vsel %vm2777_vm10, %v2903_v28, 0.0  ;;  %v2226_v21 = vsel %vm2039_vm6, %v2095_v8, 0.0  ;;  %v6070_v28 = vadd.s32 4294967295, %v6039_v29 }
 0x2cd   : > { %v6020_v0 = vadd.f32 %v5812_v44, %v1555_v55  ;;  %5086 = vrot.lane.b32.xlu2 %v5080_v16, %s5422_s11  ;;  %4740 = vmatmul.msk.bf16.vlgmr.msra.gmra.mxu2 %vm939_vm0, %v2469_v13  ;;  %vm2042_vm14 = vcmp.ge.s32.totalorder %v6025_v36, 0  ;;  %v2216_v13 = vsel %vm2136_vm15, %v2176_v63, 0.0  ;;  %v6067_v55 = vadd.s32 1, %v5808_v41 }
 0x2ce   : > { %5101 = vrot.lane.b32.xlu0 %v5100_v17, %s5425_s22  ;;  %5096 = vrot.lane.b32.xlu1 %v5095_v49, %s5425_s22  ;;  %v6085_v8 = vadd.s32 4294967290, %v5806_v40  ;;  %vm7790_vm13 = vcmp.ge.s32.totalorder %v6070_v28, 0  ;;  %v1916_v40 = vsel %vm939_vm0, %v5880_v15, 0.0 }
 0x2cf   : > { %v2177_v16 = vrot.slane %v6020_v0, 1  ;;  %v2096_v43 = vrot.slane %v6020_v0, 7  ;;  %vm2139_vm6 = vcmp.lt.s32.totalorder %v6067_v55, 8  ;;  %v2904_v2 = vrot.slane %v6020_v0, 2 }
 0x2d0   : > { %v5115_v18 = vpack.i.bf16 %v6020_v0, %v5971_v23 }
 0x2d1   : > { %v2178_v25 = vsel %vm2167_vm11, %v2175_v27, %v2177_v16  ;;  %v6052_v54 = vsel %vm2085_vm9, %v2094_v61, %v2096_v43  ;;  %v2920_v27 = vsel %vm7791_vm12, %v2901_v7, 0.0  ;;  %v1915_v7 = vsel %vm939_vm0, %v5827_v56, 0.0 }
 0x2d2   : > { %v2217_v17 = vsel %vm2137_vm3, %v2178_v25, 0.0  ;;  %v2227_v60 = vsel %vm2040_vm5, %v6052_v54, 0.0  ;;  %v5110_v63 = vpack.i.bf16 %v2921_v1, %v2920_v27  ;;  %v6075_v14 = vsel %vm2042_vm14, %v6052_v54, 0.0 }
 0x2d3   : > { %v5125_v61 = vpack.i.bf16 %v2217_v17, %v2216_v13  ;;  %v5130_v49 = vpack.i.bf16 %v2227_v60, %v2226_v21  ;;  %7821 = vst [vmem:[#allocation23_spill] sm:$0xff] %v6075_v14  ;;  %vm2138_vm5 = vcmp.lt.s32.totalorder %v6046_v59, 8  ;;  %v1918_v21 = vsel %vm939_vm0, %v5928_v48, 0.0 }
 0x2d4   : > { %v1557_v5 = vpop.f32.mrf.mxu3  ;;  %v1917_v33 = vadd.f32 %v1916_v40, %v1915_v7  ;;  %v7824_v40 = vrot.slane %v5971_v23, 2 }
 0x2d5   : > { %v6078_v52 = vadd.f32 %v5812_v44, %v1557_v5  ;;  %5126 = vrot.lane.b32.xlu2 %v5125_v61, %s5422_s11  ;;  %v5426_v61 = vmov 64.0  }
 0x2d6   : > { %5111 = vrot.lane.b32.xlu0 %v5110_v63, %s5423_s18  ;;  %5106 = vrot.lane.b32.xlu1 %v5105_v53, %s5423_s18  ;;  %v6097_v53 = vadd.s32 4294967290, %v5808_v41  ;;  %v2236_v41 = vsel %vm2136_vm15, %v2178_v25, 0.0  ;;  %5315 = vrcp.f32 %v5426_v61  ;;  %v2197_v63 = vsel %vm2138_vm5, %v2178_v25, 0.0 }
 0x2d7   : > { %v6091_v1 = vpack.c.bf16 %v6078_v52, %v6020_v0  ;;  %v7786_v13 = vrot.slane %v6078_v52, 1  ;;  %v2098_v17 = vrot.slane %v6078_v52, 7  ;;  %v2906_v27 = vrot.slane %v6078_v52, 2 }
 0x2d8   : > { %v6127_v61 = vadd.s32 4294967295, %v5834_v58  ;;  %v6133_v25 = vadd.s32 1, %v5834_v58  ;;  %vm2778_vm15 = vcmp.ge.s32.totalorder %v6085_v8, 0  ;;  %v1919_v7 = vadd.f32 %v1918_v21, %v1917_v33 }
 0x2d9   : > { %7822 = vst [vmem:[#allocation24_spill] sm:$0xff] %v6091_v1  ;;  %4663 = vmatmul.msk.bf16.gmra.mxu0 %vm939_vm0, %v6091_v1  ;;  %v6109_v60 = vsel %vm2167_vm11, %v2177_v16, %v7786_v13  ;;  %v6123_v16 = vsel %vm2085_vm9, %v2096_v43, %v2098_v17  ;;  %v1924_v37 = vsel %vm939_vm0, %v6078_v52, 0.0 }
 0x2da   : > { %v2237_v5 = vsel %vm2137_vm3, %v6109_v60, 0.0  ;;  %v2198_v9 = vsel %vm2139_vm6, %v6109_v60, 0.0  ;;  %vm2779_vm3 = vcmp.ge.s32.totalorder %v6097_v53, 0  ;;  %vm2141_vm12 = vcmp.lt.s32.totalorder %v6133_v25, 8 }
 0x2db   : > { %v2472_v4 = vpack.c.bf16 %v2237_v5, %v2236_v41  ;;  %v5135_v13 = vpack.i.bf16 %v2198_v9, %v2197_v63  ;;  %v2907_v9 = vsel %vm2814_vm1, %v2904_v2, %v2906_v27  ;;  %v1920_v41 = vsel %vm939_vm0, %v5971_v23, 0.0 }
 0x2dc   : > { %v1560_v34 = vpop.f32.mrf.mxu3  ;;  %v6146_v5 = vsel %vm7790_vm13, %v6123_v16, 0.0  ;;  %v2905_v63 = vsel %vm2814_vm1, %v7824_v40, %v2904_v2  ;;  %vm2044_vm13 = vcmp.ge.s32.totalorder %v6127_v61, 0  ;;  %v1921_v14 = vadd.f32 %v1920_v41, %v1919_v7 }
 0x2dd   : > { %v6136_v43 = vadd.f32 %v5812_v44, %v1560_v34  ;;  %4741 = vmatmul.msk.bf16.gmra.mxu2 %vm939_vm0, %v2472_v4  ;;  %5136 = vrot.lane.b32.xlu2 %v5135_v13, %s5425_s22  ;;  %7823 = vst [vmem:[#allocation25_spill] sm:$0xff] %v6146_v5  ;;  %v6152_v34 = vadd.s32 1, %v6039_v29  ;;  %v6154_v13 = vpop.eup %5315  ;;  %v1922_v5 = vsel %vm939_vm0, %v6020_v0, 0.0  ;;  %v2209_v21 = vsel %vm2042_vm14, %v6123_v16, 0.0 }
 0x2de   : > { %5116 = vrot.lane.b32.xlu1 %v5115_v18, %s5423_s18  ;;  %5131 = vrot.lane.b32.xlu0 %v5130_v49, %s5425_s22  ;;  %v2923_v49 = vsel %vm2779_vm3, %v2907_v9, 0.0  ;;  %v2922_v9 = vsel %vm2778_vm15, %v2905_v63, 0.0  ;;  %v2208_v41 = vsel %vm2041_vm2, %v6052_v54, 0.0  ;;  %v1923_v7 = vadd.f32 %v1922_v5, %v1921_v14 }
 0x2df   : > { %v7794_v4 = vrot.slane %v6136_v43, 7  ;;  %v2908_v33 = vrot.slane %v6136_v43, 2  ;;  %v2181_v2 = vrot.slane %v6136_v43, 1  ;;  %v5145_v1 = vpack.i.bf16 %v2923_v49, %v2922_v9 }
 0x2e0   : > { %v1926_v35 = vsel %vm939_vm0, %v6136_v43, 0.0  ;;  %v1937_v20 = vmul.f32 64.0, %v6154_v13  ;;  %v5140_v42 = vpack.i.bf16 %v2209_v21, %v2208_v41  ;;  %v1925_v10 = vadd.f32 %v1924_v37, %v1923_v7  ;;  %v4947_v41 = vld [vmem:[%s5520_s4] sm:$0xff] }
 0x2e1   : > { %v6174_v40 = vsel %vm2085_vm9, %v2098_v17, %v7794_v4  ;;  %v6187_v17 = vsel %vm2814_vm1, %v2906_v27, %v2908_v33  ;;  %v7826_v27 = vrot.slane %v6078_v52, 1  ;;  %v7829_v24 = vrot.slane %v6136_v43, 7 }
 0x2e2   : > { %v6192_v63 = vsel %vm7795_vm4, %v6187_v17, 0.0  ;;  %v6197_v54 = vsel %vm2044_vm13, %v6174_v40, 0.0  ;;  %vm2140_vm4 = vcmp.lt.s32.totalorder %v6152_v34, 8  ;;  %v1927_v37 = vadd.f32 %v1926_v35, %v1925_v10 }
 0x2e3   : > { %7825 = vst [vmem:[#allocation26_spill] sm:$0xff] %v6197_v54  ;;  %v6206_v5 = vsel %vm2167_vm11, %v7826_v27, %v2181_v2  ;;  %v1938_v21 = vsub.f32 1.0, %v1937_v20  ;;  %v2218_v10 = vsel %vm2138_vm5, %v6109_v60, 0.0  ;;  %v6346_v61 = vadd.s32 4294967290, %v6039_v29 }
 0x2e4   : > { %v1562_v4 = vpop.f32.mrf.mxu3  ;;  %v2219_v35 = vsel %vm2139_vm6, %v6206_v5, 0.0  ;;  %v2238_v36 = vsel %vm2138_vm5, %v6206_v5, 0.0 }
 0x2e5   : > { %v6200_v14 = vadd.f32 %v5812_v44, %v1562_v4  ;;  %5146 = vrot.lane.b32.xlu2 %v5145_v1, %s5423_s18  ;;  %v6214_v44 = vsel %vm2141_vm12, %v5850_v3, 0.0  ;;  %v4948_v4 = vld [vmem:[%s5520_s4 + $0x8] sm:$0xff]  ;;  %v5160_v59 = vpack.i.bf16 %v2219_v35, %v2218_v10 }
 0x2e6   : > { %5121 = vrot.lane.b32.xlu1 %v5115_v18, %s5422_s11  ;;  %5141 = vrot.lane.b32.xlu0 %v5140_v42, %s5423_s18  ;;  %v2229_v42 = vsel %vm2042_vm14, %v6174_v40, 0.0  ;;  %vm7833_vm14 = vcmp.lt.s32.totalorder %v5761_v45, 8 }
 0x2e7   : > { %v6219_v1 = vpack.c.bf16 %v6200_v14, %v6136_v43  ;;  %v2183_v49 = vrot.slane %v6200_v14, 1  ;;  %v1928_v18 = vsel %vm939_vm0, %v6200_v14, 0.0  ;;  %3468 = vmatpush.bf16.msrb.mxu2 %v4948_v4  ;;  %v2201_v7 = vrot.slane %v6200_v14, 7 }
 0x2e8   : > { %v1929_v9 = vadd.f32 %v1928_v18, %v1927_v37  ;;  %v2910_v27 = vrot.slane %v6200_v14, 2  ;;  %v2228_v4 = vsel %vm2041_vm2, %v6123_v16, 0.0  ;;  %vm1941_vm2 = vweird.f32 %v6154_v13 }
 0x2e9   : > { %7827 = vst [vmem:[#allocation27_spill] sm:$0xff] %v6219_v1  ;;  %4664 = vmatmul.msk.bf16.gmra.mxu0 %vm939_vm0, %v6219_v1  ;;  %v2184_v20 = vsel %vm2167_vm11, %v2181_v2, %v2183_v49  ;;  %v2212_v60 = vsel %vm2167_vm11, %v2183_v49, %v5850_v3  ;;  %v5165_v54 = vpack.i.bf16 %v2229_v42, %v2228_v4  ;;  %v2934_v3 = vrot.slane %v6200_v14, 6 }
 0x2ea   : > { %v2239_v37 = vsel %vm2139_vm6, %v2184_v20, 0.0  ;;  %v1930_v18 = vrot.slane %v1929_v9, 4  ;;  %v1939_v1 = vmul.f32 %v6154_v13, %v1938_v21  ;;  %v5150_v49 = vpack.i.bf16 %v6136_v43, %v6078_v52 }
 0x2eb   : > { %v2475_v2 = vpack.c.bf16 %v2239_v37, %v2238_v36  ;;  %v2240_v55 = vsel %vm2140_vm4, %v2212_v60, 0.0  ;;  %3469 = vmatpush.bf16.msrb.mxu2 %v4947_v41  ;;  %v2202_v16 = vsel %vm2085_vm9, %v7829_v24, %v2201_v7  ;;  %v2911_v42 = vsel %vm2814_vm1, %v2908_v33, %v2910_v27 }
 0x2ec   : > { %v1931_v38 = vadd.f32 %v1930_v18, %v1929_v9  ;;  %v2478_v21 = vpack.c.bf16 %v6214_v44, %v2240_v55  ;;  %v7799_v36 = vrot.slane %v6136_v43, 6  ;;  %v6267_v35 = vsel %vm2775_vm8, %v2911_v42, 0.0  ;;  %v4936_v9 = vld [vmem:[%s7828_s23 + $0x38] sm:$0xff] }
 0x2ed   : > { %4742 = vmatmul.msk.bf16.gmra.mxu2 %vm939_vm0, %v2475_v2  ;;  %5166 = vrot.lane.b32.xlu2 %v5165_v54, %s5425_s22  ;;  %v6272_v54 = vsel %vm2777_vm10, %v5925_v39, 0.0  ;;  %v1940_v44 = vadd.f32 %v6154_v13, %v1939_v1  ;;  %v2951_v41 = vsel %vm2814_vm1, %v2910_v27, %v5925_v39  ;;  %v2211_v4 = vsel %vm2044_vm13, %v2202_v16, 0.0 }
 0x2ee   : > { %5151 = vrot.lane.b32.xlu0 %v5150_v49, %s5423_s18  ;;  %5161 = vrot.lane.b32.xlu1 %v5160_v59, %s5422_s11  ;;  %v1932_v10 = vrot.slane %v1931_v38, 2  ;;  %v6283_v37 = vsel %vm1977_vm7, %v7799_v36, %v2934_v3  ;;  %vm7830_vm11 = vcmp.ge.s32.totalorder %v6016_v12, 0  ;;  %v2200_v18 = vsel %vm2141_vm12, %v2184_v20, 0.0 }
 0x2ef   : > { %v6290_v1 = vsel %vm7830_vm11, %v2951_v41, 0.0  ;;  %3312 = vmatpush.bf16.msrb.mxu1 %v4936_v9  ;;  %v6298_v2 = vsel %vm1977_vm7, %v2934_v3, %v5758_v62  ;;  %vm7831_vm1 = vcmp.lt.s32.totalorder %v5755_v50, 8  ;;  %vm7832_vm10 = vcmp.ge.s32.totalorder %v6070_v28, 0 }
 0x2f0   : > { %v1933_v26 = vadd.f32 %v1932_v10, %v1931_v38  ;;  %v6303_v38 = vsel %vm7831_vm1, %v6283_v37, 0.0  ;;  %v2210_v59 = vsel %vm7832_vm10, %v6174_v40, 0.0  ;;  %v6311_v24 = vsel %vm7833_vm14, %v6298_v2, 0.0  ;;  %vm7834_vm5 = vmmov %vm7832_vm10 }
 0x2f1   : > { %v2199_v3 = vsel %vm2140_vm4, %v6206_v5, 0.0  ;;  %v5175_v10 = vpack.i.bf16 %v2211_v4, %v2210_v59  ;;  %v1942_v9 = vsel %vm1941_vm2, %v6154_v13, %v1940_v44  ;;  %v3141_v41 = vpack.c.bf16 %v6311_v24, %v6303_v38  ;;  %vm7838_vm2 = vmmov %vm7831_vm1 }
 0x2f2   : > { %v1934_v55 = vrot.slane %v1933_v26, 1  ;;  %v5170_v36 = vpack.i.bf16 %v2200_v18, %v2199_v3  ;;  %v2222_v27 = vsel %vm2085_vm9, %v2201_v7, %v5831_v57  ;;  %v2886_v5 = vrot.slane %v5928_v48, 6 }
 0x2f3   : > { %v2220_v13 = vsel %vm2140_vm4, %v2184_v20, 0.0  ;;  %v2221_v44 = vsel %vm2141_vm12, %v2212_v60, 0.0  ;;  %v2230_v4 = vsel %vm7834_vm5, %v2202_v16, 0.0  ;;  %v5180_v7 = vpack.i.bf16 0.0, %v6200_v14  ;;  %v4935_v16 = vld [vmem:[%s7828_s23 + $0x30] sm:$0xff] }
 0x2f4   : > { %v1935_v33 = vadd.f32 %v1934_v55, %v1933_v26  ;;  %v5185_v26 = vpack.i.bf16 %v2221_v44, %v2220_v13  ;;  %v6340_v20 = vadd.s32 6, %v6039_v29  ;;  %vm7837_vm12 = vcmp.ge.s32.totalorder %v5873_v11, 0  ;;  %3313 = vmatpush.bf16.msrb.mxu1 %v4935_v16  ;;  %v4933_v44 = vld [vmem:[%s7828_s23 + $0x20] sm:$0xff]  ;;  %v4931_v16 = vld [vmem:[%s7828_s23 + $0x10] sm:$0xff] }
 0x2f5   : > { %5176 = vrot.lane.b32.xlu2 %v5175_v10, %s5423_s18  ;;  %vm2780_vm6 = vcmp.ge.s32.totalorder %v6346_v61, 0  ;;  %v2926_v10 = vrot.slane %v5971_v23, 6  ;;  %vm7839_vm11 = vcmp.lt.s32.totalorder %v5784_v31, 8  ;;  %vm7840_vm1 = vcmp.lt.s32.totalorder %v5781_v30, 8  ;;  %v6392_v31 = vpop.permute.xlu2 %5051  ;;  %v4924_v30 = vld [vmem:[%s5510_s20 + $0x68] sm:$0xff]  ;;  %vm7846_vm10 = vmmov %vm7837_vm12 }
 0x2f6   : > { %5156 = vrot.lane.b32.xlu0 %v5150_v49, %s5422_s11  ;;  %5171 = vrot.lane.b32.xlu1 %v5170_v36, %s5425_s22  ;;  %v1943_v40 = vmul.f32 %v1942_v9, %v1935_v33  ;;  %v2231_v49 = vsel %vm2044_vm13, %v2222_v27, 0.0  ;;  %v6335_v36 = vadd.s32 6, %v5834_v58  ;;  %v2884_v33 = vrot.slane %v5880_v15, 6  ;;  %vm7836_vm13 = vmmov %vm7833_vm14  ;;  %v4934_v9 = vld [vmem:[%s7828_s23 + $0x28] sm:$0xff] }
 0x2f7   : > { %v5195_v34 = vpack.i.bf16 %v2231_v49, %v2230_v4  ;;  %v7835_v58 = vrot.slane %v5827_v56, 6  ;;  %vm2854_vm9 = vcmp.lt.s32.totalorder %v6340_v20, 8  ;;  %v2928_v27 = vrot.slane %v6020_v0, 6  ;;  %v4925_v4 = vld [vmem:[%s5510_s20 + $0x70] sm:$0xff] }
 0x2f8   : > { %4665 = vmatmul.msk.f32.vlgmr.msrb.gmra.mxu3 %vm939_vm0, %v1943_v40  ;;  %v2887_v28 = vsel %vm1977_vm7, %v2884_v33, %v2886_v5  ;;  %vm2855_vm4 = vcmp.lt.s32.totalorder %v6335_v36, 8  ;;  %v2924_v59 = vsel %vm2780_vm6, %v6187_v17, 0.0  ;;  %v4926_v40 = vld [vmem:[%s5510_s20 + $0x78] sm:$0xff]  ;;  %v2927_v17 = vsel %vm1977_vm7, %v2886_v5, %v2926_v10  ;;  %3314 = vmatpush.bf16.msrb.mxu1 %v4934_v9 }
 0x2f9   : > { %v2885_v25 = vsel %vm1977_vm7, %v7835_v58, %v2884_v33  ;;  %v2944_v60 = vsel %vm7836_vm13, %v2887_v28, 0.0  ;;  %v2899_v29 = vsel %vm2855_vm4, %v2887_v28, 0.0  ;;  %v2929_v50 = vsel %vm1977_vm7, %v2926_v10, %v2928_v27  ;;  %2668 = vmatpush.bf16.msra.mxu0 %v4926_v40  ;;  %v4929_v10 = vld [vmem:[%s7828_s23] sm:$0xff] }
 0x2fa   : > { %v2943_v18 = vsel %vm7838_vm2, %v2885_v25, 0.0  ;;  %v2898_v45 = vsel %vm2854_vm9, %v2885_v25, 0.0  ;;  %v2946_v13 = vsel %vm7839_vm11, %v2929_v50, 0.0  ;;  %v2945_v49 = vsel %vm7840_vm1, %v2927_v17, 0.0  ;;  %v4921_v50 = vld [vmem:[%s5510_s20 + $0x50] sm:$0xff] }
 0x2fb   : > { %v5205_v55 = vpack.i.bf16 %v2944_v60, %v2943_v18  ;;  %v2930_v33 = vrot.slane %v6078_v52, 6  ;;  %v7841_v5 = vpack.i.bf16 %v6272_v54, %v6290_v1  ;;  %v7843_v28 = vrot.slane %v6136_v43, 6 }
 0x2fc   : > { %3315 = vmatpush.bf16.msrb.mxu1 %v4933_v44  ;;  %v6407_v1 = vsel %vm2778_vm15, %v5925_v39, 0.0  ;;  %v6412_v25 = vsel %vm2779_vm3, %v5925_v39, 0.0  ;;  %vm7844_vm15 = vcmp.lt.s32.totalorder %v5818_v47, 8  ;;  %vm7845_vm3 = vcmp.lt.s32.totalorder %v5815_v46, 8  ;;  %v4920_v44 = vld [vmem:[%s5510_s20 + $0x48] sm:$0xff] }
 0x2fd   : > { %4743 = vmatmul.msk.bf16.gmra.mxu2 %vm939_vm0, %v2478_v21  ;;  %5181 = vrot.lane.b32.xlu2 %v5180_v7, %s5423_s18  ;;  %v2925_v21 = vsel %vm7837_vm12, %v2911_v42, 0.0  ;;  %v5190_v42 = vpack.i.bf16 %v2899_v29, %v2898_v45  ;;  %v5215_v7 = vpack.i.bf16 %v2946_v13, %v2945_v49  ;;  %v2933_v58 = vsel %vm1977_vm7, %v2930_v33, %v7843_v28  ;;  %v4923_v29 = vld [vmem:[%s5510_s20 + $0x60] sm:$0xff]  ;;  %v5047_v45 = vpop.permute.xlu0 %5046 }
 0x2fe   : > { %5186 = vrot.lane.b32.xlu0 %v5185_v26, %s5422_s11  ;;  %5196 = vrot.lane.b32.xlu1 %v5195_v34, %s5425_s22  ;;  %v5200_v3 = vpack.i.bf16 %v2925_v21, %v2924_v59  ;;  %v4932_v26 = vld [vmem:[%s7828_s23 + $0x18] sm:$0xff]  ;;  %v7842_v34 = vpack.i.bf16 %v6267_v35, %v6192_v63  ;;  %v2931_v60 = vsel %vm1977_vm7, %v2928_v27, %v2930_v33  ;;  %v2949_v63 = vsel %vm2854_vm9, %v6283_v37, 0.0 }
 0x2ff   : > { %2669 = vmatpush.bf16.msra.mxu0 %v4925_v4  ;;  %v2950_v35 = vsel %vm2855_vm4, %v6298_v2, 0.0  ;;  %v2948_v8 = vsel %vm7844_vm15, %v2933_v58, 0.0  ;;  %v5230_v53 = vpack.i.bf16 %v6412_v25, %v6407_v1  ;;  %v2947_v21 = vsel %vm7845_vm3, %v2931_v60, 0.0  ;;  %v7848_v4 = vld [vmem:[#allocation17_spill] sm:$0xff]  ;;  %v7851_v58 = vld [vmem:[#allocation18_spill] sm:$0xff] }
 0x300   : > { %3316 = vmatpush.bf16.msrb.mxu1 %v4932_v26  ;;  %v5235_v37 = vpack.i.bf16 %v2950_v35, %v2949_v63  ;;  %v5225_v18 = vpack.i.bf16 %v2948_v8, %v2947_v21  ;;  %v2956_v27 = vsel %vm2780_vm6, %v5925_v39, 0.0  ;;  %v2957_v46 = vsel %vm7846_vm10, %v5925_v39, 0.0  ;;  %v7852_v63 = vld [vmem:[#allocation24_spill] sm:$0xff] }
 0x301   : > { %v5240_v59 = vpack.i.bf16 %v2957_v46, %v2956_v27  ;;  %vm7847_vm14 = vcmp.ge.s32.totalorder %v5861_v6, 0  ;;  %v2830_v13 = vsel %vm2780_vm6, %v5943_v51, 0.0  ;;  %v7850_v51 = vld [vmem:[#allocation21_spill] sm:$0xff]  ;;  %vm2434_vm5 = vcmask 785408   ;;  %v7855_v27 = vld [vmem:[#allocation19_spill] sm:$0xff] }
 0x302   : > { %v2110_v11 = vsel %vm7847_vm14, %v5831_v57, 0.0  ;;  %vm7853_vm13 = vcmask 523264   ;;  %vm7856_vm6 = vcmp.ge.s32.totalorder %v7855_v27, 0  ;;  %vm7865_vm14 = vcmp.ge.s32.totalorder %v6016_v12, 0 }
 0x303   : > { %2670 = vmatpush.bf16.msra.mxu0 %v4924_v30  ;;  %v4919_v30 = vld [vmem:[%s5510_s20 + $0x40] sm:$0xff]  ;;  %vm7854_vm12 = vmmov %vm7853_vm13  ;;  %v2824_v46 = vsel %vm7856_vm6, %v5925_v39, 0.0 }
 0x304   : > { %3317 = vmatpush.bf16.msrb.mxu1 %v4931_v16 }
 0x305   : > { %5206 = vrot.lane.b32.xlu2 %v5205_v55, %s5422_s11  ;;  %v4930_v55 = vld [vmem:[%s7828_s23 + $0x8] sm:$0xff] }
 0x306   : > { %5191 = vrot.lane.b32.xlu0 %v5190_v42, %s5425_s22  ;;  %5201 = vrot.lane.b32.xlu1 %v5200_v3, %s5423_s18  ;;  %v4922_v42 = vld [vmem:[%s5510_s20 + $0x58] sm:$0xff] }
 0x307   : > { %2671 = vmatpush.bf16.msra.mxu0 %v4923_v29 }
 0x308   : > { %3318 = vmatpush.bf16.msrb.mxu1 %v4930_v55 }
 0x30b   : > { %2672 = vmatpush.bf16.msra.mxu0 %v4922_v42 }
 0x30c   : > { %3319 = vmatpush.bf16.msrb.mxu1 %v4929_v10  ;;  %v5049_v10 = vunpack.i.h.bf16 %v5047_v45 }
 0x30d   : > { %4832 = vmatmul.msk.bf16.vlgmr.msrb.gmra.mxu2 %vm939_vm0, %v5893_v19  ;;  %5221 = vrot.lane.b32.xlu2 %v7841_v5, %s5425_s22 }
 0x30e   : > { %5211 = vrot.lane.b32.xlu0 %v7842_v34, %s5425_s22  ;;  %5216 = vrot.lane.b32.xlu1 %v5215_v7, %s5422_s11  ;;  %v7849_v34 = vld [vmem:[#allocation20_spill] sm:$0xff] }
 0x30f   : > { %2673 = vmatpush.bf16.msra.mxu0 %v4921_v50  ;;  %v5048_v50 = vunpack.i.l.bf16 %v5047_v45 }
 0x313   : > { %2674 = vmatpush.bf16.msra.mxu0 %v4920_v44 }
 0x315   : > { %5236 = vrot.lane.b32.xlu2 %v5235_v37, %s5422_s11 }
 0x316   : > { %5226 = vrot.lane.b32.xlu0 %v5225_v18, %s5422_s11  ;;  %5231 = vrot.lane.b32.xlu1 %v5230_v53, %s5425_s22 }
 0x317   : > { %v5072_v2 = vpop.permute.xlu2 %5071  ;;  %2675 = vmatpush.bf16.msra.mxu0 %v4919_v30 }
 0x318   : > { %v5074_v29 = vunpack.i.h.bf16 %v5072_v2  ;;  %v5073_v21 = vunpack.i.l.bf16 %v5072_v2 }
 0x31d   : > { %4833 = vmatmul.msk.bf16.gmra.mxu2 %vm939_vm0, %v5988_v32 }
 0x31e   : > { %5241 = vrot.lane.b32.xlu0 %v5240_v59, %s5425_s22  ;;  %v2825_v59 = vsel %vm2775_vm8, %v5925_v39, 0.0  ;;  %vm7857_vm8 = vmmov %vm7854_vm12 }
 0x31f   : > { %v6443_v3 = vpop.permute.xlu2 %5081  ;;  %vm7858_vm2 = vmmov %vm7857_vm8 }
 0x320   : > { %vm7860_vm11 = vmmov %vm7858_vm2 }
 0x321   : > { %vm7861_vm1 = vmmov %vm7858_vm2 }
 0x322   : > { %vm7862_vm15 = vmmov %vm7861_vm1 }
 0x323   : > { %v5057_v9 = vpop.permute.xlu0 %5056  ;;  %vm7863_vm3 = vmmov %vm7861_vm1 }
 0x324   : > { %v5059_v40 = vunpack.i.h.bf16 %v5057_v9  ;;  %v6450_v17 = vunpack.i.l.bf16 %v5057_v9  ;;  %vm7864_vm10 = vmmov %vm7861_vm1 }
 0x325   : > { %vm7869_vm6 = vmmov %vm7861_vm1 }
 0x326   : > { %v2419_v49 = vsel %vm939_vm0, %v7848_v4, %v5059_v40  ;;  %v6459_v7 = vsel %vm939_vm0, %v2830_v13, %v5059_v40  ;;  %v2418_v6 = vsel %vm939_vm0, %v2110_v11, %v6450_v17  ;;  %v3091_v11 = vsel %vm939_vm0, %v2824_v46, %v6450_v17 }
 0x327   : > { %v5062_v57 = vpop.permute.xlu1 %5061  ;;  %v5087_v33 = vpop.permute.xlu2 %5086  ;;  %v3092_v9 = vsel %vm939_vm0, %v2825_v59, %v6450_v17 }
 0x328   : > { %v5089_v5 = vunpack.i.h.bf16 %v5087_v33  ;;  %v5088_v26 = vunpack.i.l.bf16 %v5087_v33  ;;  %v5064_v30 = vunpack.i.h.bf16 %v5062_v57 }
 0x32a   : > { %v2420_v61 = vsel %vm939_vm0, %v7849_v34, %v5088_v26  ;;  %v6468_v28 = vsel %vm939_vm0, %v7850_v51, %v5089_v5  ;;  %v6472_v60 = vsel %vm939_vm0, %v7851_v58, %v5088_v26  ;;  %v5063_v26 = vunpack.i.l.bf16 %v5062_v57  ;;  %v7859_v34 = vld [vmem:[#allocation27_spill] sm:$0xff] }
 0x32b   : > { %v5084_v58 = vunpack.i.h.bf16 %v6443_v3  ;;  %v3096_v57 = vsel %vm939_vm0, %v6412_v25, %v6450_v17 }
 0x32d   : > { %4834 = vmatmul.msk.bf16.gmra.mxu2 %vm939_vm0, %v7852_v63 }
 0x32f   : > { %v5067_v35 = vpop.permute.xlu1 %5066  ;;  %v6476_v8 = vpop.permute.xlu2 %5126 }
 0x330   : > { %v5069_v53 = vunpack.i.h.bf16 %v5067_v35  ;;  %v5068_v16 = vunpack.i.l.bf16 %v5067_v35  ;;  %v5083_v35 = vunpack.i.l.bf16 %v6443_v3  ;;  %v3104_v3 = vsel %vm7861_vm1, %v3096_v57, %v5064_v30  ;;  %v1972_v57 = vld [vmem:[%s7867_s26] sm:$0x3]  ;;  %s7936_s26 = sld [smem:[#allocation11_spill]] }
 0x331   : > { %v5053_v30 = vunpack.i.l.bf16 %v6392_v31  ;;  %4666 = vmatpush.msk.msra.mxu3 %vm1977_vm7, %v1972_v57  ;;  %vm7877_vm7 = vmmov %vm7861_vm1 }
 0x332   : > { %v2426_v37 = vsel %vm7853_vm13, %v2418_v6, %v5068_v16  ;;  %v2427_v18 = vsel %vm7854_vm12, %v2419_v49, %v5069_v53  ;;  %v3099_v49 = vsel %vm7857_vm8, %v3091_v11, %v5048_v50  ;;  %v3100_v6 = vsel %vm7858_vm2, %v3092_v9, %v5049_v10  ;;  %vm7866_vm13 = vmmov %vm7861_vm1 }
 0x333   : > { %v6487_v55 = vsel %vm2434_vm5, %v2426_v37, %v5073_v21  ;;  %v6490_v42 = vsel %vm2434_vm5, %v2427_v18, %v5074_v29  ;;  %v3095_v29 = vsel %vm939_vm0, %v6407_v1, %v6450_v17  ;;  %vm7868_vm12 = vmmov %vm7861_vm1 }
 0x334   : > { %v2467_v2 = vpack.c.bf16 %v6490_v42, %v6487_v55  ;;  %v3103_v46 = vsel %vm7860_vm11, %v3095_v29, %v5063_v26  ;;  %v5054_v26 = vunpack.i.h.bf16 %v6392_v31  ;;  %vm7870_vm8 = vmmov %vm7861_vm1 }
 0x335   : > { %vm7871_vm2 = vmmov %vm7861_vm1 }
 0x336   : > { %vm7878_vm11 = vmmov %vm7861_vm1 }
 0x337   : > { %v5077_v40 = vpop.permute.xlu1 %5076  ;;  %v6498_v22 = vpop.permute.xlu2 %5136 }
 0x338   : > { %v5079_v13 = vunpack.i.h.bf16 %v5077_v40  ;;  %v5078_v44 = vunpack.i.l.bf16 %v5077_v40  ;;  %v5092_v4 = vpop.permute.xlu0 %5091 }
 0x339   : > { %v5094_v51 = vunpack.i.h.bf16 %v5092_v4  ;;  %v5093_v53 = vunpack.i.l.bf16 %v5092_v4 }
 0x33a   : > { %v3107_v33 = vsel %vm2434_vm5, %v3099_v49, %v5078_v44  ;;  %v3108_v45 = vsel %vm2434_vm5, %v3100_v6, %v5079_v13 }
 0x33b   : > { %v3139_v5 = vpack.c.bf16 %v3108_v45, %v3107_v33  ;;  %v2444_v11 = vsel %vm939_vm0, %v5880_v15, %v5094_v51  ;;  %v2443_v13 = vsel %vm939_vm0, %v5827_v56, %v5093_v53  ;;  %v2826_v33 = vsel %vm7865_vm14, %v5925_v39, 0.0  ;;  %vm7882_vm14 = vmmov %vm7861_vm1 }
 0x33d   : > { %3320 = vmatmul.bf16.vlgmr.msrb.gmra.mxu1 %v3139_v5  ;;  %4835 = vmatmul.msk.bf16.gmra.mxu2 %vm939_vm0, %v7859_v34 }
 0x33f   : > { %v5147_v16 = vpop.permute.xlu2 %5146 }
 0x340   : > { %v5102_v21 = vpop.permute.xlu0 %5101  ;;  %v5097_v37 = vpop.permute.xlu1 %5096  ;;  %v5149_v18 = vunpack.i.h.bf16 %v5147_v16  ;;  %v5148_v27 = vunpack.i.l.bf16 %v5147_v16 }
 0x341   : > { %v5104_v59 = vunpack.i.h.bf16 %v5102_v21  ;;  %v5103_v10 = vunpack.i.l.bf16 %v5102_v21  ;;  %v5099_v50 = vunpack.i.h.bf16 %v5097_v37  ;;  %v5098_v9 = vunpack.i.l.bf16 %v5097_v37 }
 0x342   : > { %v3111_v1 = vsel %vm2434_vm5, %v3103_v46, %v5148_v27  ;;  %v3112_v40 = vsel %vm2434_vm5, %v3104_v3, %v5149_v18  ;;  %v4918_v46 = vld [vmem:[%s5510_s20 + $0x38] sm:$0xff] }
 0x343   : > { %v2452_v25 = vsel %vm7862_vm15, %v2444_v11, %v5099_v50  ;;  %v3145_v44 = vpack.c.bf16 %v3112_v40, %v3111_v1  ;;  %v2428_v4 = vsel %vm7863_vm3, %v2420_v61, %v5103_v10  ;;  %v2451_v49 = vsel %vm7864_vm10, %v2443_v13, %v5098_v9  ;;  %2639 = vmatpush.bf16.msrb.mxu3 %v4918_v46  ;;  %vm7879_vm15 = vmmov %vm7861_vm1 }
 0x344   : > { %v2460_v6 = vsel %vm2434_vm5, %v2452_v25, %v5084_v58  ;;  %v2429_v45 = vsel %vm7866_vm13, %v6468_v28, %v5104_v59  ;;  %v2459_v5 = vsel %vm2434_vm5, %v2451_v49, %v5083_v35  ;;  %v3093_v61 = vsel %vm939_vm0, %v2826_v33, %v6450_v17  ;;  %vm7880_vm10 = vmmov %vm7861_vm1 }
 0x345   : > { %v2468_v51 = vpack.c.bf16 %v2460_v6, %v2459_v5  ;;  %v3094_v58 = vsel %vm939_vm0, %v6272_v54, %v6450_v17  ;;  %v3101_v29 = vsel %vm7868_vm12, %v3093_v61, %v5053_v30  ;;  %v5129_v59 = vunpack.i.h.bf16 %v6476_v8  ;;  %vm7883_vm13 = vmmov %vm7861_vm1 }
 0x346   : > { %v3102_v31 = vsel %vm7869_vm6, %v3094_v58, %v5054_v26  ;;  %v5128_v10 = vunpack.i.l.bf16 %v6476_v8  ;;  %v7872_v58 = vld [vmem:[#allocation22_spill] sm:$0xff]  ;;  %vm1973_vm3 = vcmask 15360   ;;  %vm7885_vm12 = vmmov %vm7861_vm1 }
 0x347   : > { %2676 = vmatmul.bf16.vlgmr.msra.gmra.mxu0 %v2468_v51  ;;  %v2446_v25 = vsel %vm939_vm0, %v5971_v23, %v5129_v59  ;;  %v5167_v57 = vpop.permute.xlu2 %5166  ;;  %v4913_v59 = vld [vmem:[%s5510_s20 + $0x10] sm:$0xff]  ;;  %vm7887_vm6 = vmmov %vm7861_vm1 }
 0x348   : > { %v5112_v39 = vpop.permute.xlu0 %5111  ;;  %v5107_v12 = vpop.permute.xlu1 %5106 }
 0x349   : > { %v5114_v28 = vunpack.i.h.bf16 %v5112_v39  ;;  %v5113_v53 = vunpack.i.l.bf16 %v5112_v39  ;;  %v5109_v35 = vunpack.i.h.bf16 %v5107_v12  ;;  %v5108_v16 = vunpack.i.l.bf16 %v5107_v12  ;;  %v7873_v12 = vld [vmem:[#allocation23_spill] sm:$0xff] }
 0x34b   : > { %v3109_v21 = vsel %vm2434_vm5, %v3101_v29, %v5113_v53  ;;  %v3110_v37 = vsel %vm2434_vm5, %v3102_v31, %v5114_v28  ;;  %v6544_v54 = vsel %vm2434_vm5, %v2428_v4, %v5108_v16  ;;  %v6547_v17 = vsel %vm2434_vm5, %v2429_v45, %v5109_v35  ;;  %v4917_v53 = vld [vmem:[%s5510_s20 + $0x30] sm:$0xff]  ;;  %v4916_v29 = vld [vmem:[%s5510_s20 + $0x28] sm:$0xff] }
 0x34c   : > { %v3142_v18 = vpack.c.bf16 %v3110_v37, %v3109_v21  ;;  %v2470_v27 = vpack.c.bf16 %v6547_v17, %v6544_v54  ;;  %v2445_v4 = vsel %vm939_vm0, %v5928_v48, %v5128_v10  ;;  %2640 = vmatpush.bf16.msrb.mxu3 %v4917_v53  ;;  %v4915_v21 = vld [vmem:[%s5510_s20 + $0x20] sm:$0xff]  ;;  %v6733_v17 = vpop.f32.mrf.mxu0 }
 0x34e   : > { %3325 = vmatmul.bf16.gmra.mxu1 %v3142_v18  ;;  %v4914_v18 = vld [vmem:[%s5510_s20 + $0x18] sm:$0xff] }
 0x350   : > { %v5117_v50 = vpop.permute.xlu1 %5116  ;;  %v5132_v3 = vpop.permute.xlu0 %5131  ;;  %2641 = vmatpush.bf16.msrb.mxu3 %v4916_v29 }
 0x351   : > { %v5119_v11 = vunpack.i.h.bf16 %v5117_v50  ;;  %v5118_v9 = vunpack.i.l.bf16 %v5117_v50  ;;  %v6556_v1 = vpop.f32.mrf.mxu2  ;;  %v5134_v40 = vunpack.i.h.bf16 %v5132_v3  ;;  %v5133_v13 = vunpack.i.l.bf16 %v5132_v3 }
 0x353   : > { %v2453_v8 = vsel %vm7870_vm8, %v2445_v4, %v5133_v13  ;;  %v2454_v49 = vsel %vm7871_vm2, %v2446_v25, %v5134_v40  ;;  %v7874_v40 = vld [vmem:[#allocation25_spill] sm:$0xff]  ;;  %v7875_v25 = vld [vmem:[#allocation26_spill] sm:$0xff]  ;;  %vm7888_vm8 = vmmov %vm7861_vm1 }
 0x354   : > { %v2461_v6 = vsel %vm2434_vm5, %v2453_v8, %v5118_v9  ;;  %v2462_v33 = vsel %vm2434_vm5, %v2454_v49, %v5119_v11  ;;  %2642 = vmatpush.bf16.msrb.mxu3 %v4915_v21  ;;  %v4912_v8 = vld [vmem:[%s5510_s20 + $0x8] sm:$0xff]  ;;  %v4945_v21 = vld [vmem:[%s7828_s23 + $0x80] sm:$0xff]  ;;  %vm7889_vm2 = vmmov %vm7861_vm1 }
 0x355   : > { %v2471_v45 = vpack.c.bf16 %v2462_v33, %v2461_v6  ;;  %v4946_v49 = vld [vmem:[%s7828_s23 + $0x88] sm:$0xff]  ;;  %v5168_v33 = vunpack.i.l.bf16 %v5167_v57 }
 0x356   : > { %3376 = vmatpush.bf16.msrb.mxu0 %v4946_v49 }
 0x357   : > { %2681 = vmatmul.bf16.gmra.mxu0 %v2471_v45 }
 0x358   : > { %v5122_v5 = vpop.permute.xlu1 %5121  ;;  %v6566_v26 = vpop.permute.xlu0 %5141  ;;  %2643 = vmatpush.bf16.msrb.mxu3 %v4914_v18 }
 0x359   : > { %v6568_v30 = vpop.f32.mrf.mxu2  ;;  %v5124_v51 = vunpack.i.h.bf16 %v5122_v5  ;;  %v5123_v61 = vunpack.i.l.bf16 %v5122_v5  ;;  %v5169_v5 = vunpack.i.h.bf16 %v5167_v57  ;;  %v5144_v42 = vunpack.i.h.bf16 %v6566_v26 }
 0x35a   : > { %3377 = vmatpush.bf16.msrb.mxu0 %v4945_v21 }
 0x35b   : > { %v6572_v39 = vsel %vm939_vm0, %v7872_v58, %v5123_v61  ;;  %v6576_v28 = vsel %vm939_vm0, %v7873_v12, %v5124_v51  ;;  %v6607_v51 = vpop.permute.xlu2 %5176  ;;  %v4911_v12 = vld [vmem:[%s5510_s20] sm:$0xff] }
 0x35c   : > { %2644 = vmatpush.bf16.msrb.mxu3 %v4913_v59  ;;  %v5179_v55 = vunpack.i.h.bf16 %v6607_v51 }
 0x35e   : > { %3330 = vmatmul.bf16.gmra.mxu1 %v3145_v44 }
 0x360   : > { %v6581_v16 = vpop.permute.xlu0 %5151  ;;  %v5162_v31 = vpop.permute.xlu1 %5161  ;;  %2645 = vmatpush.bf16.msrb.mxu3 %v4912_v8 }
 0x361   : > { %v6579_v35 = vpop.f32.mrf.mxu2  ;;  %v5163_v10 = vunpack.i.l.bf16 %v5162_v31  ;;  %v5164_v11 = vunpack.i.h.bf16 %v5162_v31  ;;  %v5153_v61 = vunpack.i.l.bf16 %v6581_v16  ;;  %v5154_v53 = vunpack.i.h.bf16 %v6581_v16  ;;  %v4938_v16 = vld [vmem:[%s7828_s23 + $0x48] sm:$0xff] }
 0x363   : > { %v2447_v6 = vsel %vm939_vm0, %v6020_v0, %v5163_v10  ;;  %v2448_v45 = vsel %vm939_vm0, %v6078_v52, %v5164_v11 }
 0x364   : > { %v2455_v29 = vsel %vm7877_vm7, %v2447_v6, %v5168_v33  ;;  %v2456_v18 = vsel %vm7878_vm11, %v2448_v45, %v5169_v5  ;;  %2646 = vmatpush.bf16.msrb.mxu3 %v4911_v12  ;;  %vm7890_vm7 = vmmov %vm7861_vm1  ;;  %vm7893_vm11 = vcmp.lt.s32.totalorder %v5818_v47, 8 }
 0x365   : > { %v2464_v57 = vsel %vm2434_vm5, %v2456_v18, %v5154_v53 }
 0x368   : > { %v5157_v46 = vpop.permute.xlu0 %5156  ;;  %v6588_v44 = vpop.permute.xlu1 %5171 }
 0x369   : > { %v6585_v37 = vpop.f32.mrf.mxu2  ;;  %v5159_v50 = vunpack.i.h.bf16 %v5157_v46  ;;  %v5158_v3 = vunpack.i.l.bf16 %v5157_v46  ;;  %v2463_v46 = vsel %vm2434_vm5, %v2455_v29, %v5153_v61 }
 0x36a   : > { %v2474_v10 = vpack.c.bf16 %v2464_v57, %v2463_v46 }
 0x36b   : > { %v6595_v13 = vsel %vm939_vm0, %v7874_v40, %v5158_v3  ;;  %v6599_v4 = vsel %vm939_vm0, %v7875_v25, %v5159_v50  ;;  %v4950_v50 = vld [vmem:[%s7876_s28 + $0x8] sm:$0xff]  ;;  %v4949_v40 = vld [vmem:[%s7876_s28] sm:$0xff]  ;;  %v6623_v25 = vpop.permute.xlu2 %5181 }
 0x36c   : > { %2686 = vmatmul.bf16.gmra.mxu0 %v2474_v10  ;;  %3560 = vmatpush.bf16.msra.mxu1 %v4950_v50  ;;  %v6632_v12 = vunpack.i.h.bf16 %v6623_v25 }
 0x370   : > { %v5187_v58 = vpop.permute.xlu0 %5186  ;;  %v5197_v31 = vpop.permute.xlu1 %5196  ;;  %3561 = vmatpush.bf16.msra.mxu1 %v4949_v40 }
 0x371   : > { %v6591_v9 = vpop.f32.mrf.mxu2  ;;  %v5189_v3 = vunpack.i.h.bf16 %v5187_v58  ;;  %v5188_v11 = vunpack.i.l.bf16 %v5187_v58  ;;  %v5199_v8 = vunpack.i.h.bf16 %v5197_v31  ;;  %v5198_v49 = vunpack.i.l.bf16 %v5197_v31 }
 0x372   : > { %v5183_v58 = vunpack.i.l.bf16 %v6623_v25 }
 0x373   : > { %v2450_v33 = vsel %vm939_vm0, %v6200_v14, %v5189_v3  ;;  %v2449_v45 = vsel %vm939_vm0, %v6136_v43, %v5188_v11  ;;  %v4944_v11 = vld [vmem:[%s7828_s23 + $0x78] sm:$0xff] }
 0x374   : > { %v2457_v57 = vsel %vm7861_vm1, %v2449_v45, %v5198_v49  ;;  %v2458_v10 = vsel %vm7879_vm15, %v2450_v33, %v5199_v8  ;;  %vm7895_vm15 = vmmov %vm7861_vm1 }
 0x375   : > { %v2465_v50 = vsel %vm2434_vm5, %v2457_v57, %v5183_v58  ;;  %v2466_v3 = vsel %vm2434_vm5, %v2458_v10, %v6632_v12  ;;  %v4943_v57 = vld [vmem:[%s7828_s23 + $0x70] sm:$0xff]  ;;  %v4942_v10 = vld [vmem:[%s7828_s23 + $0x68] sm:$0xff] }
 0x376   : > { %v2477_v45 = vpack.c.bf16 %v2466_v3, %v2465_v50  ;;  %v5139_v50 = vunpack.i.h.bf16 %v6498_v22  ;;  %v5143_v3 = vunpack.i.l.bf16 %v6566_v26  ;;  %v6677_v26 = vld [vmem:[%s7884_s2 + $0x2] ss:$0 sm:$0xff] }
 0x378   : > { %v5192_v6 = vpop.permute.xlu0 %5191  ;;  %v5202_v5 = vpop.permute.xlu1 %5201 }
 0x379   : > { %v6619_v59 = vpop.f32.mrf.mxu2  ;;  %v5194_v29 = vunpack.i.h.bf16 %v5192_v6  ;;  %v5193_v21 = vunpack.i.l.bf16 %v5192_v6  ;;  %v5204_v18 = vunpack.i.h.bf16 %v5202_v5  ;;  %v5203_v46 = vunpack.i.l.bf16 %v5202_v5 }
 0x37b   : > { %v1968_v31 = vpop.f32.mrf.mxu3  ;;  %v3105_v6 = vsel %vm7880_vm10, %v6459_v7, %v5193_v21  ;;  %v3106_v49 = vsel %vm7882_vm14, %v6472_v60, %v5194_v29  ;;  %v5138_v7 = vunpack.i.l.bf16 %v6498_v22  ;;  %v6655_v21 = vld [vmem:[%s7881_s1 + $0x2] ss:$0 sm:$0xff]  ;;  %v5207_v29 = vpop.permute.xlu2 %5206  ;;  %v2431_v22 = vsel %vm7885_vm12, %v6576_v28, %v5139_v50  ;;  %vm7897_vm10 = vmmov %vm7861_vm1 }
 0x37c   : > { %v1971_v40 = vmax.f32 %v1968_v31, 0.0  ;;  %v3113_v8 = vsel %vm2434_vm5, %v3105_v6, %v5203_v46  ;;  %v3114_v33 = vsel %vm2434_vm5, %v3106_v49, %v5204_v18  ;;  %2691 = vmatmul.bf16.gmra.mxu0 %v2477_v45  ;;  %v4941_v46 = vld [vmem:[%s7828_s23 + $0x60] sm:$0xff]  ;;  %v5208_v49 = vunpack.i.l.bf16 %v5207_v29  ;;  %vm7903_vm14 = vmmov %vm7861_vm1 }
 0x37d   : > { %v3148_v31 = vpack.c.bf16 %v3114_v33, %v3113_v8  ;;  %v2430_v60 = vsel %vm7883_vm13, %v6572_v39, %v5138_v7  ;;  %v5209_v39 = vunpack.i.h.bf16 %v5207_v29  ;;  %v5178_v8 = vunpack.i.l.bf16 %v6607_v51  ;;  %vm7904_vm13 = vmmov %vm7861_vm1 }
 0x37e   : > { %4667 = vmatmul.msk.f32.vlgmr.msra.gmra.mxu3 %vm1973_vm3, %v1971_v40  ;;  %v5173_v40 = vunpack.i.l.bf16 %v6588_v44  ;;  %v2439_v45 = vsel %vm2434_vm5, %v2430_v60, %v5143_v3  ;;  %vm7896_vm3 = vmmov %vm7861_vm1 }
 0x37f   : > { %3341 = vmatpush.bf16.msra.mxu3 %v4944_v11  ;;  %3335 = vmatmul.bf16.gmra.mxu1 %v3148_v31  ;;  %v5174_v11 = vunpack.i.h.bf16 %v6588_v44  ;;  %v2440_v44 = vsel %vm2434_vm5, %v2431_v22, %v5144_v42  ;;  %v4940_v31 = vld [vmem:[%s7828_s23 + $0x58] sm:$0xff] }
 0x380   : > { %v5212_v6 = vpop.permute.xlu0 %5211  ;;  %v2473_v7 = vpack.c.bf16 %v2440_v44, %v2439_v45  ;;  %v2432_v29 = vsel %vm7887_vm6, %v6595_v13, %v5173_v40 }
 0x381   : > { %v6629_v61 = vpop.f32.mrf.mxu2  ;;  %v5214_v33 = vunpack.i.h.bf16 %v5212_v6  ;;  %v2433_v28 = vsel %vm7888_vm8, %v6599_v4, %v5174_v11  ;;  %v6684_v51 = vsel %vm2434_vm5, %v2432_v29, %v5178_v8  ;;  %v4939_v11 = vld [vmem:[%s7828_s23 + $0x50] sm:$0xff]  ;;  %vm7905_vm8 = vmmov %vm7861_vm1 }
 0x382   : > { %v6687_v60 = vsel %vm2434_vm5, %v2433_v28, %v5179_v55 }
 0x383   : > { %3342 = vmatpush.bf16.msra.mxu3 %v4943_v57  ;;  %v5213_v57 = vunpack.i.l.bf16 %v5212_v6  ;;  %v2476_v50 = vpack.c.bf16 %v6687_v60, %v6684_v51  ;;  %v6700_v6 = vld [vmem:[%s7886_s10 + $0x2] ss:$0 sm:$0xff] }
 0x386   : > { %2647 = vmatmul.bf16.vlgmr.msrb.gmra.mxu3 %v2467_v2 }
 0x387   : > { %3343 = vmatpush.bf16.msra.mxu3 %v4942_v10 }
 0x389   : > { %v6649_v5 = vpop.f32.mrf.mxu2 }
 0x38b   : > { %3344 = vmatpush.bf16.msra.mxu3 %v4941_v46  ;;  %v3115_v46 = vsel %vm939_vm0, %v5827_v56, %v5208_v49 }
 0x38c   : > { %v3123_v13 = vsel %vm7889_vm2, %v3115_v46, %v5213_v57  ;;  %4817 = vmatmul.msk.bf16.vlgmr.msrb.gmra.mxu0 %vm939_vm0, %v3141_v41 }
 0x38f   : > { %3345 = vmatpush.bf16.msra.mxu3 %v4940_v31  ;;  %4847 = vmatmul.msk.bf16.vlgmr.msra.gmra.mxu1 %vm939_vm0, %v5893_v19  ;;  %v4937_v19 = vld [vmem:[%s7828_s23 + $0x40] sm:$0xff] }
 0x391   : > { %v3471_v18 = vpop.f32.mrf.mxu2 }
 0x392   : > { %v3472_v2 = vadd.f32 %v6655_v21, %v3471_v18  ;;  %v3116_v18 = vsel %vm939_vm0, %v5880_v15, %v5209_v39 }
 0x393   : > { %v3124_v3 = vsel %vm7890_vm7, %v3116_v18, %v5214_v33  ;;  %3346 = vmatpush.bf16.msra.mxu3 %v4939_v11  ;;  %v6741_v11 = vpop.f32.mrf.mxu0 }
 0x394   : > { %v3491_v10 = vmax.f32 %v3472_v2, 0.0  ;;  %v6710_v2 = vsel %vm2434_vm5, %v3123_v13, %v5154_v53  ;;  %v6715_v39 = vsel %vm2434_vm5, %v3124_v3, %v5183_v58 }
 0x395   : > { %v3140_v38 = vpack.c.bf16 %v6715_v39, %v6710_v2 }
 0x396   : > { %v3504_v40 = vmul.f32 %v6677_v26, %v3491_v10  ;;  %2652 = vmatmul.bf16.gmra.mxu3 %v2470_v27 }
 0x397   : > { %3347 = vmatpush.bf16.msra.mxu3 %v4938_v16 }
 0x398   : > { %v3517_v24 = vadd.f32 %v6700_v6, %v3504_v40 }
 0x399   : > { %v3473_v4 = vpop.f32.mrf.mxu2 }
 0x39a   : > { %v3474_v55 = vadd.f32 %v6655_v21, %v3473_v4  ;;  %v3525_v25 = vpack.c.bf16 %v3517_v24, %v3517_v24 }
 0x39b   : > { %3348 = vmatpush.bf16.msra.mxu3 %v4937_v19  ;;  %v6750_v16 = vpop.f32.mrf.mxu0 }
 0x39c   : > { %v3492_v42 = vmax.f32 %v3474_v55, 0.0  ;;  %v3681_v8 = vunpack.c.l.b16 %v3525_v25 }
 0x39e   : > { %v3505_v41 = vmul.f32 %v6677_v26, %v3492_v42 }
 0x39f   : > { %4848 = vmatmul.msk.bf16.gmra.mxu1 %vm939_vm0, %v5988_v32 }
 0x3a0   : > { %v3518_v58 = vadd.f32 %v6700_v6, %v3505_v41 }
 0x3a1   : > { %v3476_v53 = vpop.f32.mrf.mxu2 }
 0x3a2   : > { %v3477_v49 = vadd.f32 %v6655_v21, %v3476_v53  ;;  %v3526_v22 = vpack.c.bf16 %v3518_v58, %v3518_v58  ;;  %v7891_v58 = vld [vmem:[#allocation14_spill] sm:$0xff] }
 0x3a4   : > { %v3493_v45 = vmax.f32 %v3477_v49, 0.0  ;;  %v3682_v33 = vunpack.c.l.b16 %v3526_v22  ;;  %v7892_v49 = vld [vmem:[#allocation15_spill] sm:$0xff] }
 0x3a5   : > { %v3144_v19 = vpack.c.bf16 %v7892_v49, %v7891_v58  ;;  %v5227_v49 = vpop.permute.xlu0 %5226 }
 0x3a6   : > { %v3506_v57 = vmul.f32 %v6677_v26, %v3493_v45  ;;  %v3689_v44 = vpack.c.b16 %v3682_v33, %v3681_v8  ;;  %2657 = vmatmul.bf16.gmra.mxu3 %v2473_v7 }
 0x3a7   : > { %4818 = vmatmul.msk.bf16.gmra.mxu0 %vm939_vm0, %v3144_v19 }
 0x3a8   : > { %3693 = vrot.lane.b32.xlu2 %v3689_v44, %s5425_s22  ;;  %v3519_v27 = vadd.f32 %v6700_v6, %v3506_v57 }
 0x3a9   : > { %v3478_v31 = vpop.f32.mrf.mxu2 }
 0x3aa   : > { %v3479_v54 = vadd.f32 %v6655_v21, %v3478_v31  ;;  %v3527_v28 = vpack.c.bf16 %v3519_v27, %v3519_v27 }
 0x3ac   : > { %v3494_v10 = vmax.f32 %v3479_v54, 0.0  ;;  %v3683_v3 = vunpack.c.l.b16 %v3527_v28 }
 0x3ae   : > { %v3507_v29 = vmul.f32 %v6677_v26, %v3494_v10  ;;  %v2960_v10 = vsel %vm7893_vm11, %v5758_v62, 0.0 }
 0x3af   : > { %4849 = vmatmul.msk.bf16.gmra.mxu1 %vm939_vm0, %v7852_v63 }
 0x3b0   : > { %v3520_v51 = vadd.f32 %v6700_v6, %v3507_v29 }
 0x3b1   : > { %v3481_v60 = vpop.f32.mrf.mxu2 }
 0x3b2   : > { %v3528_v18 = vpack.c.bf16 %v3520_v51, %v3520_v51  ;;  %v3482_v46 = vadd.f32 %v6655_v21, %v3481_v60  ;;  %v7894_v51 = vld [vmem:[#allocation16_spill] sm:$0xff] }
 0x3b3   : > { %v3147_v60 = vpack.c.bf16 %v2960_v10, %v7894_v51 }
 0x3b4   : > { %v3495_v13 = vmax.f32 %v3482_v46, 0.0  ;;  %v3684_v4 = vunpack.c.l.b16 %v3528_v18  ;;  %v5217_v18 = vpop.permute.xlu1 %5216 }
 0x3b6   : > { %v3690_v40 = vpack.c.b16 %v3684_v4, %v3683_v3  ;;  %v3508_v55 = vmul.f32 %v6677_v26, %v3495_v13  ;;  %2662 = vmatmul.bf16.gmra.mxu3 %v2476_v50  ;;  %v6759_v50 = vpop.f32.mrf.mxu0  ;;  %v5218_v4 = vunpack.i.l.bf16 %v5217_v18 }
 0x3b7   : > { %4819 = vmatmul.msk.bf16.gmra.mxu0 %vm939_vm0, %v3147_v60 }
 0x3b8   : > { %3695 = vrot.lane.b32.xlu2 %v3690_v40, %s5425_s22  ;;  %v3521_v7 = vadd.f32 %v6700_v6, %v3508_v55  ;;  %v5222_v55 = vpop.permute.xlu2 %5221 }
 0x3b9   : > { %v3483_v32 = vpop.f32.mrf.mxu2  ;;  %v5224_v2 = vunpack.i.h.bf16 %v5222_v55  ;;  %v5223_v39 = vunpack.i.l.bf16 %v5222_v55 }
 0x3ba   : > { %v3484_v42 = vadd.f32 %v6655_v21, %v3483_v32  ;;  %v3529_v53 = vpack.c.bf16 %v3521_v7, %v3521_v7  ;;  %v6770_v13 = vpop.f32.mrf.mxu1  ;;  %v3117_v7 = vsel %vm939_vm0, %v5928_v48, %v5218_v4 }
 0x3bc   : > { %v3496_v24 = vmax.f32 %v3484_v42, 0.0  ;;  %v3685_v57 = vunpack.c.l.b16 %v3529_v53 }
 0x3be   : > { %v3509_v41 = vmul.f32 %v6677_v26, %v3496_v24 }
 0x3bf   : > { %4850 = vmatmul.msk.bf16.gmra.mxu1 %vm939_vm0, %v7859_v34  ;;  %v6777_v34 = vpop.f32.mrf.mxu0 }
 0x3c0   : > { %v3522_v25 = vadd.f32 %v6700_v6, %v3509_v41 }
 0x3c1   : > { %v3486_v22 = vpop.f32.mrf.mxu2 }
 0x3c2   : > { %v3530_v45 = vpack.c.bf16 %v3522_v25, %v3522_v25  ;;  %v3487_v8 = vadd.f32 %v6655_v21, %v3486_v22  ;;  %v6786_v41 = vpop.f32.mrf.mxu1  ;;  %v5229_v22 = vunpack.i.h.bf16 %v5227_v49 }
 0x3c4   : > { %v3497_v33 = vmax.f32 %v3487_v8, 0.0  ;;  %v3686_v63 = vunpack.c.l.b16 %v3530_v45  ;;  %v5228_v45 = vunpack.i.l.bf16 %v5227_v49  ;;  %v5232_v8 = vpop.permute.xlu1 %5231 }
 0x3c6   : > { %v3691_v44 = vpack.c.b16 %v3686_v63, %v3685_v57  ;;  %v3510_v31 = vmul.f32 %v6677_v26, %v3497_v33  ;;  %3349 = vmatmul.bf16.vlgmr.msra.gmra.mxu3 %v3140_v38  ;;  %v5234_v33 = vunpack.i.h.bf16 %v5232_v8  ;;  %v5233_v57 = vunpack.i.l.bf16 %v5232_v8 }
 0x3c7   : > { %v6792_v58 = vpop.f32.mrf.mxu0 }
 0x3c8   : > { %3697 = vrot.lane.b32.xlu2 %v3691_v44, %s5425_s22  ;;  %v3523_v29 = vadd.f32 %v6700_v6, %v3510_v31  ;;  %v3120_v44 = vsel %vm939_vm0, %v6078_v52, %v5229_v22  ;;  %v3119_v31 = vsel %vm939_vm0, %v6020_v0, %v5228_v45 }
 0x3c9   : > { %v3488_v54 = vpop.f32.mrf.mxu2  ;;  %v3128_v10 = vsel %vm7897_vm10, %v3120_v44, %v5234_v33  ;;  %v6840_v33 = vld [vmem:[%s7881_s1] ss:$0 sm:$0xff] }
 0x3ca   : > { %v3489_v27 = vadd.f32 %v6655_v21, %v3488_v54  ;;  %v3531_v3 = vpack.c.bf16 %v3523_v29, %v3523_v29  ;;  %v5219_v21 = vunpack.i.h.bf16 %v5217_v18  ;;  %v2961_v29 = vsel %vm2854_vm9, %v5758_v62, 0.0  ;;  %vm7899_vm9 = vmmov %vm7861_vm1 }
 0x3cb   : > { %v6794_v63 = vpop.f32.mrf.mxu1  ;;  %v3136_v18 = vsel %vm2434_vm5, %v3128_v10, %v6632_v12 }
 0x3cc   : > { %v3498_v28 = vmax.f32 %v3489_v27, 0.0  ;;  %v3687_v32 = vunpack.c.l.b16 %v3531_v3  ;;  %v3127_v27 = vsel %vm7896_vm3, %v3119_v31, %v5233_v57  ;;  %v6843_v57 = vld [vmem:[%s7881_s1 + $0x3] ss:$0 sm:$0xff] }
 0x3cd   : > { %v3135_v60 = vsel %vm2434_vm5, %v3127_v27, %v6632_v12 }
 0x3ce   : > { %v3511_v46 = vmul.f32 %v6677_v26, %v3498_v28  ;;  %v3118_v26 = vsel %vm939_vm0, %v5971_v23, %v5219_v21  ;;  %v2962_v28 = vsel %vm2855_vm4, %v5758_v62, 0.0  ;;  %v3146_v3 = vpack.c.bf16 %v3136_v18, %v3135_v60  ;;  %v5242_v21 = vpop.permute.xlu0 %5241  ;;  %vm7898_vm4 = vmmov %vm7861_vm1 }
 0x3cf   : > { %v3126_v24 = vsel %vm7895_vm15, %v3118_v26, %v5224_v2  ;;  %v6800_v54 = vpop.f32.mrf.mxu0  ;;  %v3150_v51 = vpack.c.bf16 %v2962_v28, %v2961_v29  ;;  %v5244_v62 = vunpack.i.h.bf16 %v5242_v21 }
 0x3d0   : > { %v3524_v47 = vadd.f32 %v6700_v6, %v3511_v46  ;;  %v3125_v6 = vsel %vm7861_vm1, %v3117_v7, %v5223_v39  ;;  %v3134_v25 = vsel %vm2434_vm5, %v3126_v24, %v6632_v12 }
 0x3d1   : > { %v3133_v53 = vsel %vm2434_vm5, %v3125_v6, %v6632_v12  ;;  %4820 = vmatmul.msk.bf16.gmra.mxu0 %vm939_vm0, %v3150_v51  ;;  %v6849_v51 = vld [vmem:[%s7884_s2 + $0x3] ss:$0 sm:$0xff] }
 0x3d2   : > { %v3532_v40 = vpack.c.bf16 %v3524_v47, %v3524_v47  ;;  %v3143_v19 = vpack.c.bf16 %v3134_v25, %v3133_v53  ;;  %v5237_v47 = vpop.permute.xlu2 %5236 }
 0x3d3   : > { %v6815_v46 = vpop.f32.mrf.mxu1  ;;  %v5239_v4 = vunpack.i.h.bf16 %v5237_v47  ;;  %v5238_v36 = vunpack.i.l.bf16 %v5237_v47 }
 0x3d4   : > { %v3688_v42 = vunpack.c.l.b16 %v3532_v40  ;;  %v5243_v40 = vunpack.i.l.bf16 %v5242_v21 }
 0x3d5   : > { %v3122_v55 = vsel %vm939_vm0, %v6200_v14, %v5239_v4 }
 0x3d6   : > { %v3692_v38 = vpack.c.b16 %v3688_v42, %v3687_v32  ;;  %3354 = vmatmul.bf16.gmra.mxu3 %v3143_v19  ;;  %v3121_v32 = vsel %vm939_vm0, %v6136_v43, %v5238_v36  ;;  %v3130_v26 = vsel %vm7899_vm9, %v3122_v55, %v5244_v62  ;;  %v6855_v62 = vld [vmem:[%s7886_s10 + $0x3] ss:$0 sm:$0xff] }
 0x3d7   : > { %v6817_v20 = vpop.f32.mrf.mxu0  ;;  %v3129_v42 = vsel %vm7898_vm4, %v3121_v32, %v5243_v40 }
 0x3d8   : > { %3699 = vrot.lane.b32.xlu2 %v3692_v38, %s5425_s22  ;;  %v3137_v39 = vsel %vm2434_vm5, %v3129_v42, %v6632_v12  ;;  %v3138_v38 = vsel %vm2434_vm5, %v3130_v26, %v6632_v12  ;;  %v6860_v26 = vld [vmem:[%s7884_s2] ss:$0 sm:$0xff]  ;;  %s7902_s22 = sld [smem:[#allocation3_spill]] }
 0x3d9   : > { %v3149_v6 = vpack.c.bf16 %v3138_v38, %v3137_v39 }
 0x3db   : > { %v6825_v7 = vpop.f32.mrf.mxu1 }
 0x3df   : > { %v2677_v2 = vpop.f32.mrf.mxu0 }
 0x3e3   : > { %v6831_v24 = vpop.f32.mrf.mxu1 }
 0x3e6   : > { %3359 = vmatmul.bf16.gmra.mxu3 %v3146_v3 }
 0x3e7   : > { %v2679_v53 = vpop.f32.mrf.mxu0 }
 0x3ef   : > { %v2682_v19 = vpop.f32.mrf.mxu0 }
 0x3f6   : > { %3364 = vmatmul.bf16.gmra.mxu3 %v3149_v6 }
 0x3f7   : > { %v2684_v8 = vpop.f32.mrf.mxu0 }
 0x3fc   : > { %v6833_v25 = vpop.f32.mrf.mxu1 }
 0x3ff   : > { %v2687_v60 = vpop.f32.mrf.mxu0 }
 0x401   : > { %v6835_v49 = vpop.f32.mrf.mxu3 }
 0x404   : > { %v6837_v22 = vpop.f32.mrf.mxu1 }
 0x407   : > { %v2689_v6 = vpop.f32.mrf.mxu0 }
 0x409   : > { %v2648_v45 = vpop.f32.mrf.mxu3 }
 0x40a   : > { %v2649_v31 = vadd.f32 %v6840_v33, %v2648_v45 }
 0x40c   : > { %v3563_v12 = vpop.f32.mrf.mxu1  ;;  %v2678_v29 = vadd.f32 %v2677_v2, %v2649_v31 }
 0x40d   : > { %v3564_v27 = vadd.f32 %v6843_v57, %v3563_v12  ;;  %v6866_v12 = vld [vmem:[%s7886_s10] ss:$0 sm:$0xff] }
 0x40e   : > { %v2707_v4 = vadd.f32 %v6556_v1, %v2678_v29 }
 0x40f   : > { %v3583_v28 = vmax.f32 %v3564_v27, 0.0 }
 0x410   : > { %v2726_v42 = vmax.f32 %v2707_v4, 0.0 }
 0x411   : > { %v2650_v44 = vpop.f32.mrf.mxu3  ;;  %v3596_v36 = vmul.f32 %v6849_v51, %v3583_v28 }
 0x412   : > { %v2651_v10 = vadd.f32 %v6840_v33, %v2650_v44  ;;  %v2738_v45 = vmul.f32 %v6860_v26, %v2726_v42 }
 0x413   : > { %v3609_v2 = vadd.f32 %v6855_v62, %v3596_v36 }
 0x414   : > { %v3565_v18 = vpop.f32.mrf.mxu1  ;;  %v2680_v3 = vadd.f32 %v2679_v53, %v2651_v10  ;;  %v2750_v29 = vadd.f32 %v6866_v12, %v2738_v45 }
 0x415   : > { %v3566_v47 = vadd.f32 %v6843_v57, %v3565_v18  ;;  %v3617_v44 = vpack.c.bf16 %v3609_v2, %v3609_v2 }
 0x416   : > { %v2709_v55 = vadd.f32 %v6568_v30, %v2680_v3 }
 0x417   : > { %v3584_v40 = vmax.f32 %v3566_v47, 0.0  ;;  %v3709_v28 = vunpack.c.l.b16 %v3617_v44 }
 0x418   : > { %v2727_v53 = vmax.f32 %v2709_v55, 0.0 }
 0x419   : > { %v2653_v21 = vpop.f32.mrf.mxu3  ;;  %v3597_v32 = vmul.f32 %v6849_v51, %v3584_v40 }
 0x41a   : > { %v2654_v30 = vadd.f32 %v6840_v33, %v2653_v21  ;;  %v2739_v10 = vmul.f32 %v6860_v26, %v2727_v53 }
 0x41b   : > { %v3610_v39 = vadd.f32 %v6855_v62, %v3597_v32 }
 0x41c   : > { %v3568_v38 = vpop.f32.mrf.mxu1  ;;  %v2683_v18 = vadd.f32 %v2682_v19, %v2654_v30  ;;  %v2751_v40 = vadd.f32 %v6866_v12, %v2739_v10  ;;  %v2758_v19 = vpack.c.bf16 %v2750_v29, %v2750_v29 }
 0x41d   : > { %v3618_v31 = vpack.c.bf16 %v3610_v39, %v3610_v39  ;;  %v3569_v27 = vadd.f32 %v6843_v57, %v3568_v38  ;;  %v2692_v38 = vpop.f32.mrf.mxu0 }
 0x41e   : > { %v2712_v53 = vadd.f32 %v6579_v35, %v2683_v18  ;;  %v2759_v30 = vpack.c.bf16 %v2751_v40, %v2751_v40  ;;  %v6882_v10 = vunpack.c.l.b16 %v2758_v19 }
 0x41f   : > { %v3585_v3 = vmax.f32 %v3569_v27, 0.0  ;;  %v3710_v4 = vunpack.c.l.b16 %v3618_v31 }
 0x420   : > { %v2728_v27 = vmax.f32 %v2712_v53, 0.0 }
 0x421   : > { %v2655_v1 = vpop.f32.mrf.mxu3  ;;  %v3598_v55 = vmul.f32 %v6849_v51, %v3585_v3  ;;  %v3717_v42 = vpack.c.b16 %v3710_v4, %v3709_v28  ;;  %v6884_v28 = vunpack.c.l.b16 %v2759_v30 }
 0x422   : > { %v2656_v47 = vadd.f32 %v6840_v33, %v2655_v1  ;;  %v2740_v40 = vmul.f32 %v6860_v26, %v2728_v27 }
 0x423   : > { %3721 = vrot.lane.b32.xlu0 %v3717_v42, %s5423_s18  ;;  %v3611_v1 = vadd.f32 %v6855_v62, %v3598_v55 }
 0x424   : > { %v3570_v36 = vpop.f32.mrf.mxu1  ;;  %v2685_v32 = vadd.f32 %v2684_v8, %v2656_v47  ;;  %v2752_v19 = vadd.f32 %v6866_v12, %v2740_v40 }
 0x425   : > { %v3571_v2 = vadd.f32 %v6843_v57, %v3570_v36  ;;  %v3619_v3 = vpack.c.bf16 %v3611_v1, %v3611_v1 }
 0x426   : > { %v2714_v31 = vadd.f32 %v6585_v37, %v2685_v32 }
 0x427   : > { %v3586_v45 = vmax.f32 %v3571_v2, 0.0  ;;  %v3711_v42 = vunpack.c.l.b16 %v3619_v3  ;;  %v2694_v2 = vpop.f32.mrf.mxu0 }
 0x428   : > { %v2729_v47 = vmax.f32 %v2714_v31, 0.0 }
 0x429   : > { %v2658_v21 = vpop.f32.mrf.mxu3  ;;  %v3599_v8 = vmul.f32 %v6849_v51, %v3586_v45 }
 0x42a   : > { %v2659_v39 = vadd.f32 %v6840_v33, %v2658_v21 }
 0x42b   : > { %v3612_v35 = vadd.f32 %v6855_v62, %v3599_v8 }
 0x42c   : > { %v2688_v44 = vadd.f32 %v2687_v60, %v2659_v39  ;;  %v3573_v18 = vpop.f32.mrf.mxu1  ;;  %v3641_v60 = vpack.c.b16 %v6884_v28, %v6882_v10  ;;  %v2741_v39 = vmul.f32 %v6860_v26, %v2729_v47 }
 0x42d   : > { %v3574_v29 = vadd.f32 %v6843_v57, %v3573_v18  ;;  %v3620_v37 = vpack.c.bf16 %v3612_v35, %v3612_v35  ;;  %v2760_v18 = vpack.c.bf16 %v2752_v19, %v2752_v19 }
 0x42e   : > { %v2753_v31 = vadd.f32 %v6866_v12, %v2741_v39 }
 0x42f   : > { %v3587_v55 = vmax.f32 %v3574_v29, 0.0  ;;  %v3712_v21 = vunpack.c.l.b16 %v3620_v37  ;;  %v3379_v40 = vpop.f32.mrf.mxu0 }
 0x430   : > { %v2761_v37 = vpack.c.bf16 %v2753_v31, %v2753_v31 }
 0x431   : > { %v2660_v4 = vpop.f32.mrf.mxu3  ;;  %v3718_v53 = vpack.c.b16 %v3712_v21, %v3711_v42  ;;  %v3600_v1 = vmul.f32 %v6849_v51, %v3587_v55  ;;  %v6904_v21 = vunpack.c.l.b16 %v2760_v18 }
 0x432   : > { %v2661_v36 = vadd.f32 %v6840_v33, %v2660_v4 }
 0x433   : > { %3723 = vrot.lane.b32.xlu0 %v3718_v53, %s5423_s18  ;;  %v3613_v3 = vadd.f32 %v6855_v62, %v3600_v1 }
 0x434   : > { %v2690_v32 = vadd.f32 %v2689_v6, %v2661_v36  ;;  %v3575_v45 = vpop.f32.mrf.mxu1  ;;  %v2717_v6 = vadd.f32 %v6591_v9, %v2688_v44  ;;  %v6906_v9 = vunpack.c.l.b16 %v2761_v37 }
 0x435   : > { %v3576_v30 = vadd.f32 %v6843_v57, %v3575_v45  ;;  %v3621_v55 = vpack.c.bf16 %v3613_v3, %v3613_v3 }
 0x436   : > { %v2719_v29 = vadd.f32 %v6619_v59, %v2690_v32  ;;  %v2730_v36 = vmax.f32 %v2717_v6, 0.0  ;;  %v3642_v59 = vpack.c.b16 %v6906_v9, %v6904_v21 }
 0x437   : > { %v3588_v35 = vmax.f32 %v3576_v30, 0.0  ;;  %v3713_v31 = vunpack.c.l.b16 %v3621_v55 }
 0x438   : > { %v2731_v39 = vmax.f32 %v2719_v29, 0.0  ;;  %v2742_v1 = vmul.f32 %v6860_v26, %v2730_v36 }
 0x439   : > { %v2663_v8 = vpop.f32.mrf.mxu3  ;;  %v3601_v4 = vmul.f32 %v6849_v51, %v3588_v35 }
 0x43a   : > { %v2664_v27 = vadd.f32 %v6840_v33, %v2663_v8  ;;  %v6914_v8 = vld [vmem:[%s7881_s1 + $0x1] ss:$0 sm:$0xff]  ;;  %v2754_v35 = vadd.f32 %v6866_v12, %v2742_v1 }
 0x43b   : > { %v3614_v42 = vadd.f32 %v6855_v62, %v3601_v4  ;;  %v3381_v4 = vpop.f32.mrf.mxu0 }
 0x43c   : > { %v2693_v47 = vadd.f32 %v2692_v38, %v2664_v27  ;;  %v3578_v44 = vpop.f32.mrf.mxu1  ;;  %v2743_v27 = vmul.f32 %v6860_v26, %v2731_v39 }
 0x43d   : > { %v3622_v53 = vpack.c.bf16 %v3614_v42, %v3614_v42  ;;  %v3579_v38 = vadd.f32 %v6843_v57, %v3578_v44 }
 0x43e   : > { %v2755_v37 = vadd.f32 %v6866_v12, %v2743_v27  ;;  %v2722_v55 = vadd.f32 %v6629_v61, %v2693_v47 }
 0x43f   : > { %v3589_v45 = vmax.f32 %v3579_v38, 0.0  ;;  %v3714_v30 = vunpack.c.l.b16 %v3622_v53  ;;  %v2762_v53 = vpack.c.bf16 %v2754_v35, %v2754_v35 }
 0x440   : > { %v2732_v1 = vmax.f32 %v2722_v55, 0.0 }
 0x441   : > { %v2665_v19 = vpop.f32.mrf.mxu3  ;;  %v3719_v3 = vpack.c.b16 %v3714_v30, %v3713_v31  ;;  %v3602_v18 = vmul.f32 %v6849_v51, %v3589_v45  ;;  %v6929_v31 = vld [vmem:[%s7884_s2 + $0x1] ss:$0 sm:$0xff]  ;;  %v6932_v61 = vunpack.c.l.b16 %v2762_v53 }
 0x442   : > { %v2666_v32 = vadd.f32 %v6840_v33, %v2665_v19  ;;  %v3322_v33 = vadd.f32 %v6914_v8, %v6770_v13 }
 0x443   : > { %3725 = vrot.lane.b32.xlu0 %v3719_v3, %s5423_s18  ;;  %v3615_v44 = vadd.f32 %v6855_v62, %v3602_v18 }
 0x444   : > { %v2695_v6 = vadd.f32 %v2694_v2, %v2666_v32  ;;  %v3580_v29 = vpop.f32.mrf.mxu1  ;;  %v2763_v32 = vpack.c.bf16 %v2755_v37, %v2755_v37 }
 0x445   : > { %v3581_v36 = vadd.f32 %v6843_v57, %v3580_v29  ;;  %v3623_v57 = vpack.c.bf16 %v3615_v44, %v3615_v44 }
 0x446   : > { %v2724_v19 = vadd.f32 %v6649_v5, %v2695_v6  ;;  %v6934_v47 = vunpack.c.l.b16 %v2763_v32 }
 0x447   : > { %v3590_v39 = vmax.f32 %v3581_v36, 0.0  ;;  %v3715_v29 = vunpack.c.l.b16 %v3623_v57 }
 0x448   : > { %v2733_v27 = vmax.f32 %v2724_v19, 0.0  ;;  %v3643_v3 = vpack.c.b16 %v6934_v47, %v6932_v61 }
 0x449   : > { %v3350_v2 = vpop.f32.mrf.mxu3  ;;  %v3603_v13 = vmul.f32 %v6849_v51, %v3590_v39  ;;  %v3384_v51 = vpop.f32.mrf.mxu0  ;;  %v3327_v39 = vadd.f32 %v6914_v8, %v6794_v63 }
 0x44a   : > { %v3351_v42 = vadd.f32 %v3350_v2, %v3322_v33  ;;  %v6942_v33 = vld [vmem:[%s7886_s10 + $0x1] ss:$0 sm:$0xff]  ;;  %v2745_v2 = vmul.f32 %v6860_v26, %v2733_v27 }
 0x44b   : > { %v3616_v30 = vadd.f32 %v6855_v62, %v3603_v13  ;;  %v2744_v62 = vmul.f32 %v6860_v26, %v2732_v1 }
 0x44c   : > { %v3380_v38 = vadd.f32 %v3379_v40, %v3351_v42  ;;  %v3324_v40 = vadd.f32 %v6914_v8, %v6786_v41 }
 0x44d   : > { %v3624_v5 = vpack.c.bf16 %v3616_v30, %v3616_v30  ;;  %v2756_v44 = vadd.f32 %v6866_v12, %v2744_v62 }
 0x44e   : > { %v3399_v45 = vmax.f32 %v3380_v38, 0.0  ;;  %v2757_v38 = vadd.f32 %v6866_v12, %v2745_v2  ;;  %v3329_v12 = vadd.f32 %v6914_v8, %v6815_v46 }
 0x44f   : > { %v3716_v37 = vunpack.c.l.b16 %v3624_v5  ;;  %v2764_v1 = vpack.c.bf16 %v2756_v44, %v2756_v44 }
 0x450   : > { %v3412_v35 = vmul.f32 %v6929_v31, %v3399_v45  ;;  %v2765_v30 = vpack.c.bf16 %v2757_v38, %v2757_v38 }
 0x451   : > { %v3352_v6 = vpop.f32.mrf.mxu3  ;;  %v3720_v41 = vpack.c.b16 %v3716_v37, %v3715_v29  ;;  %v3386_v32 = vpop.f32.mrf.mxu0 }
 0x452   : > { %v3353_v18 = vadd.f32 %v3352_v6, %v3324_v40  ;;  %v3425_v42 = vadd.f32 %v6942_v33, %v3412_v35  ;;  %v6954_v6 = vunpack.c.l.b16 %v2764_v1  ;;  %v6956_v63 = vunpack.c.l.b16 %v2765_v30 }
 0x453   : > { %3727 = vrot.lane.b32.xlu0 %v3720_v41, %s5423_s18  ;;  %v3334_v1 = vadd.f32 %v6914_v8, %v6831_v24  ;;  %s7901_s18 = sld [smem:[#allocation2_spill]] }
 0x454   : > { %v3382_v36 = vadd.f32 %v3381_v4, %v3353_v18  ;;  %v3433_v26 = vpack.c.bf16 %v3425_v42, %v3425_v42  ;;  %v3644_v62 = vpack.c.b16 %v6956_v63, %v6954_v6 }
 0x456   : > { %v3400_v55 = vmax.f32 %v3382_v36, 0.0  ;;  %v3653_v27 = vunpack.c.l.b16 %v3433_v26 }
 0x458   : > { %v3413_v53 = vmul.f32 %v6929_v31, %v3400_v55  ;;  %v3332_v55 = vadd.f32 %v6914_v8, %v6825_v7 }
 0x459   : > { %v3355_v19 = vpop.f32.mrf.mxu3  ;;  %v3389_v36 = vpop.f32.mrf.mxu0 }
 0x45a   : > { %v3356_v13 = vadd.f32 %v3355_v19, %v3327_v39  ;;  %v3426_v4 = vadd.f32 %v6942_v33, %v3413_v53 }
 0x45c   : > { %v3385_v45 = vadd.f32 %v3384_v51, %v3356_v13  ;;  %v3434_v57 = vpack.c.bf16 %v3426_v4, %v3426_v4 }
 0x45e   : > { %v3401_v40 = vmax.f32 %v3385_v45, 0.0  ;;  %v3654_v5 = vunpack.c.l.b16 %v3434_v57 }
 0x460   : > { %v3661_v35 = vpack.c.b16 %v3654_v5, %v3653_v27  ;;  %v3414_v29 = vmul.f32 %v6929_v31, %v3401_v40 }
 0x461   : > { %v3357_v18 = vpop.f32.mrf.mxu3 }
 0x462   : > { %v3358_v51 = vadd.f32 %v3357_v18, %v3329_v12  ;;  %3665 = vrot.lane.b32.xlu1 %v3661_v35, %s5422_s11  ;;  %v3427_v41 = vadd.f32 %v6942_v33, %v3414_v29  ;;  %v3337_v12 = vadd.f32 %v6914_v8, %v6833_v25  ;;  %v3339_v25 = vadd.f32 %v6914_v8, %v6837_v22 }
 0x464   : > { %v3387_v37 = vadd.f32 %v3386_v32, %v3358_v51  ;;  %v3435_v53 = vpack.c.bf16 %v3427_v41, %v3427_v41  ;;  %v3391_v32 = vpop.f32.mrf.mxu0  ;;  %v4958_v41 = vld [vmem:[%s7900_s16 + $0x38] sm:$0xff] }
 0x465   : > { %3829 = vmatpush.bf16.msrb.mxu3 %v4958_v41 }
 0x466   : > { %v3402_v2 = vmax.f32 %v3387_v37, 0.0  ;;  %v3655_v4 = vunpack.c.l.b16 %v3435_v53 }
 0x468   : > { %v3415_v46 = vmul.f32 %v6929_v31, %v3402_v2 }
 0x469   : > { %v3360_v42 = vpop.f32.mrf.mxu3 }
 0x46a   : > { %v3361_v44 = vadd.f32 %v3360_v42, %v3332_v55  ;;  %v3428_v39 = vadd.f32 %v6942_v33, %v3415_v46 }
 0x46c   : > { %v3390_v38 = vadd.f32 %v3389_v36, %v3361_v44  ;;  %v3436_v19 = vpack.c.bf16 %v3428_v39, %v3428_v39  ;;  %v3394_v18 = vpop.f32.mrf.mxu0  ;;  %v4957_v44 = vld [vmem:[%s7900_s16 + $0x30] sm:$0xff] }
 0x46d   : > { %3830 = vmatpush.bf16.msrb.mxu3 %v4957_v44  ;;  %v3694_v44 = vpop.permute.xlu2 %3693 }
 0x46e   : > { %v3403_v13 = vmax.f32 %v3390_v38, 0.0  ;;  %v3656_v26 = vunpack.c.l.b16 %v3436_v19 }
 0x470   : > { %v3662_v45 = vpack.c.b16 %v3656_v26, %v3655_v4  ;;  %v3416_v7 = vmul.f32 %v6929_v31, %v3403_v13 }
 0x471   : > { %v3362_v57 = vpop.f32.mrf.mxu3 }
 0x472   : > { %v3363_v30 = vadd.f32 %v3362_v57, %v3334_v1  ;;  %3667 = vrot.lane.b32.xlu1 %v3662_v45, %s5422_s11  ;;  %v3429_v5 = vadd.f32 %v6942_v33, %v3416_v7  ;;  %v4956_v45 = vld [vmem:[%s7900_s16 + $0x28] sm:$0xff]  ;;  %v4955_v7 = vld [vmem:[%s7900_s16 + $0x20] sm:$0xff] }
 0x473   : > { %3831 = vmatpush.bf16.msrb.mxu3 %v4956_v45 }
 0x474   : > { %v3392_v40 = vadd.f32 %v3391_v32, %v3363_v30  ;;  %v3437_v37 = vpack.c.bf16 %v3429_v5, %v3429_v5  ;;  %v3396_v13 = vpop.f32.mrf.mxu0  ;;  %v4954_v5 = vld [vmem:[%s7900_s16 + $0x18] sm:$0xff] }
 0x476   : > { %v3404_v27 = vmax.f32 %v3392_v40, 0.0  ;;  %v3657_v46 = vunpack.c.l.b16 %v3437_v37 }
 0x477   : > { %3832 = vmatpush.bf16.msrb.mxu3 %v4955_v7 }
 0x478   : > { %v3417_v35 = vmul.f32 %v6929_v31, %v3404_v27 }
 0x479   : > { %v3365_v24 = vpop.f32.mrf.mxu3 }
 0x47a   : > { %v3366_v29 = vadd.f32 %v3365_v24, %v3337_v12  ;;  %v3430_v51 = vadd.f32 %v6942_v33, %v3417_v35  ;;  %v4952_v12 = vld [vmem:[%s7900_s16 + $0x8] sm:$0xff]  ;;  %v6995_v35 = vld [vmem:[%s7901_s18] ss:$0 sm:$0xff]  ;;  %s7937_s18 = sld [smem:[#allocation13_spill]] }
 0x47b   : > { %3833 = vmatpush.bf16.msrb.mxu3 %v4954_v5  ;;  %v7000_v24 = vld [vmem:[%s7902_s22] ss:$0 sm:$0xff]  ;;  %v1736_v37 = vmul.f32 %v6995_v35, %v6741_v11  ;;  %v1737_v41 = vmul.f32 %v6995_v35, %v6750_v16  ;;  %v1739_v5 = vmul.f32 %v6995_v35, %v6777_v34  ;;  %v1741_v61 = vmul.f32 %v6995_v35, %v6800_v54  ;;  %s7738_s22 = scalar_lea.vmem %s5580_s27, %s4586_s15 }
 0x47c   : > { %v3395_v36 = vadd.f32 %v3394_v18, %v3366_v29  ;;  %v3438_v2 = vpack.c.bf16 %v3430_v51, %v3430_v51  ;;  %v1735_v18 = vmul.f32 %v6995_v35, %v6733_v17 }
 0x47d   : > { %v1749_v17 = vadd.f32 %v7000_v24, %v1737_v41 }
 0x47e   : > { %v3405_v55 = vmax.f32 %v3395_v36, 0.0  ;;  %v3658_v42 = vunpack.c.l.b16 %v3438_v2  ;;  %v1747_v29 = vadd.f32 %v7000_v24, %v1735_v18  ;;  %v1748_v2 = vadd.f32 %v7000_v24, %v1736_v37 }
 0x480   : > { %v3663_v39 = vpack.c.b16 %v3658_v42, %v3657_v46  ;;  %v3418_v38 = vmul.f32 %v6929_v31, %v3405_v55  ;;  %v1755_v51 = vsub.f32 0.0, %v1747_v29  ;;  %v2001_v55 = vsub.f32 0.0, %v6835_v49 }
 0x481   : > { %v3367_v53 = vpop.f32.mrf.mxu3  ;;  %v1756_v46 = vsub.f32 0.0, %v1748_v2 }
 0x482   : > { %v3368_v19 = vadd.f32 %v3367_v53, %v3339_v25  ;;  %3669 = vrot.lane.b32.xlu1 %v3663_v39, %s5422_s11  ;;  %v3431_v32 = vadd.f32 %v6942_v33, %v3418_v38  ;;  %v1763_v36 = vmul.f32 1.442695, %v1755_v51  ;;  %v2002_v25 = vmul.f32 1.442695, %v2001_v55 }
 0x483   : > { %v1765_v38 = vmul.f32 1.442695, %v1756_v46 }
 0x484   : > { %v3397_v4 = vadd.f32 %v3396_v13, %v3368_v19  ;;  %v3439_v8 = vpack.c.bf16 %v3431_v32, %v3431_v32  ;;  %5317 = vpow2.f32 %v1763_v36  ;;  %v1757_v19 = vsub.f32 0.0, %v1749_v17 }
 0x485   : > { %v1738_v13 = vmul.f32 %v6995_v35, %v6759_v50  ;;  %5319 = vpow2.f32 %v2002_v25  ;;  %v3696_v50 = vpop.permute.xlu2 %3695 }
 0x486   : > { %v3406_v26 = vmax.f32 %v3397_v4, 0.0  ;;  %v3659_v30 = vunpack.c.l.b16 %v3439_v8  ;;  %5321 = vpow2.f32 %v1765_v38 }
 0x487   : > { %v1750_v10 = vadd.f32 %v7000_v24, %v1738_v13 }
 0x488   : > { %v3419_v1 = vmul.f32 %v6929_v31, %v3406_v26  ;;  %v4953_v31 = vld [vmem:[%s7900_s16 + $0x10] sm:$0xff]  ;;  %v1767_v26 = vmul.f32 1.442695, %v1757_v19 }
 0x489   : > { %3834 = vmatpush.bf16.msrb.mxu3 %v4953_v31  ;;  %v1758_v32 = vsub.f32 0.0, %v1750_v10 }
 0x48a   : > { %v3432_v22 = vadd.f32 %v6942_v33, %v3419_v1  ;;  %v4951_v33 = vld [vmem:[%s7900_s16] sm:$0xff]  ;;  %v5318_v49 = vpop.eup %5317 }
 0x48b   : > { %v7018_v4 = vadd.f32 1.0, %v5318_v49  ;;  %v5320_v28 = vpop.eup %5319  ;;  %v1769_v45 = vmul.f32 1.442695, %v1758_v32 }
 0x48c   : > { %v3440_v57 = vpack.c.bf16 %v3432_v22, %v3432_v22  ;;  %v7022_v1 = vadd.f32 1.0, %v5320_v28 }
 0x48d   : > { %3835 = vmatpush.bf16.msrb.mxu3 %v4952_v12  ;;  %5323 = vrcp.f32 %v7018_v4  ;;  %v1740_v12 = vmul.f32 %v6995_v35, %v6792_v58  ;;  %vm1792_vm12 = vweird.f32 %v7018_v4 }
 0x48e   : > { %v3660_v40 = vunpack.c.l.b16 %v3440_v57  ;;  %5325 = vpow2.f32 %v1767_v26  ;;  %v2016_v54 = vand.u32 2147483648, %v7022_v1  ;;  %vm2010_vm1 = vweird.f32 %v7022_v1 }
 0x48f   : > { %5327 = vrcp.f32 %v7022_v1  ;;  %v1752_v18 = vadd.f32 %v7000_v24, %v1740_v12 }
 0x490   : > { %v3664_v27 = vpack.c.b16 %v3660_v40, %v3659_v30 }
 0x491   : > { %3836 = vmatpush.bf16.msrb.mxu3 %v4951_v33  ;;  %v1760_v36 = vsub.f32 0.0, %v1752_v18 }
 0x492   : > { %3671 = vrot.lane.b32.xlu1 %v3664_v27, %s5422_s11  ;;  %s7935_s11 = sld [smem:[#allocation12_spill]] }
 0x495   : > { %v3722_v39 = vpop.permute.xlu0 %3721 }
 0x4a5   : > { %v3724_v30 = vpop.permute.xlu0 %3723 }
 0x4b5   : > { %v3726_v19 = vpop.permute.xlu0 %3725 }
 0x4d4   : > { %v3666_v42 = vpop.permute.xlu1 %3665 }
 0x4d5   : > { %v3731_v11 = vsel %vm939_vm0, %v3641_v60, %v3666_v42  ;;  %v5322_v60 = vpop.eup %5321 }
 0x4d6   : > { %v3742_v53 = vsel %vm7903_vm14, %v3731_v11, %v3694_v44  ;;  %v7024_v22 = vadd.f32 1.0, %v5322_v60  ;;  %v5324_v7 = vpop.eup %5323  ;;  %v1773_v44 = vmul.f32 1.442695, %v1760_v36 }
 0x4d7   : > { %v3750_v16 = vsel %vm2434_vm5, %v3742_v53, %v3722_v39  ;;  %v5326_v27 = vpop.eup %5325  ;;  %v1788_v21 = vmul.f32 %v5324_v7, %v7018_v4  ;;  %vm1793_vm6 = vweird.f32 %v5324_v7  ;;  %v1796_v39 = vand.u32 2147483647, %v7018_v4  ;;  %v3698_v53 = vpop.permute.xlu2 %3697 }
 0x4d8   : > { %3837 = vmatmul.bf16.vlgmr.msrb.gmra.mxu3 %v3750_v16  ;;  %5329 = vrcp.f32 %v7024_v22  ;;  %v7039_v9 = vadd.f32 1.0, %v5326_v27  ;;  %v7042_v33 = vpop.eup %5327  ;;  %v1798_v16 = vand.u32 2147483648, %v7018_v4  ;;  %vm1794_vm2 = vmor %vm1792_vm12, %vm1793_vm6  ;;  %v1753_v4 = vadd.f32 %v7000_v24, %v1741_v61 }
 0x4d9   : > { %5331 = vpow2.f32 %v1769_v45  ;;  %v1789_v34 = vsub.f32 1.0, %v1788_v21  ;;  %v2006_v58 = vmul.f32 %v7042_v33, %v7022_v1  ;;  %vm1797_vm7 = vcmp.eq.f32.partialorder %v1796_v39, 8.507059e+37 }
 0x4da   : > { %5333 = vrcp.f32 %v7039_v9  ;;  %vm2011_vm11 = vweird.f32 %v7042_v33  ;;  %v2014_v27 = vand.u32 2147483647, %v7022_v1  ;;  %vm1807_vm15 = vweird.f32 %v7024_v22 }
 0x4db   : > { %v1790_v2 = vmul.f32 %v5324_v7, %v1789_v34  ;;  %v2007_v42 = vsub.f32 1.0, %v2006_v58  ;;  %vm7092_vm10 = vmor %vm2010_vm1, %vm2011_vm11  ;;  %v1761_v18 = vsub.f32 0.0, %v1753_v4 }
 0x4dc   : > { %vm2015_vm14 = vcmp.eq.f32.partialorder %v2014_v27, 8.507059e+37 }
 0x4dd   : > { %v1791_v11 = vadd.f32 %v5324_v7, %v1790_v2  ;;  %v2008_v10 = vmul.f32 %v7042_v33, %v2007_v42 }
 0x4de   : > { %v7045_v29 = vpop.eup %5329 }
 0x4df   : > { %v5332_v51 = vpop.eup %5331  ;;  %v1803_v41 = vmul.f32 %v7045_v29, %v7024_v22  ;;  %v1795_v47 = vsel %vm1794_vm2, %v5324_v7, %v1791_v11  ;;  %vm1808_vm3 = vweird.f32 %v7045_v29  ;;  %v1775_v11 = vmul.f32 1.442695, %v1761_v18 }
 0x4e0   : > { %v7052_v55 = vadd.f32 1.0, %v5332_v51  ;;  %v7054_v17 = vpop.eup %5333  ;;  %v2017_v51 = vor.u32 1.1754944e-38, %v2016_v54  ;;  %vm7108_vm4 = vmor %vm1807_vm15, %vm1808_vm3  ;;  %vm7916_vm2 = vcmask 523264  }
 0x4e1   : > { %v1804_v49 = vsub.f32 1.0, %v1803_v41  ;;  %v1818_v26 = vmul.f32 %v7054_v17, %v7039_v9  ;;  %vm1823_vm12 = vweird.f32 %v7054_v17 }
 0x4e2   : > { %5335 = vrcp.f32 %v7052_v55 }
 0x4e3   : > { %v1805_v60 = vmul.f32 %v7045_v29, %v1804_v49  ;;  %v1819_v32 = vsub.f32 1.0, %v1818_v26 }
 0x4e4   : > { %v3668_v8 = vpop.permute.xlu1 %3667 }
 0x4e5   : > { %v3734_v57 = vsel %vm939_vm0, %v3642_v59, %v3668_v8  ;;  %v1751_v59 = vadd.f32 %v7000_v24, %v1739_v5  ;;  %v2009_v8 = vadd.f32 %v7042_v33, %v2008_v10  ;;  %v1820_v1 = vmul.f32 %v7054_v17, %v1819_v32 }
 0x4e6   : > { %v3744_v40 = vsel %vm7904_vm13, %v3734_v57, %v3696_v50  ;;  %v1742_v57 = vmul.f32 %v6995_v35, %v6817_v20  ;;  %v1826_v20 = vand.u32 2147483647, %v7039_v9  ;;  %vm1822_vm13 = vweird.f32 %v7039_v9 }
 0x4e7   : > { %v3753_v31 = vsel %vm2434_vm5, %v3744_v40, %v3724_v30  ;;  %v1759_v37 = vsub.f32 0.0, %v1751_v59  ;;  %v1811_v30 = vand.u32 2147483647, %v7024_v22  ;;  %v1813_v40 = vand.u32 2147483648, %v7024_v22 }
 0x4e8   : > { %3842 = vmatmul.bf16.gmra.mxu3 %v3753_v31  ;;  %v7076_v45 = vpop.eup %5335  ;;  %v1806_v31 = vadd.f32 %v7045_v29, %v1805_v60  ;;  %v2013_v22 = vsel %vm7092_vm10, %v7042_v33, %v2009_v8  ;;  %v1754_v34 = vadd.f32 %v7000_v24, %v1742_v57  ;;  %v1828_v24 = vand.u32 2147483648, %v7039_v9 }
 0x4e9   : > { %v1771_v46 = vmul.f32 1.442695, %v1759_v37  ;;  %v1833_v21 = vmul.f32 %v7076_v45, %v7052_v55  ;;  %vm7112_vm9 = vcmp.eq.f32.partialorder %v1811_v30, 8.507059e+37  ;;  %v1814_v36 = vor.u32 1.1754944e-38, %v1813_v40 }
 0x4ea   : > { %v1810_v33 = vsel %vm7108_vm4, %v7045_v29, %v1806_v31  ;;  %v2018_v41 = vsel %vm2015_vm14, %v2017_v51, %v2013_v22  ;;  %vm7125_vm6 = vcmp.eq.f32.partialorder %v1826_v20, 8.507059e+37  ;;  %v1762_v29 = vsub.f32 0.0, %v1754_v34 }
 0x4eb   : > { %5337 = vpow2.f32 %v1771_v46  ;;  %v1821_v46 = vadd.f32 %v7054_v17, %v1820_v1  ;;  %v1829_v10 = vor.u32 1.1754944e-38, %v1828_v24 }
 0x4ec   : > { %5339 = vpow2.f32 %v1773_v44  ;;  %v1834_v44 = vsub.f32 1.0, %v1833_v21  ;;  %v1777_v60 = vmul.f32 1.442695, %v1762_v29 }
 0x4ee   : > { %v1835_v63 = vmul.f32 %v7076_v45, %v1834_v44 }
 0x4f0   : > { %v1836_v27 = vadd.f32 %v7076_v45, %v1835_v63 }
 0x4f1   : > { %v5338_v7 = vpop.eup %5337 }
 0x4f2   : > { %v5340_v5 = vpop.eup %5339  ;;  %v7105_v59 = vadd.f32 1.0, %v5338_v7 }
 0x4f3   : > { %v7116_v2 = vadd.f32 1.0, %v5340_v5 }
 0x4f4   : > { %v3670_v25 = vpop.permute.xlu1 %3669  ;;  %5341 = vrcp.f32 %v7105_v59  ;;  %v1856_v44 = vand.u32 2147483647, %v7105_v59  ;;  %vm1852_vm15 = vweird.f32 %v7105_v59 }
 0x4f5   : > { %v3737_v38 = vsel %vm939_vm0, %v3643_v3, %v3670_v25  ;;  %v1799_v3 = vor.u32 1.1754944e-38, %v1798_v16  ;;  %5343 = vrcp.f32 %v7116_v2  ;;  %v3700_v16 = vpop.permute.xlu2 %3699  ;;  %vm1867_vm4 = vweird.f32 %v7116_v2 }
 0x4f6   : > { %v3746_v13 = vsel %vm7905_vm8, %v3737_v38, %v3698_v53  ;;  %v1815_v53 = vsel %vm7112_vm9, %v1814_v36, %v1810_v33  ;;  %v7134_v38 = vperm.slane %v2018_v41, 0  ;;  %vm7146_vm8 = vmor %vm1822_vm13, %vm1823_vm12  ;;  %5345 = vpow2.f32 %v1775_v11 }
 0x4f7   : > { %v3756_v28 = vsel %vm2434_vm5, %v3746_v13, %v3726_v19  ;;  %v1800_v50 = vsel %vm1797_vm7, %v1799_v3, %v1795_v47  ;;  %v1825_v6 = vsel %vm7146_vm8, %v7054_v17, %v1821_v46  ;;  %v7158_v9 = vmul.f32 %v1815_v53, %v5880_v15 }
 0x4f8   : > { %3847 = vmatmul.bf16.gmra.mxu3 %v3756_v28  ;;  %v7097_v12 = vmul.f32 %v1800_v50, %v5827_v56  ;;  %v3728_v28 = vpop.permute.xlu0 %3727  ;;  %v1843_v3 = vand.u32 2147483648, %v7052_v55  ;;  %v7165_v17 = vmul.f32 %v7134_v38, %v5827_v56  ;;  %v7169_v50 = vmul.f32 %v7134_v38, %v5880_v15 }
 0x4f9   : > { %v1830_v30 = vsel %vm7125_vm6, %v1829_v10, %v1825_v6  ;;  %vm1838_vm7 = vweird.f32 %v7076_v45  ;;  %v3859_v31 = vperm.slane %v7158_v9, 0  ;;  %v3875_v20 = vperm.slane %v7158_v9, 1 }
 0x4fa   : > { %v3858_v25 = vperm.slane %v7097_v12, 0  ;;  %v3874_v19 = vperm.slane %v7097_v12, 1  ;;  %v3898_v13 = vperm.slane %v7097_v12, 2  ;;  %v3922_v32 = vperm.slane %v7097_v12, 3  ;;  %v7171_v4 = vpop.eup %5341 }
 0x4fb   : > { %v3946_v8 = vperm.slane %v7097_v12, 4  ;;  %v3970_v57 = vperm.slane %v7097_v12, 5  ;;  %v3994_v54 = vperm.slane %v7097_v12, 6  ;;  %v4018_v7 = vperm.slane %v7097_v12, 7  ;;  %v7178_v40 = vpop.eup %5343 }
 0x4fc   : > { %v1844_v35 = vor.u32 1.1754944e-38, %v1843_v3  ;;  %5347 = vpow2.f32 %v1777_v60  ;;  %v3899_v1 = vperm.slane %v7158_v9, 2  ;;  %v7191_v21 = vmul.f32 %v1830_v30, %v5928_v48  ;;  %v5346_v18 = vpop.eup %5345 }
 0x4fd   : > { %v3866_v22 = vmul.f32 %v3858_v25, %v7165_v17  ;;  %v3923_v34 = vperm.slane %v7158_v9, 3  ;;  %v3947_v51 = vperm.slane %v7158_v9, 4  ;;  %v1848_v58 = vmul.f32 %v7171_v4, %v7105_v59 }
 0x4fe   : > { %v1863_v36 = vmul.f32 %v7178_v40, %v7116_v2  ;;  %v3971_v33 = vperm.slane %v7158_v9, 5  ;;  %v3995_v24 = vperm.slane %v7158_v9, 6  ;;  %v7212_v46 = vmul.f32 %v7134_v38, %v5928_v48 }
 0x4ff   : > { %v4019_v42 = vperm.slane %v7158_v9, 7  ;;  %v3867_v25 = vmul.f32 %v3859_v31, %v7165_v17  ;;  %v3883_v11 = vmul.f32 %v3875_v20, %v7169_v50  ;;  %v3860_v29 = vperm.slane %v7191_v21, 0 }
 0x500   : > { %v7220_v53 = vadd.f32 1.0, %v5346_v18  ;;  %v1849_v26 = vsub.f32 1.0, %v1848_v58  ;;  %v1864_v10 = vsub.f32 1.0, %v1863_v36  ;;  %v7229_v6 = vmul.f32 %v7134_v38, %v5971_v23 }
 0x501   : > { %v3906_v63 = vmul.f32 %v3898_v13, %v7212_v46  ;;  %v3996_v3 = vperm.slane %v7191_v21, 6  ;;  %v3891_v60 = vadd.f32 %v3883_v11, %v3867_v25  ;;  %vm1853_vm3 = vweird.f32 %v7171_v4 }
 0x502   : > { %5349 = vrcp.f32 %v7220_v53  ;;  %v1850_v13 = vmul.f32 %v7171_v4, %v1849_v26  ;;  %v1865_v20 = vmul.f32 %v7178_v40, %v1864_v10  ;;  %v3930_v18 = vmul.f32 %v3922_v32, %v7229_v6  ;;  %vm7287_vm14 = vmor %vm1852_vm15, %vm1853_vm3 }
 0x503   : > { %vm7254_vm10 = vcmp.eq.f32.partialorder %v1856_v44, 8.507059e+37  ;;  %v1871_v58 = vand.u32 2147483647, %v7116_v2  ;;  %vm1868_vm9 = vweird.f32 %v7178_v40  ;;  %v3868_v26 = vmul.f32 %v3860_v29, %v7165_v17 }
 0x504   : > { %v3672_v39 = vpop.permute.xlu1 %3671  ;;  %v1851_v32 = vadd.f32 %v7171_v4, %v1850_v13  ;;  %v1866_v44 = vadd.f32 %v7178_v40, %v1865_v20  ;;  %vm7301_vm13 = vmor %vm1867_vm4, %vm1868_vm9  ;;  %vm1882_vm6 = vweird.f32 %v7220_v53 }
 0x505   : > { %v3740_v49 = vsel %vm939_vm0, %v3644_v62, %v3672_v39  ;;  %v1841_v62 = vand.u32 2147483647, %v7052_v55  ;;  %v1858_v39 = vand.u32 2147483648, %v7105_v59  ;;  %vm1872_vm12 = vcmp.eq.f32.partialorder %v1871_v58, 8.507059e+37 }
 0x506   : > { %v3748_v61 = vsel %vm7916_vm2, %v3740_v49, %v3700_v16  ;;  %v3876_v49 = vperm.slane %v7191_v21, 1 }
 0x507   : > { %v3759_v47 = vsel %vm2434_vm5, %v3748_v61, %v3728_v28  ;;  %vm1837_vm5 = vweird.f32 %v7052_v55  ;;  %vm7183_vm11 = vcmp.eq.f32.partialorder %v1841_v62, 8.507059e+37  ;;  %v3882_v55 = vmul.f32 %v3874_v19, %v7169_v50 }
 0x508   : > { %3852 = vmatmul.bf16.gmra.mxu3 %v3759_v47  ;;  %vm7197_vm1 = vmor %vm1837_vm5, %vm1838_vm7  ;;  %v3900_v28 = vperm.slane %v7191_v21, 2  ;;  %v3924_v61 = vperm.slane %v7191_v21, 3  ;;  %v3948_v62 = vperm.slane %v7191_v21, 4  ;;  %v3972_v47 = vperm.slane %v7191_v21, 5 }
 0x509   : > { %v1840_v41 = vsel %vm7197_vm1, %v7076_v45, %v1836_v27  ;;  %v3890_v16 = vadd.f32 %v3882_v55, %v3866_v22  ;;  %v5348_v45 = vpop.eup %5347  ;;  %v1859_v22 = vor.u32 1.1754944e-38, %v1858_v39  ;;  %v7249_v55 = vmul.f32 %v7134_v38, %v6020_v0 }
 0x50a   : > { %v1845_v19 = vsel %vm7183_vm11, %v1844_v35, %v1840_v41  ;;  %v7240_v27 = vadd.f32 1.0, %v5348_v45  ;;  %v3907_v35 = vmul.f32 %v3899_v1, %v7212_v46  ;;  %v1873_v1 = vand.u32 2147483648, %v7116_v2 }
 0x50b   : > { %v7237_v30 = vmul.f32 %v1845_v19, %v5971_v23  ;;  %v3914_v5 = vadd.f32 %v3906_v63, %v3890_v16  ;;  %v3931_v39 = vmul.f32 %v3923_v34, %v7229_v6  ;;  %v7268_v16 = vpop.eup %5349  ;;  %v7272_v45 = vmul.f32 %v7134_v38, %v6078_v52 }
 0x50c   : > { %v3915_v36 = vadd.f32 %v3907_v35, %v3891_v60  ;;  %5351 = vrcp.f32 %v7240_v27  ;;  %v3954_v19 = vmul.f32 %v3946_v8, %v7249_v55  ;;  %v3884_v10 = vmul.f32 %v3876_v49, %v7169_v50 }
 0x50d   : > { %v3861_v41 = vperm.slane %v7237_v30, 0  ;;  %v3877_v25 = vperm.slane %v7237_v30, 1  ;;  %v3938_v11 = vadd.f32 %v3930_v18, %v3914_v5  ;;  %v3901_v63 = vperm.slane %v7237_v30, 2 }
 0x50e   : > { %v3925_v60 = vperm.slane %v7237_v30, 3  ;;  %v3949_v34 = vperm.slane %v7237_v30, 4  ;;  %v3939_v5 = vadd.f32 %v3931_v39, %v3915_v36  ;;  %v3973_v13 = vperm.slane %v7237_v30, 5 }
 0x50f   : > { %v3962_v8 = vadd.f32 %v3954_v19, %v3938_v11  ;;  %v3869_v29 = vmul.f32 %v3861_v41, %v7165_v17  ;;  %v3885_v49 = vmul.f32 %v3877_v25, %v7169_v50  ;;  %v1855_v18 = vsel %vm7287_vm14, %v7171_v4, %v1851_v32 }
 0x510   : > { %v1878_v36 = vmul.f32 %v7268_v16, %v7220_v53  ;;  %v3955_v41 = vmul.f32 %v3947_v51, %v7249_v55  ;;  %v1870_v4 = vsel %vm7301_vm13, %v7178_v40, %v1866_v44  ;;  %v7317_v2 = vmul.f32 %v7134_v38, %v6136_v43 }
 0x511   : > { %v3978_v11 = vmul.f32 %v3970_v57, %v7272_v45  ;;  %v3892_v32 = vadd.f32 %v3884_v10, %v3868_v26  ;;  %v1874_v39 = vor.u32 1.1754944e-38, %v1873_v1  ;;  %v1888_v19 = vand.u32 2147483648, %v7220_v53 }
 0x512   : > { %v7310_v25 = vpop.eup %5351  ;;  %v3963_v51 = vadd.f32 %v3955_v41, %v3939_v5  ;;  %v1860_v20 = vsel %vm7254_vm10, %v1859_v22, %v1855_v18  ;;  %v3893_v59 = vadd.f32 %v3885_v49, %v3869_v29  ;;  %v3908_v40 = vmul.f32 %v3900_v28, %v7212_v46 }
 0x513   : > { %v3986_v31 = vadd.f32 %v3978_v11, %v3962_v8  ;;  %v1875_v44 = vsel %vm1872_vm12, %v1874_v39, %v1870_v4  ;;  %v1879_v35 = vsub.f32 1.0, %v1878_v36  ;;  %v1893_v57 = vmul.f32 %v7310_v25, %v7240_v27 }
 0x514   : > { %v3979_v58 = vmul.f32 %v3971_v33, %v7272_v45  ;;  %v7335_v1 = vmul.f32 %v7134_v38, %v6200_v14  ;;  %v4002_v22 = vmul.f32 %v3994_v54, %v7317_v2  ;;  %v3909_v37 = vmul.f32 %v3901_v63, %v7212_v46 }
 0x515   : > { %v3916_v28 = vadd.f32 %v3908_v40, %v3892_v32  ;;  %v4021_v26 = vperm.slane %v7237_v30, 7  ;;  %v7343_v10 = vmul.f32 %v1860_v20, %v6020_v0  ;;  %v1886_v5 = vand.u32 2147483647, %v7220_v53 }
 0x516   : > { %v3987_v8 = vadd.f32 %v3979_v58, %v3963_v51  ;;  %v7347_v33 = vmul.f32 %v1875_v44, %v6078_v52  ;;  %v4010_v38 = vadd.f32 %v4002_v22, %v3986_v31  ;;  %v3917_v29 = vadd.f32 %v3909_v37, %v3893_v59 }
 0x517   : > { %v3932_v54 = vmul.f32 %v3924_v61, %v7229_v6  ;;  %v1880_v63 = vmul.f32 %v7268_v16, %v1879_v35  ;;  %v1894_v49 = vsub.f32 1.0, %v1893_v57  ;;  %v4003_v18 = vmul.f32 %v3995_v24, %v7317_v2 }
 0x518   : > { %v1889_v36 = vor.u32 1.1754944e-38, %v1888_v19  ;;  %v4026_v41 = vmul.f32 %v4018_v7, %v7335_v1  ;;  %v3933_v31 = vmul.f32 %v3925_v60, %v7229_v6  ;;  %v3862_v11 = vperm.slane %v7343_v10, 0 }
 0x519   : > { %v3940_v4 = vadd.f32 %v3932_v54, %v3916_v28  ;;  %v3878_v61 = vperm.slane %v7343_v10, 1  ;;  %vm1883_vm8 = vweird.f32 %v7268_v16  ;;  %v4011_v35 = vadd.f32 %v4003_v18, %v3987_v8 }
 0x51a   : > { %v3863_v32 = vperm.slane %v7347_v33, 0  ;;  %vm7365_vm2 = vcmp.eq.f32.partialorder %v1886_v5, 8.507059e+37  ;;  %v7369_v24 = vadd.f32 %v4026_v41, %v4010_v38  ;;  %v3941_v12 = vadd.f32 %v3933_v31, %v3917_v29  ;;  %vm7393_vm5 = vmor %vm1882_vm6, %vm1883_vm8 }
 0x51b   : > { %v3956_v7 = vmul.f32 %v3948_v62, %v7249_v55  ;;  %v3879_v60 = vperm.slane %v7347_v33, 1  ;;  %v1881_v19 = vadd.f32 %v7268_v16, %v1880_v63  ;;  %v1895_v51 = vmul.f32 %v7310_v25, %v1894_v49 }
 0x51c   : > { %v4027_v20 = vmul.f32 %v4019_v42, %v7335_v1  ;;  %v3957_v59 = vmul.f32 %v3949_v34, %v7249_v55  ;;  %v3870_v44 = vmul.f32 %v3862_v11, %v7165_v17  ;;  %v3886_v57 = vmul.f32 %v3878_v61, %v7169_v50 }
 0x51d   : > { %v3964_v40 = vadd.f32 %v3956_v7, %v3940_v4  ;;  %v3902_v58 = vperm.slane %v7343_v10, 2  ;;  %v3871_v22 = vmul.f32 %v3863_v32, %v7165_v17  ;;  %v3887_v37 = vmul.f32 %v3879_v60, %v7169_v50 }
 0x51e   : > { %v7384_v62 = vadd.f32 %v4027_v20, %v4011_v35  ;;  %v3903_v28 = vperm.slane %v7347_v33, 2  ;;  %v4042_v42 = vsel %vm939_vm0, %v7369_v24, -inf  ;;  %v3965_v34 = vadd.f32 %v3957_v59, %v3941_v12 }
 0x51f   : > { %v3980_v5 = vmul.f32 %v3972_v47, %v7272_v45  ;;  %v1885_v8 = vsel %vm7393_vm5, %v7268_v16, %v1881_v19  ;;  %v1896_v38 = vadd.f32 %v7310_v25, %v1895_v51  ;;  %vm1898_vm7 = vweird.f32 %v7310_v25 }
 0x520   : > { %v1903_v53 = vand.u32 2147483648, %v7240_v27  ;;  %vm1897_vm11 = vweird.f32 %v7240_v27  ;;  %v3981_v29 = vmul.f32 %v3973_v13, %v7272_v45  ;;  %v3894_v63 = vadd.f32 %v3886_v57, %v3870_v44 }
 0x521   : > { %v3988_v54 = vadd.f32 %v3980_v5, %v3964_v40  ;;  %v1901_v47 = vand.u32 2147483647, %v7240_v27  ;;  %v4043_v49 = vrot.slane %v4042_v42, 4  ;;  %v4049_v16 = vsel %vm939_vm0, %v7384_v62, -inf  ;;  %vm7416_vm1 = vmor %vm1897_vm11, %vm1898_vm7 }
 0x522   : > { %v3895_v18 = vadd.f32 %v3887_v37, %v3871_v22  ;;  %v3926_v41 = vperm.slane %v7343_v10, 3  ;;  %v3989_v4 = vadd.f32 %v3981_v29, %v3965_v34  ;;  %v4004_v13 = vmul.f32 %v3996_v3, %v7317_v2 }
 0x523   : > { %v3910_v11 = vmul.f32 %v3902_v58, %v7212_v46  ;;  %v1890_v27 = vsel %vm7365_vm2, %v1889_v36, %v1885_v8  ;;  %v1900_v61 = vsel %vm7416_vm1, %v7310_v25, %v1896_v38  ;;  %v1904_v35 = vor.u32 1.1754944e-38, %v1903_v53 }
 0x524   : > { %v3911_v32 = vmul.f32 %v3903_v28, %v7212_v46  ;;  %v4050_v12 = vrot.slane %v4049_v16, 4  ;;  %v7933_v7 = vperm.slane %v7237_v30, 6  ;;  %v4012_v19 = vadd.f32 %v4004_v13, %v3988_v54 }
 0x525   : > { %v3918_v51 = vadd.f32 %v3910_v11, %v3894_v63  ;;  %v3927_v3 = vperm.slane %v7347_v33, 3  ;;  %vm1902_vm15 = vcmp.eq.f32.partialorder %v1901_v47, 8.507059e+37  ;;  %v4044_v20 = vmax.f32 %v4042_v42, %v4043_v49 }
 0x526   : > { %v4005_v60 = vmul.f32 %v7933_v7, %v7317_v2  ;;  %v3919_v39 = vadd.f32 %v3911_v32, %v3895_v18  ;;  %v1905_v36 = vsel %vm1902_vm15, %v1904_v35, %v1900_v61  ;;  %v7934_v25 = vperm.slane %v7191_v21, 7  ;;  %v4960_v35 = vld [vmem:[%s7935_s11 + $0x8] sm:$0xff] }
 0x527   : > { %v3934_v44 = vmul.f32 %v3926_v41, %v7229_v6  ;;  %v3950_v57 = vperm.slane %v7343_v10, 4  ;;  %v7440_v58 = vmul.f32 %v1890_v27, %v6136_v43  ;;  %v3935_v22 = vmul.f32 %v3927_v3, %v7229_v6  ;;  %4420 = vmatpush.bf16.msra.mxu0 %v4960_v35 }
 0x528   : > { %v4013_v59 = vadd.f32 %v4005_v60, %v3989_v4  ;;  %v4028_v40 = vmul.f32 %v7934_v25, %v7335_v1  ;;  %v4051_v37 = vmax.f32 %v4049_v16, %v4050_v12  ;;  %v4029_v28 = vmul.f32 %v4021_v26, %v7335_v1 }
 0x529   : > { %v3942_v42 = vadd.f32 %v3934_v44, %v3918_v51  ;;  %v3951_v21 = vperm.slane %v7347_v33, 4  ;;  %v7450_v34 = vmul.f32 %v1905_v36, %v6200_v14  ;;  %v4045_v5 = vrot.slane %v4044_v20, 2 }
 0x52a   : > { %v7446_v9 = vadd.f32 %v4028_v40, %v4012_v19  ;;  %v3943_v8 = vadd.f32 %v3935_v22, %v3919_v39  ;;  %v7452_v38 = vadd.f32 %v4029_v28, %v4013_v59  ;;  %v3958_v53 = vmul.f32 %v3950_v57, %v7249_v55 }
 0x52b   : > { %v3974_v29 = vperm.slane %v7343_v10, 5  ;;  %v3975_v30 = vperm.slane %v7347_v33, 5  ;;  %v3864_v26 = vperm.slane %v7440_v58, 0  ;;  %v3959_v54 = vmul.f32 %v3951_v21, %v7249_v55 }
 0x52c   : > { %v3880_v63 = vperm.slane %v7440_v58, 1  ;;  %v4052_v47 = vrot.slane %v4051_v37, 2  ;;  %v4056_v49 = vsel %vm939_vm0, %v7446_v9, -inf  ;;  %v3966_v16 = vadd.f32 %v3958_v53, %v3942_v42 }
 0x52d   : > { %v3865_v18 = vperm.slane %v7450_v34, 0  ;;  %v3881_v41 = vperm.slane %v7450_v34, 1  ;;  %v4046_v31 = vmax.f32 %v4044_v20, %v4045_v5  ;;  %v3967_v4 = vadd.f32 %v3959_v54, %v3943_v8 }
 0x52e   : > { %v4063_v13 = vsel %vm939_vm0, %v7452_v38, -inf  ;;  %v3982_v11 = vmul.f32 %v3974_v29, %v7272_v45  ;;  %v3872_v27 = vmul.f32 %v3864_v26, %v7165_v17  ;;  %v3888_v61 = vmul.f32 %v3880_v63, %v7169_v50 }
 0x52f   : > { %v4057_v32 = vrot.slane %v4056_v49, 4  ;;  %v3983_v12 = vmul.f32 %v3975_v30, %v7272_v45  ;;  %v3873_v7 = vmul.f32 %v3865_v18, %v7165_v17  ;;  %v3889_v60 = vmul.f32 %v3881_v41, %v7169_v50 }
 0x530   : > { %v3998_v19 = vperm.slane %v7343_v10, 6  ;;  %v4053_v51 = vmax.f32 %v4051_v37, %v4052_v47  ;;  %v3990_v3 = vadd.f32 %v3982_v11, %v3966_v16  ;;  %v3999_v20 = vperm.slane %v7347_v33, 6 }
 0x531   : > { %v4064_v39 = vrot.slane %v4063_v13, 4  ;;  %v3991_v36 = vadd.f32 %v3983_v12, %v3967_v4  ;;  %v3904_v59 = vperm.slane %v7440_v58, 2  ;;  %v4047_v25 = vrot.slane %v4046_v31, 1 }
 0x532   : > { %v4006_v40 = vmul.f32 %v3998_v19, %v7317_v2  ;;  %v3896_v44 = vadd.f32 %v3888_v61, %v3872_v27  ;;  %v3905_v57 = vperm.slane %v7450_v34, 2  ;;  %v4058_v17 = vmax.f32 %v4056_v49, %v4057_v32 }
 0x533   : > { %v4007_v50 = vmul.f32 %v3999_v20, %v7317_v2  ;;  %v3897_v22 = vadd.f32 %v3889_v60, %v3873_v7  ;;  %v4022_v37 = vperm.slane %v7343_v10, 7  ;;  %v4054_v28 = vrot.slane %v4053_v51, 1 }
 0x534   : > { %v4014_v42 = vadd.f32 %v4006_v40, %v3990_v3  ;;  %v3912_v21 = vmul.f32 %v3904_v59, %v7212_v46  ;;  %v4023_v5 = vperm.slane %v7347_v33, 7  ;;  %v4065_v8 = vmax.f32 %v4063_v13, %v4064_v39 }
 0x535   : > { %v4015_v53 = vadd.f32 %v4007_v50, %v3991_v36  ;;  %v3913_v29 = vmul.f32 %v3905_v57, %v7212_v46  ;;  %v3928_v30 = vperm.slane %v7440_v58, 3  ;;  %v4048_v26 = vmax.f32 %v4046_v31, %v4047_v25 }
 0x536   : > { %v4030_v54 = vmul.f32 %v4022_v37, %v7335_v1  ;;  %v3920_v63 = vadd.f32 %v3912_v21, %v3896_v44  ;;  %v3929_v47 = vperm.slane %v7450_v34, 3  ;;  %v4059_v49 = vrot.slane %v4058_v17, 2 }
 0x537   : > { %v4031_v10 = vmul.f32 %v4023_v5, %v7335_v1  ;;  %v3921_v16 = vadd.f32 %v3913_v29, %v3897_v22  ;;  %v4055_v18 = vmax.f32 %v4053_v51, %v4054_v28  ;;  %v3936_v33 = vmul.f32 %v3928_v30, %v7229_v6 }
 0x538   : > { %v7487_v41 = vadd.f32 %v4030_v54, %v4014_v42  ;;  %v4066_v4 = vrot.slane %v4065_v8, 2  ;;  %v3937_v46 = vmul.f32 %v3929_v47, %v7229_v6  ;;  %v3952_v31 = vperm.slane %v7440_v58, 4 }
 0x539   : > { %v7490_v13 = vadd.f32 %v4031_v10, %v4015_v53  ;;  %v4098_v11 = vsub.f32 %v7369_v24, %v4048_v26  ;;  %v3944_v27 = vadd.f32 %v3936_v33, %v3920_v63  ;;  %v3953_v61 = vperm.slane %v7450_v34, 4 }
 0x53a   : > { %v4060_v35 = vmax.f32 %v4058_v17, %v4059_v49  ;;  %v3945_v32 = vadd.f32 %v3937_v46, %v3921_v16  ;;  %v4099_v12 = vsub.f32 %v7384_v62, %v4055_v18  ;;  %v4070_v7 = vsel %vm939_vm0, %v7487_v41, -inf }
 0x53b   : > { %v3960_v60 = vmul.f32 %v3952_v31, %v7249_v55  ;;  %v4067_v19 = vmax.f32 %v4065_v8, %v4066_v4  ;;  %v4077_v6 = vsel %vm939_vm0, %v7490_v13, -inf  ;;  %v3961_v51 = vmul.f32 %v3953_v61, %v7249_v55 }
 0x53c   : > { %v3976_v24 = vperm.slane %v7440_v58, 5  ;;  %v4106_v3 = vmul.f32 1.442695, %v4098_v11  ;;  %v3977_v39 = vperm.slane %v7450_v34, 5  ;;  %v4061_v36 = vrot.slane %v4060_v35, 1 }
 0x53d   : > { %v3968_v20 = vadd.f32 %v3960_v60, %v3944_v27  ;;  %v4071_v59 = vrot.slane %v4070_v7, 4  ;;  %v3969_v62 = vadd.f32 %v3961_v51, %v3945_v32  ;;  %v4108_v25 = vmul.f32 1.442695, %v4099_v12 }
 0x53e   : > { %v4078_v40 = vrot.slane %v4077_v6, 4  ;;  %v3984_v44 = vmul.f32 %v3976_v24, %v7272_v45  ;;  %v4068_v57 = vrot.slane %v4067_v19, 1  ;;  %v3985_v17 = vmul.f32 %v3977_v39, %v7272_v45 }
 0x53f   : > { %v4000_v50 = vperm.slane %v7440_v58, 6  ;;  %5353 = vpow2.f32 %v4106_v3  ;;  %v4001_v22 = vperm.slane %v7450_v34, 6  ;;  %v4062_v37 = vmax.f32 %v4060_v35, %v4061_v36 }
 0x540   : > { %v3992_v55 = vadd.f32 %v3984_v44, %v3968_v20  ;;  %v4072_v28 = vmax.f32 %v4070_v7, %v4071_v59  ;;  %v3993_v42 = vadd.f32 %v3985_v17, %v3969_v62  ;;  %5355 = vpow2.f32 %v4108_v25 }
 0x541   : > { %v4079_v21 = vmax.f32 %v4077_v6, %v4078_v40  ;;  %v4008_v5 = vmul.f32 %v4000_v50, %v7317_v2  ;;  %v4069_v8 = vmax.f32 %v4067_v19, %v4068_v57  ;;  %v4009_v53 = vmul.f32 %v4001_v22, %v7317_v2 }
 0x542   : > { %v4024_v29 = vperm.slane %v7440_v58, 7  ;;  %v4025_v45 = vperm.slane %v7450_v34, 7  ;;  %v4100_v26 = vsub.f32 %v7446_v9, %v4062_v37  ;;  %v4073_v54 = vrot.slane %v4072_v28, 2 }
 0x543   : > { %v4016_v30 = vadd.f32 %v4008_v5, %v3992_v55  ;;  %v4017_v63 = vadd.f32 %v4009_v53, %v3993_v42  ;;  %v4080_v49 = vrot.slane %v4079_v21, 2  ;;  %v4101_v16 = vsub.f32 %v7452_v38, %v4069_v8  ;;  %v4959_v38 = vld [vmem:[%s7935_s11] sm:$0xff] }
 0x544   : > { %v4032_v10 = vmul.f32 %v4024_v29, %v7335_v1  ;;  %v4033_v18 = vmul.f32 %v4025_v45, %v7335_v1  ;;  %v4110_v9 = vmul.f32 1.442695, %v4100_v26  ;;  %v4074_v33 = vmax.f32 %v4072_v28, %v4073_v54  ;;  %4421 = vmatpush.bf16.msra.mxu0 %v4959_v38 }
 0x545   : > { %v7514_v47 = vpop.eup %5353  ;;  %v4081_v31 = vmax.f32 %v4079_v21, %v4080_v49  ;;  %v4112_v27 = vmul.f32 1.442695, %v4101_v16 }
 0x546   : > { %v7519_v2 = vpop.eup %5355  ;;  %v7521_v58 = vadd.f32 %v4032_v10, %v4016_v30  ;;  %v4122_v34 = vsel %vm939_vm0, %v7514_v47, 0.0  ;;  %v7525_v4 = vadd.f32 %v4033_v18, %v4017_v63  ;;  %5357 = vpow2.f32 %v4110_v9 }
 0x547   : > { %v4129_v11 = vsel %vm939_vm0, %v7519_v2, 0.0  ;;  %v4123_v1 = vrot.slane %v4122_v34, 4  ;;  %v4075_v35 = vrot.slane %v4074_v33, 1  ;;  %v4082_v7 = vrot.slane %v4081_v31, 1 }
 0x548   : > { %v4084_v61 = vsel %vm939_vm0, %v7521_v58, -inf  ;;  %v4091_v32 = vsel %vm939_vm0, %v7525_v4, -inf  ;;  %v4130_v12 = vrot.slane %v4129_v11, 4  ;;  %5359 = vpow2.f32 %v4112_v27 }
 0x549   : > { %v4085_v60 = vrot.slane %v4084_v61, 4  ;;  %v4124_v19 = vadd.f32 %v4123_v1, %v4122_v34  ;;  %v4092_v6 = vrot.slane %v4091_v32, 4  ;;  %v4076_v51 = vmax.f32 %v4074_v33, %v4075_v35 }
 0x54a   : > { %v4131_v24 = vadd.f32 %v4130_v12, %v4129_v11  ;;  %v4083_v20 = vmax.f32 %v4081_v31, %v4082_v7 }
 0x54b   : > { %v4086_v36 = vmax.f32 %v4084_v61, %v4085_v60  ;;  %v4125_v59 = vrot.slane %v4124_v19, 2  ;;  %v4093_v62 = vmax.f32 %v4091_v32, %v4092_v6  ;;  %v4102_v40 = vsub.f32 %v7487_v41, %v4076_v51 }
 0x54c   : > { %v7538_v39 = vpop.eup %5357  ;;  %v4132_v44 = vrot.slane %v4131_v24, 2  ;;  %v4103_v17 = vsub.f32 %v7490_v13, %v4083_v20 }
 0x54d   : > { %v4136_v57 = vsel %vm939_vm0, %v7538_v39, 0.0  ;;  %v4087_v50 = vrot.slane %v4086_v36, 2  ;;  %v4126_v55 = vadd.f32 %v4125_v59, %v4124_v19  ;;  %v4094_v37 = vrot.slane %v4093_v62, 2 }
 0x54e   : > { %v7540_v25 = vpop.eup %5359  ;;  %v4137_v28 = vrot.slane %v4136_v57, 4  ;;  %v4114_v42 = vmul.f32 1.442695, %v4102_v40  ;;  %v4133_v21 = vadd.f32 %v4132_v44, %v4131_v24  ;;  %v4116_v8 = vmul.f32 1.442695, %v4103_v17 }
 0x54f   : > { %v4143_v22 = vsel %vm939_vm0, %v7540_v25, 0.0  ;;  %v4088_v29 = vmax.f32 %v4086_v36, %v4087_v50  ;;  %v4127_v41 = vrot.slane %v4126_v55, 1  ;;  %v4095_v30 = vmax.f32 %v4093_v62, %v4094_v37 }
 0x550   : > { %v4144_v53 = vrot.slane %v4143_v22, 4  ;;  %v4138_v45 = vadd.f32 %v4137_v28, %v4136_v57  ;;  %5361 = vpow2.f32 %v4114_v42  ;;  %v4134_v26 = vrot.slane %v4133_v21, 1  ;;  %v7565_v57 = vld [vmem:[%s7936_s26] ss:$0 sm:$0xff] }
 0x551   : > { %5363 = vpow2.f32 %v4116_v8  ;;  %v4089_v54 = vrot.slane %v4088_v29, 1  ;;  %v4128_v63 = vadd.f32 %v4127_v41, %v4126_v55  ;;  %v4096_v49 = vrot.slane %v4095_v30, 1 }
 0x552   : > { %v4145_v13 = vadd.f32 %v4144_v53, %v4143_v22  ;;  %v4139_v10 = vrot.slane %v4138_v45, 2  ;;  %v4135_v16 = vadd.f32 %v4134_v26, %v4133_v21 }
 0x553   : > { %v4090_v33 = vmax.f32 %v4088_v29, %v4089_v54  ;;  %5365 = vrcp.f32 %v4128_v63  ;;  %v4097_v11 = vmax.f32 %v4095_v30, %v4096_v49 }
 0x554   : > { %v4146_v9 = vrot.slane %v4145_v13, 2  ;;  %v4140_v38 = vadd.f32 %v4139_v10, %v4138_v45  ;;  %5367 = vrcp.f32 %v4135_v16 }
 0x555   : > { %v4104_v35 = vsub.f32 %v7521_v58, %v4090_v33  ;;  %v4105_v32 = vsub.f32 %v7525_v4, %v4097_v11 }
 0x556   : > { %v7548_v34 = vpop.eup %5361  ;;  %v4147_v27 = vadd.f32 %v4146_v9, %v4145_v13  ;;  %v4141_v12 = vrot.slane %v4140_v38, 1 }
 0x557   : > { %v7550_v31 = vpop.eup %5363  ;;  %v4150_v1 = vsel %vm939_vm0, %v7548_v34, 0.0  ;;  %v4118_v24 = vmul.f32 1.442695, %v4104_v35  ;;  %v4120_v36 = vmul.f32 1.442695, %v4105_v32 }
 0x558   : > { %v4157_v61 = vsel %vm939_vm0, %v7550_v31, 0.0  ;;  %v4151_v19 = vrot.slane %v4150_v1, 4  ;;  %v4148_v51 = vrot.slane %v4147_v27, 1  ;;  %v4142_v62 = vadd.f32 %v4141_v12, %v4140_v38 }
 0x559   : > { %v5366_v7 = vpop.eup %5365  ;;  %v4158_v6 = vrot.slane %v4157_v61, 4  ;;  %5369 = vpow2.f32 %v4118_v24 }
 0x55a   : > { %v5368_v20 = vpop.eup %5367  ;;  %v7559_v59 = vmul.f32 %v5366_v7, %v7514_v47  ;;  %v4152_v40 = vadd.f32 %v4151_v19, %v4150_v1  ;;  %v4149_v4 = vadd.f32 %v4148_v51, %v4147_v27  ;;  %5371 = vpow2.f32 %v4120_v36 }
 0x55b   : > { %v7527_v46 = vpop.f32.mrf.mxu3  ;;  %v4159_v44 = vadd.f32 %v4158_v6, %v4157_v61  ;;  %v7562_v58 = vmul.f32 %v5368_v20, %v7519_v2  ;;  %5373 = vrcp.f32 %v4142_v62 }
 0x55c   : > { %v4194_v17 = vperm.slane %v7559_v59, 0  ;;  %v4210_v50 = vperm.slane %v7559_v59, 1  ;;  %v4234_v22 = vperm.slane %v7559_v59, 2  ;;  %v4153_v37 = vrot.slane %v4152_v40, 2 }
 0x55d   : > { %v4160_v2 = vrot.slane %v4159_v44, 2  ;;  %v4195_v28 = vperm.slane %v7562_v58, 0  ;;  %v4211_v42 = vperm.slane %v7562_v58, 1  ;;  %v4258_v21 = vperm.slane %v7559_v59, 3 }
 0x55e   : > { %5375 = vrcp.f32 %v4149_v4  ;;  %v7579_v8 = vadd.f32 %v7565_v57, %v7527_v46  ;;  %v4259_v29 = vperm.slane %v7562_v58, 3  ;;  %v4282_v30 = vperm.slane %v7559_v59, 4 }
 0x55f   : > { %v7586_v41 = vpop.eup %5369  ;;  %v4283_v45 = vperm.slane %v7562_v58, 4  ;;  %v4306_v26 = vperm.slane %v7559_v59, 5  ;;  %v4307_v13 = vperm.slane %v7562_v58, 5  ;;  %v4154_v63 = vadd.f32 %v4153_v37, %v4152_v40 }
 0x560   : > { %v7592_v54 = vpop.eup %5371  ;;  %v4161_v49 = vadd.f32 %v4160_v2, %v4159_v44  ;;  %v4331_v33 = vperm.slane %v7562_v58, 6  ;;  %v4354_v11 = vperm.slane %v7559_v59, 7  ;;  %v4202_v38 = vmul.f32 %v4194_v17, %v7579_v8 }
 0x561   : > { %v5374_v10 = vpop.eup %5373  ;;  %v4355_v1 = vperm.slane %v7562_v58, 7  ;;  %v4164_v61 = vsel %vm939_vm0, %v7586_v41, 0.0  ;;  %v4203_v32 = vmul.f32 %v4195_v28, %v7579_v8  ;;  %v4171_v7 = vsel %vm939_vm0, %v7592_v54, 0.0 }
 0x562   : > { %v7615_v51 = vmul.f32 %v5374_v10, %v7538_v39  ;;  %v4155_v24 = vrot.slane %v4154_v63, 1  ;;  %v4162_v20 = vrot.slane %v4161_v49, 1  ;;  %v4172_v4 = vrot.slane %v4171_v7, 4 }
 0x563   : > { %v7536_v3 = vpop.f32.mrf.mxu3 }
 0x564   : > { %v7571_v47 = vadd.f32 %v7565_v57, %v7536_v3  ;;  %v4235_v3 = vperm.slane %v7562_v58, 2  ;;  %v5376_v35 = vpop.eup %5375  ;;  %v4165_v58 = vrot.slane %v4164_v61, 4  ;;  %v4212_v37 = vperm.slane %v7615_v51, 1 }
 0x565   : > { %v7623_v44 = vmul.f32 %v5376_v35, %v7540_v25  ;;  %v4156_v2 = vadd.f32 %v4155_v24, %v4154_v63  ;;  %v4163_v28 = vadd.f32 %v4162_v20, %v4161_v49 }
 0x566   : > { %v4218_v46 = vmul.f32 %v4210_v50, %v7571_v47  ;;  %v4219_v16 = vmul.f32 %v4211_v42, %v7571_v47  ;;  %v4166_v10 = vadd.f32 %v4165_v58, %v4164_v61 }
 0x567   : > { %v4197_v49 = vperm.slane %v7623_v44, 0  ;;  %v4213_v35 = vperm.slane %v7623_v44, 1  ;;  %5377 = vrcp.f32 %v4156_v2 }
 0x568   : > { %v4226_v6 = vadd.f32 %v4218_v46, %v4202_v38  ;;  %v4260_v46 = vperm.slane %v7615_v51, 3  ;;  %5379 = vrcp.f32 %v4163_v28 }
 0x56b   : > { %v3843_v5 = vpop.f32.mrf.mxu3 }
 0x56c   : > { %v7582_v53 = vadd.f32 %v7565_v57, %v3843_v5  ;;  %v4330_v5 = vperm.slane %v7559_v59, 6  ;;  %v4227_v59 = vadd.f32 %v4219_v16, %v4203_v32 }
 0x56e   : > { %v4242_v27 = vmul.f32 %v4234_v22, %v7582_v53  ;;  %v4196_v22 = vperm.slane %v7615_v51, 0 }
 0x570   : > { %v4250_v40 = vadd.f32 %v4242_v27, %v4226_v6 }
 0x573   : > { %v3845_v18 = vpop.f32.mrf.mxu3 }
 0x574   : > { %v7598_v9 = vadd.f32 %v7565_v57, %v3845_v18  ;;  %v4243_v18 = vmul.f32 %v4235_v3, %v7582_v53 }
 0x576   : > { %v4266_v62 = vmul.f32 %v4258_v21, %v7598_v9  ;;  %v4251_v39 = vadd.f32 %v4243_v18, %v4227_v59  ;;  %v4220_v18 = vmul.f32 %v4212_v37, %v7571_v47  ;;  %v4204_v59 = vmul.f32 %v4196_v22, %v7579_v8 }
 0x578   : > { %v4274_v42 = vadd.f32 %v4266_v62, %v4250_v40  ;;  %v4261_v62 = vperm.slane %v7623_v44, 3 }
 0x57b   : > { %v3848_v60 = vpop.f32.mrf.mxu3 }
 0x57c   : > { %v7609_v12 = vadd.f32 %v7565_v57, %v3848_v60  ;;  %v4267_v60 = vmul.f32 %v4259_v29, %v7598_v9  ;;  %v4236_v29 = vperm.slane %v7615_v51, 2 }
 0x57e   : > { %v4290_v50 = vmul.f32 %v4282_v30, %v7609_v12  ;;  %v4275_v21 = vadd.f32 %v4267_v60, %v4251_v39  ;;  %v4173_v30 = vadd.f32 %v4172_v4, %v4171_v7  ;;  %v4167_v7 = vrot.slane %v4166_v10, 2 }
 0x57f   : > { %v4284_v60 = vperm.slane %v7615_v51, 4  ;;  %v4244_v4 = vmul.f32 %v4236_v29, %v7582_v53 }
 0x580   : > { %v4298_v16 = vadd.f32 %v4290_v50, %v4274_v42  ;;  %v5378_v50 = vpop.eup %5377  ;;  %v4168_v37 = vadd.f32 %v4167_v7, %v4166_v10  ;;  %v4268_v42 = vmul.f32 %v4260_v46, %v7598_v9 }
 0x581   : > { %v5380_v2 = vpop.eup %5379 }
 0x583   : > { %v3850_v55 = vpop.f32.mrf.mxu3 }
 0x584   : > { %v7618_v36 = vadd.f32 %v7565_v57, %v3850_v55  ;;  %v4291_v55 = vmul.f32 %v4283_v45, %v7609_v12 }
 0x586   : > { %v4314_v25 = vmul.f32 %v4306_v26, %v7618_v36  ;;  %v4315_v3 = vmul.f32 %v4307_v13, %v7618_v36  ;;  %v4299_v45 = vadd.f32 %v4291_v55, %v4275_v21  ;;  %v4237_v26 = vperm.slane %v7623_v44, 2 }
 0x587   : > { %v4228_v55 = vadd.f32 %v4220_v18, %v4204_v59  ;;  %v4269_v21 = vmul.f32 %v4261_v62, %v7598_v9  ;;  %v7669_v18 = vmul.f32 %v5378_v50, %v7548_v34 }
 0x588   : > { %v4322_v32 = vadd.f32 %v4314_v25, %v4298_v16  ;;  %v4323_v61 = vadd.f32 %v4315_v3, %v4299_v45  ;;  %v4245_v39 = vmul.f32 %v4237_v26, %v7582_v53  ;;  %v4308_v25 = vperm.slane %v7615_v51, 5 }
 0x589   : > { %v4309_v3 = vperm.slane %v7623_v44, 5  ;;  %v4252_v29 = vadd.f32 %v4244_v4, %v4228_v55  ;;  %v4292_v45 = vmul.f32 %v4284_v60, %v7609_v12  ;;  %v4198_v34 = vperm.slane %v7669_v18, 0 }
 0x58a   : > { %v4214_v62 = vperm.slane %v7669_v18, 1  ;;  %v4238_v60 = vperm.slane %v7669_v18, 2 }
 0x58b   : > { %v3853_v19 = vpop.f32.mrf.mxu3  ;;  %v4317_v26 = vmul.f32 %v4309_v3, %v7618_v36 }
 0x58c   : > { %v7626_v17 = vadd.f32 %v7565_v57, %v3853_v19  ;;  %v4222_v50 = vmul.f32 %v4214_v62, %v7571_v47 }
 0x58e   : > { %v4338_v38 = vmul.f32 %v4330_v5, %v7626_v17  ;;  %v4339_v27 = vmul.f32 %v4331_v33, %v7626_v17  ;;  %v4221_v5 = vmul.f32 %v4213_v35, %v7571_v47  ;;  %v4174_v33 = vrot.slane %v4173_v30, 2 }
 0x58f   : > { %v4316_v35 = vmul.f32 %v4308_v25, %v7618_v36  ;;  %v4286_v25 = vperm.slane %v7669_v18, 4 }
 0x590   : > { %v4346_v19 = vadd.f32 %v4338_v38, %v4322_v32  ;;  %v4347_v6 = vadd.f32 %v4339_v27, %v4323_v61  ;;  %v4333_v38 = vperm.slane %v7623_v44, 6  ;;  %v4169_v27 = vrot.slane %v4168_v37, 1 }
 0x591   : > { %v4356_v32 = vperm.slane %v7615_v51, 7  ;;  %v4357_v61 = vperm.slane %v7623_v44, 7 }
 0x593   : > { %v3855_v63 = vpop.f32.mrf.mxu3 }
 0x594   : > { %v7642_v13 = vadd.f32 %v7565_v57, %v3855_v63  ;;  %v4205_v57 = vmul.f32 %v4197_v49, %v7579_v8  ;;  %v4276_v63 = vadd.f32 %v4268_v42, %v4252_v29  ;;  %v4246_v42 = vmul.f32 %v4238_v60, %v7582_v53 }
 0x596   : > { %v4362_v24 = vmul.f32 %v4354_v11, %v7642_v13  ;;  %v4363_v20 = vmul.f32 %v4355_v1, %v7642_v13  ;;  %v4285_v11 = vperm.slane %v7623_v44, 4  ;;  %v4175_v1 = vadd.f32 %v4174_v33, %v4173_v30 }
 0x597   : > { %v4229_v28 = vadd.f32 %v4221_v5, %v4205_v57  ;;  %v4332_v30 = vperm.slane %v7615_v51, 6  ;;  %v7672_v5 = vmul.f32 %v5380_v2, %v7550_v31  ;;  %v4300_v7 = vadd.f32 %v4292_v45, %v4276_v63 }
 0x598   : > { %v4370_v40 = vadd.f32 %v4362_v24, %v4346_v19  ;;  %v4371_v58 = vadd.f32 %v4363_v20, %v4347_v6  ;;  %v4293_v10 = vmul.f32 %v4285_v11, %v7609_v12  ;;  %v4176_v46 = vrot.slane %v4175_v1, 1 }
 0x599   : > { %v4253_v16 = vadd.f32 %v4245_v39, %v4229_v28  ;;  %v4340_v19 = vmul.f32 %v4332_v30, %v7626_v17  ;;  %v4341_v6 = vmul.f32 %v4333_v38, %v7626_v17  ;;  %v4170_v24 = vadd.f32 %v4169_v27, %v4168_v37 }
 0x59a   : > { %v4378_v22 = vpack.c.bf16 %v4371_v58, %v4370_v40  ;;  %v4177_v20 = vadd.f32 %v4176_v46, %v4175_v1  ;;  %v4324_v59 = vadd.f32 %v4316_v35, %v4300_v7  ;;  %v4364_v51 = vmul.f32 %v4356_v32, %v7642_v13 }
 0x59b   : > { %v4277_v49 = vadd.f32 %v4269_v21, %v4253_v16  ;;  %v4365_v44 = vmul.f32 %v4357_v61, %v7642_v13  ;;  %v4215_v31 = vperm.slane %v7672_v5, 1  ;;  %v4199_v4 = vperm.slane %v7672_v5, 0 }
 0x59c   : > { %4893 = vmatmul.msk.bf16.vlgmr.msra.gmra.mxu0 %vm939_vm0, %v4378_v22  ;;  %v4348_v40 = vadd.f32 %v4340_v19, %v4324_v59  ;;  %v4262_v39 = vperm.slane %v7669_v18, 3  ;;  %v4239_v11 = vperm.slane %v7672_v5, 2  ;;  %5381 = vrcp.f32 %v4170_v24 }
 0x59d   : > { %v4301_v33 = vadd.f32 %v4293_v10, %v4277_v49  ;;  %v4223_v55 = vmul.f32 %v4215_v31, %v7571_v47  ;;  %v4263_v2 = vperm.slane %v7672_v5, 3  ;;  %5383 = vrcp.f32 %v4177_v20 }
 0x59e   : > { %v4372_v37 = vadd.f32 %v4364_v51, %v4348_v40  ;;  %v4206_v22 = vmul.f32 %v4198_v34, %v7579_v8  ;;  %v4207_v28 = vmul.f32 %v4199_v4, %v7579_v8  ;;  %v4247_v21 = vmul.f32 %v4239_v11, %v7582_v53 }
 0x59f   : > { %v4325_v57 = vadd.f32 %v4317_v26, %v4301_v33  ;;  %v4287_v3 = vperm.slane %v7672_v5, 4  ;;  %v4270_v45 = vmul.f32 %v4262_v39, %v7598_v9  ;;  %v4271_v10 = vmul.f32 %v4263_v2, %v7598_v9 }
 0x5a0   : > { %v4230_v29 = vadd.f32 %v4222_v50, %v4206_v22  ;;  %v4231_v16 = vadd.f32 %v4223_v55, %v4207_v28  ;;  %v4310_v38 = vperm.slane %v7669_v18, 5  ;;  %v4311_v27 = vperm.slane %v7672_v5, 5 }
 0x5a1   : > { %v4349_v58 = vadd.f32 %v4341_v6, %v4325_v57  ;;  %v4294_v35 = vmul.f32 %v4286_v25, %v7609_v12  ;;  %v4295_v26 = vmul.f32 %v4287_v3, %v7609_v12  ;;  %v4334_v61 = vperm.slane %v7669_v18, 6 }
 0x5a2   : > { %v5382_v46 = vpop.eup %5381  ;;  %v4254_v63 = vadd.f32 %v4246_v42, %v4230_v29  ;;  %v4255_v49 = vadd.f32 %v4247_v21, %v4231_v16  ;;  %v4335_v7 = vperm.slane %v7672_v5, 6  ;;  %v4318_v6 = vmul.f32 %v4310_v38, %v7618_v36 }
 0x5a3   : > { %v4373_v1 = vadd.f32 %v4365_v44, %v4349_v58  ;;  %v5384_v32 = vpop.eup %5383  ;;  %v4319_v24 = vmul.f32 %v4311_v27, %v7618_v36  ;;  %v4358_v20 = vperm.slane %v7669_v18, 7  ;;  %v4359_v59 = vperm.slane %v7672_v5, 7 }
 0x5a4   : > { %v4278_v33 = vadd.f32 %v4270_v45, %v4254_v63  ;;  %v4279_v19 = vadd.f32 %v4271_v10, %v4255_v49  ;;  %v4342_v44 = vmul.f32 %v4334_v61, %v7626_v17  ;;  %v4343_v34 = vmul.f32 %v4335_v7, %v7626_v17 }
 0x5a5   : > { %v4379_v30 = vpack.c.bf16 %v4373_v1, %v4372_v37  ;;  %v4192_v62 = vmul.f32 %v5382_v46, %v7586_v41  ;;  %v4193_v31 = vmul.f32 %v5384_v32, %v7592_v54  ;;  %v4366_v58 = vmul.f32 %v4358_v20, %v7642_v13 }
 0x5a6   : > { %v4302_v57 = vadd.f32 %v4294_v35, %v4278_v33  ;;  %v4303_v51 = vadd.f32 %v4295_v26, %v4279_v19  ;;  %v4367_v4 = vmul.f32 %v4359_v59, %v7642_v13 }
 0x5a7   : > { %v4216_v50 = vperm.slane %v4192_v62, 1  ;;  %v4217_v5 = vperm.slane %v4193_v31, 1  ;;  %v4200_v37 = vperm.slane %v4192_v62, 0  ;;  %v4240_v1 = vperm.slane %v4192_v62, 2 }
 0x5a8   : > { %v4326_v60 = vadd.f32 %v4318_v6, %v4302_v57  ;;  %v4327_v40 = vadd.f32 %v4319_v24, %v4303_v51  ;;  %v4201_v2 = vperm.slane %v4193_v31, 0  ;;  %v4241_v54 = vperm.slane %v4193_v31, 2 }
 0x5a9   : > { %v4224_v22 = vmul.f32 %v4216_v50, %v7571_v47  ;;  %v4225_v41 = vmul.f32 %v4217_v5, %v7571_v47  ;;  %v4264_v28 = vperm.slane %v4192_v62, 3  ;;  %v4265_v42 = vperm.slane %v4193_v31, 3  ;;  %v5266_v5 = vld [vmem:[%s5575_s12] ss:$0 sm:$0xff] }
 0x5aa   : > { %v4350_v39 = vadd.f32 %v4342_v44, %v4326_v60  ;;  %v4351_v18 = vadd.f32 %v4343_v34, %v4327_v40  ;;  %v4208_v21 = vmul.f32 %v4200_v37, %v7579_v8  ;;  %v4209_v25 = vmul.f32 %v4201_v2, %v7579_v8 }
 0x5ab   : > { %v4248_v3 = vmul.f32 %v4240_v1, %v7582_v53  ;;  %v4249_v29 = vmul.f32 %v4241_v54, %v7582_v53  ;;  %v4288_v45 = vperm.slane %v4192_v62, 4  ;;  %v4289_v10 = vperm.slane %v4193_v31, 4 }
 0x5ac   : > { %4894 = vmatmul.msk.bf16.gmra.mxu0 %vm939_vm0, %v4379_v30  ;;  %v4374_v55 = vadd.f32 %v4366_v58, %v4350_v39  ;;  %v4375_v11 = vadd.f32 %v4367_v4, %v4351_v18  ;;  %v4232_v30 = vadd.f32 %v4224_v22, %v4208_v21  ;;  %v4233_v38 = vadd.f32 %v4225_v41, %v4209_v25  ;;  %v5263_v58 = vld [vmem:[%s7937_s18] ss:$0 sm:$0xff] }
 0x5ad   : > { %v4272_v27 = vmul.f32 %v4264_v28, %v7598_v9  ;;  %v4273_v47 = vmul.f32 %v4265_v42, %v7598_v9  ;;  %v4312_v46 = vperm.slane %v4192_v62, 5  ;;  %v4313_v63 = vperm.slane %v4193_v31, 5  ;;  %v5264_v4 = vld [vmem:[%s5565_s30] ss:$0 sm:$0xff] }
 0x5ae   : > { %v4380_v16 = vpack.c.bf16 %v4375_v11, %v4374_v55  ;;  %v4256_v49 = vadd.f32 %v4248_v3, %v4232_v30  ;;  %v4257_v35 = vadd.f32 %v4249_v29, %v4233_v38  ;;  %v4296_v8 = vmul.f32 %v4288_v45, %v7609_v12  ;;  %v5265_v18 = vld [vmem:[%s5570_s24] ss:$0 sm:$0xff] }
 0x5af   : > { %v4297_v26 = vmul.f32 %v4289_v10, %v7609_v12  ;;  %v4336_v53 = vperm.slane %v4192_v62, 6  ;;  %v4337_v32 = vperm.slane %v4193_v31, 6  ;;  %v4320_v33 = vmul.f32 %v4312_v46, %v7618_v36 }
 0x5b0   : > { %v4280_v61 = vadd.f32 %v4272_v27, %v4256_v49  ;;  %v4281_v7 = vadd.f32 %v4273_v47, %v4257_v35  ;;  %v4321_v19 = vmul.f32 %v4313_v63, %v7618_v36  ;;  %v4360_v6 = vperm.slane %v4192_v62, 7 }
 0x5b1   : > { %v4361_v9 = vperm.slane %v4193_v31, 7  ;;  %v4344_v59 = vmul.f32 %v4336_v53, %v7626_v17  ;;  %v4345_v57 = vmul.f32 %v4337_v32, %v7626_v17 }
 0x5b2   : > { %v4304_v24 = vadd.f32 %v4296_v8, %v4280_v61  ;;  %v4305_v20 = vadd.f32 %v4297_v26, %v4281_v7  ;;  %v4368_v44 = vmul.f32 %v4360_v6, %v7642_v13 }
 0x5b3   : > { %v4369_v34 = vmul.f32 %v4361_v9, %v7642_v13 }
 0x5b4   : > { %v4328_v12 = vadd.f32 %v4320_v33, %v4304_v24  ;;  %v4329_v51 = vadd.f32 %v4321_v19, %v4305_v20 }
 0x5b6   : > { %v4352_v36 = vadd.f32 %v4344_v59, %v4328_v12  ;;  %v4353_v62 = vadd.f32 %v4345_v57, %v4329_v51 }
 0x5b8   : > { %v4376_v31 = vadd.f32 %v4368_v44, %v4352_v36  ;;  %v4377_v60 = vadd.f32 %v4369_v34, %v4353_v62 }
 0x5ba   : > { %v4381_v40 = vpack.c.bf16 %v4377_v60, %v4376_v31 }
 0x5bc   : > { %4895 = vmatmul.msk.bf16.gmra.mxu0 %vm939_vm0, %v4380_v16 }
 0x5cc   : > { %4896 = vmatmul.msk.bf16.gmra.mxu0 %vm939_vm0, %v4381_v40 }
 0x619   : > { %v4423_v39 = vpop.f32.mrf.mxu0 }
 0x61a   : > { %v4424_v17 = vadd.f32 %v5263_v58, %v4423_v39 }
 0x61c   : > { %v4447_v50 = vmul.f32 %v5264_v4, %v4424_v17 }
 0x61e   : > { %v4459_v55 = vadd.f32 %v5265_v18, %v4447_v50 }
 0x620   : > { %v4471_v11 = vadd.f32 %v5266_v5, %v4459_v55 }
 0x621   : > { %v4425_v13 = vpop.f32.mrf.mxu0 }
 0x622   : > { %v4479_v37 = vadd.f32 %v4471_v11, %v5827_v56  ;;  %v4426_v1 = vadd.f32 %v5263_v58, %v4425_v13 }
 0x624   : > { %4487 = vst.msk [vmem:[%s7738_s22] sm:$0xff] %vm939_vm0, %v4479_v37  ;;  %v4448_v2 = vmul.f32 %v5264_v4, %v4426_v1 }
 0x626   : > { %v4460_v22 = vadd.f32 %v5265_v18, %v4448_v2 }
 0x628   : > { %v4472_v41 = vadd.f32 %v5266_v5, %v4460_v22 }
 0x629   : > { %v4428_v54 = vpop.f32.mrf.mxu0 }
 0x62a   : > { %v4480_v28 = vadd.f32 %v4472_v41, %v5880_v15  ;;  %v4429_v42 = vadd.f32 %v5263_v58, %v4428_v54 }
 0x62c   : > { %4488 = vst.msk [vmem:[%s7738_s22 + $0x8] sm:$0xff] %vm939_vm0, %v4480_v28  ;;  %v4449_v21 = vmul.f32 %v5264_v4, %v4429_v42 }
 0x62e   : > { %v4461_v25 = vadd.f32 %v5265_v18, %v4449_v21 }
 0x630   : > { %v4473_v3 = vadd.f32 %v5266_v5, %v4461_v25 }
 0x631   : > { %v4430_v29 = vpop.f32.mrf.mxu0 }
 0x632   : > { %v4481_v56 = vadd.f32 %v4473_v3, %v5928_v48  ;;  %v4431_v16 = vadd.f32 %v5263_v58, %v4430_v29 }
 0x634   : > { %4489 = vst.msk [vmem:[%s7738_s22 + $0x10] sm:$0xff] %vm939_vm0, %v4481_v56  ;;  %v4450_v45 = vmul.f32 %v5264_v4, %v4431_v16 }
 0x636   : > { %v4462_v10 = vadd.f32 %v5265_v18, %v4450_v45 }
 0x638   : > { %v4474_v30 = vadd.f32 %v5266_v5, %v4462_v10 }
 0x639   : > { %v4433_v38 = vpop.f32.mrf.mxu0 }
 0x63a   : > { %v4482_v15 = vadd.f32 %v4474_v30, %v5971_v23  ;;  %v4434_v27 = vadd.f32 %v5263_v58, %v4433_v38 }
 0x63c   : > { %4490 = vst.msk [vmem:[%s7738_s22 + $0x18] sm:$0xff] %vm939_vm0, %v4482_v15  ;;  %v4451_v47 = vmul.f32 %v5264_v4, %v4434_v27 }
 0x63e   : > { %v4463_v46 = vadd.f32 %v5265_v18, %v4451_v47 }
 0x640   : > { %v4475_v63 = vadd.f32 %v5266_v5, %v4463_v46 }
 0x641   : > { %v4435_v49 = vpop.f32.mrf.mxu0 }
 0x642   : > { %v4483_v48 = vadd.f32 %v4475_v63, %v6020_v0  ;;  %v4436_v35 = vadd.f32 %v5263_v58, %v4435_v49 }
 0x644   : > { %4491 = vst.msk [vmem:[%s7738_s22 + $0x20] sm:$0xff] %vm939_vm0, %v4483_v48  ;;  %v4452_v8 = vmul.f32 %v5264_v4, %v4436_v35 }
 0x646   : > { %v4464_v26 = vadd.f32 %v5265_v18, %v4452_v8 }
 0x648   : > { %v4476_v53 = vadd.f32 %v5266_v5, %v4464_v26 }
 0x649   : > { %v4438_v32 = vpop.f32.mrf.mxu0 }
 0x64a   : > { %v4484_v23 = vadd.f32 %v4476_v53, %v6078_v52  ;;  %v4439_v61 = vadd.f32 %v5263_v58, %v4438_v32 }
 0x64c   : > { %4492 = vst.msk [vmem:[%s7738_s22 + $0x28] sm:$0xff] %vm939_vm0, %v4484_v23  ;;  %v4453_v7 = vmul.f32 %v5264_v4, %v4439_v61 }
 0x64e   : > { %v4465_v33 = vadd.f32 %v5265_v18, %v4453_v7 }
 0x650   : > { %v4477_v19 = vadd.f32 %v5266_v5, %v4465_v33 }
 0x651   : > { %v4440_v6 = vpop.f32.mrf.mxu0 }
 0x652   : > { %v4485_v0 = vadd.f32 %v4477_v19, %v6136_v43  ;;  %v4441_v9 = vadd.f32 %v5263_v58, %v4440_v6 }
 0x654   : > { %4493 = vst.msk [vmem:[%s7738_s22 + $0x30] sm:$0xff] %vm939_vm0, %v4485_v0  ;;  %v4454_v24 = vmul.f32 %v5264_v4, %v4441_v9 }
 0x656   : > { %v4466_v20 = vadd.f32 %v5265_v18, %v4454_v24 }
 0x658   : > { %v4478_v59 = vadd.f32 %v5266_v5, %v4466_v20 }
 0x65a   : > { %v4486_v57 = vadd.f32 %v4478_v59, %v6200_v14 }
 0x65c   : > { %4494 = vst.msk [vmem:[%s7738_s22 + $0x38] sm:$0xff] %vm939_vm0, %v4486_v57 }
 0x65d PF: > { %s69_s7 = sadd.s32 1, %s5391_s7  }
 0x65e   : > { %p66_p4 = scmp.ge.s32.totalorder %s69_s7, 4  }
 0x660   :  { %68 = sbr.rel (!%p66_p4) target bundleno = 45 (0x2d), region = 204 }

</bundles_post_ra>
